<compile_context>
chip_gen: v5e
topology: v5e:2x2
jax: 0.10.0
libtpu: 0.0.40
codegen_flags: <defaults>
</compile_context>

<pallas_src>
import jax
import jax.numpy as jnp
from jax.experimental import pallas as pl
from jax.experimental.pallas import tpu as pltpu

_LANE = 128          # lane width / logits packing factor
_MIN_TILE_B = 256    # floor: amortize ~0.35us per-grid-step overhead
_MAX_TILE_B = 2048   # cap: keep double-buffered VMEM footprint small everywhere


def _sigmoid(z):
    # Explicit form (exp on the EUP); avoids relying on a lax.logistic lowering.
    return 1.0 / (1.0 + jnp.exp(-z))


def _mlp_kernel(x_ref, w1_ref, b1_ref, w2_ref, b2_ref, w3_ref, b3_ref, o_ref):
    # x: (tile_b, 10) f32.  Weights pre-laid-out (in, out); w3 zero-padded to
    # lane width 128 so the final matmul output is lane-dense (logit in lane 0).
    hp = jax.lax.Precision.HIGHEST
    x = x_ref[...]
    h1 = _sigmoid(jnp.dot(x, w1_ref[...], preferred_element_type=jnp.float32,
                          precision=hp) + b1_ref[...])
    h2 = _sigmoid(jnp.dot(h1, w2_ref[...], preferred_element_type=jnp.float32,
                          precision=hp) + b2_ref[...])
    logits = jnp.dot(h2, w3_ref[...], preferred_element_type=jnp.float32,
                     precision=hp)                      # (tile_b, 128), lane 0 valid

    # Pack 128 consecutive rows' logits into one lane-dense row:
    # (tile_b,128) -> (nb,128,128) -> transpose last two dims (XLU vxpose per
    # block) -> keep sublane 0 -> (nb,128).  Cuts output HBM bytes ~128x vs the
    # padded slab while keeping stores unmasked.
    tile_b = logits.shape[0]
    nb = tile_b // _LANE
    lt = jnp.swapaxes(logits.reshape(nb, _LANE, _LANE), -1, -2)
    packed = lt[:, 0, :] + b3_ref[...]                  # bias broadcast-add, (nb,128)
    o_ref[...] = packed.astype(o_ref.dtype)


def prepare_params(params):
    """One-time layout prep (hoisted out of the per-call forward path).

    params: PyTorch Linear convention -- weights (out, in), biases (out,).
    Returns kernel-layout params: weights (in, out), biases (1, out); the final
    layer's weight zero-padded to lane width 128 and its bias broadcast to 128
    lanes (added after the in-kernel pack).
    """
    w3 = params["w3"].astype(jnp.float32)                       # (1, 10)
    b3 = params["b3"].astype(jnp.float32)                       # (1,)
    k = w3.shape[1]
    w3_pad = jnp.zeros((k, _LANE), jnp.float32).at[:, 0].set(w3[0, :])
    b3_b = jnp.full((1, _LANE), b3[0], jnp.float32)
    return {
        "w1": params["w1"].T.astype(jnp.float32),               # (10, 10) in->out
        "b1": params["b1"].reshape(1, -1).astype(jnp.float32),  # (1, 10)
        "w2": params["w2"].T.astype(jnp.float32),
        "b2": params["b2"].reshape(1, -1).astype(jnp.float32),
        "w3": w3_pad,                                           # (10, 128)
        "b3": b3_b,                                             # (1, 128)
    }


def _choose_tile_b(batch):
    # Multiple of 128 (needed by the lane-pack transpose), floor 256 (per-step
    # overhead), cap 2048 (VMEM), and sized ~B/8 so the grid has ~8 steps --
    # enough iterations to feed both v7x TensorCores and overlap DMA/compute.
    t = ((pl.cdiv(batch, 8) + _LANE - 1) // _LANE) * _LANE
    return int(min(max(t, _MIN_TILE_B), _MAX_TILE_B))


def neural_network_forward(x, prepared, *, tile_b=None):
    """x: (B, 10) float32; prepared: output of prepare_params(). Returns (B, 1)."""
    batch, d_in = x.shape
    if tile_b is None:
        tile_b = _choose_tile_b(batch)
    assert tile_b % _LANE == 0
    num_steps = pl.cdiv(batch, tile_b)      # ragged tail: Pallas masks the copy
    nb = tile_b // _LANE

    # Constant index_map -> the tiny weights stay VMEM-resident (no re-DMA).
    resident = lambda a: pl.BlockSpec(a.shape, lambda i: (0,) * a.ndim)

    out = pl.pallas_call(
        _mlp_kernel,
        out_shape=jax.ShapeDtypeStruct((num_steps, nb, _LANE), jnp.float32),
        grid=(num_steps,),
        in_specs=[
            pl.BlockSpec((tile_b, d_in), lambda i: (i, 0)),
            resident(prepared["w1"]), resident(prepared["b1"]),
            resident(prepared["w2"]), resident(prepared["b2"]),
            resident(prepared["w3"]), resident(prepared["b3"]),
        ],
        # Leading grid dim squeezed; last two block dims equal the full array
        # dims, so any nb (even < 8) satisfies the (8,128) layout rule.
        out_specs=pl.BlockSpec((None, nb, _LANE), lambda i: (i, 0, 0)),
        compiler_params=pltpu.CompilerParams(
            dimension_semantics=("parallel",)),
    )(x, prepared["w1"], prepared["b1"], prepared["w2"], prepared["b2"],
      prepared["w3"], prepared["b3"])

    # Flattened row-major, slot s*tile_b + r*128 + l holds batch row's logit;
    # slots >= B (partial-tile garbage) are discarded here.
    return out.reshape(-1)[:batch].reshape(batch, 1)


def _ref_forward(x, params):
    hp = jax.lax.Precision.HIGHEST
    h = _sigmoid(jnp.dot(x, params["w1"].T, precision=hp) + params["b1"])
    h = _sigmoid(jnp.dot(h, params["w2"].T, precision=hp) + params["b2"])
    return jnp.dot(h, params["w3"].T, precision=hp) + params["b3"]


if __name__ == "__main__":
    key = jax.random.PRNGKey(0)
    kx, k1, k2, k3, k4, k5, k6 = jax.random.split(key, 7)

    # Ragged batch (not a multiple of the tile) to exercise the no-pad path.
    B, D = 2000, 10
    x = jax.random.normal(kx, (B, D), dtype=jnp.float32)

    # Deterministic params (PyTorch Linear convention: weight (out, in)).
    params = {
        "w1": jax.random.normal(k1, (10, 10), dtype=jnp.float32) * 0.3,
        "b1": jax.random.normal(k2, (10,), dtype=jnp.float32) * 0.1,
        "w2": jax.random.normal(k3, (10, 10), dtype=jnp.float32) * 0.3,
        "b2": jax.random.normal(k4, (10,), dtype=jnp.float32) * 0.1,
        "w3": jax.random.normal(k5, (1, 10), dtype=jnp.float32) * 0.3,
        "b3": jax.random.normal(k6, (1,), dtype=jnp.float32) * 0.1,
    }

    prepared = prepare_params(params)       # one-time layout prep (hoisted)

    out = neural_network_forward(x, prepared)
    out = jax.block_until_ready(out)

    ref = _ref_forward(x, params)
    assert out.shape == (B, 1), out.shape
    assert jnp.allclose(out, ref, atol=1e-4, rtol=1e-4), (
        float(jnp.max(jnp.abs(out - ref))))

    print("KERNEL_OK")
</pallas_src>

<mosaic_0001>
module attributes {stable_mosaic.version = 11 : i64} {
  func.func @_mlp_kernel(%arg0: i32, %arg1: memref<256x10xf32, #tpu.memory_space<vmem>>, %arg2: memref<10x10xf32, #tpu.memory_space<vmem>>, %arg3: memref<1x10xf32, #tpu.memory_space<vmem>>, %arg4: memref<10x10xf32, #tpu.memory_space<vmem>>, %arg5: memref<1x10xf32, #tpu.memory_space<vmem>>, %arg6: memref<10x128xf32, #tpu.memory_space<vmem>>, %arg7: memref<1x128xf32, #tpu.memory_space<vmem>>, %arg8: memref<1x2x128xf32, #tpu.memory_space<vmem>>) attributes {dimension_semantics = [#tpu.dimension_semantics<parallel>], iteration_bounds = array<i64: 8>, scalar_prefetch = 0 : i64, scratch_operands = 0 : i64, tpu.core_type = #tpu.core_type<tc>, window_params = [{transform_indices = @transform_0, window_bounds = array<i64: 256, 10>}, {pipeline_mode = #tpu.pipeline_mode<synchronous>, transform_indices = @transform_1, window_bounds = array<i64: 10, 10>}, {pipeline_mode = #tpu.pipeline_mode<synchronous>, transform_indices = @transform_2, window_bounds = array<i64: 1, 10>}, {pipeline_mode = #tpu.pipeline_mode<synchronous>, transform_indices = @transform_3, window_bounds = array<i64: 10, 10>}, {pipeline_mode = #tpu.pipeline_mode<synchronous>, transform_indices = @transform_4, window_bounds = array<i64: 1, 10>}, {pipeline_mode = #tpu.pipeline_mode<synchronous>, transform_indices = @transform_5, window_bounds = array<i64: 10, 128>}, {pipeline_mode = #tpu.pipeline_mode<synchronous>, transform_indices = @transform_6, window_bounds = array<i64: 1, 128>}, {transform_indices = @transform_7, window_bounds = array<i64: 1, 2, 128>}]} {
    %c0 = arith.constant 0 : index
    %c0_0 = arith.constant 0 : index
    %0 = vector.load %arg1[%c0, %c0_0] : memref<256x10xf32, #tpu.memory_space<vmem>>, vector<256x10xf32>
    %c0_1 = arith.constant 0 : index
    %c0_2 = arith.constant 0 : index
    %1 = vector.load %arg2[%c0_1, %c0_2] : memref<10x10xf32, #tpu.memory_space<vmem>>, vector<10x10xf32>
    %cst = arith.constant dense<0.000000e+00> : vector<256x10xf32>
    %2 = tpu.matmul %0, %1, %cst {dimension_numbers = #tpu.dot_dimension_numbers<[1], [0], [0], [1], [0, 0, 1, 1], [], []>, precision = #tpu.contract_precision<fp32>} : vector<256x10xf32>, vector<10x10xf32>, vector<256x10xf32> -> vector<256x10xf32>
    %c0_3 = arith.constant 0 : index
    %c0_4 = arith.constant 0 : index
    %3 = vector.load %arg3[%c0_3, %c0_4] : memref<1x10xf32, #tpu.memory_space<vmem>>, vector<1x10xf32>
    %4 = vector.broadcast %3 : vector<1x10xf32> to vector<256x10xf32>
    %5 = arith.addf %2, %4 : vector<256x10xf32>
    %cst_5 = arith.constant 0.000000e+00 : f32
    %6 = vector.broadcast %cst_5 : f32 to vector<256x10xf32>
    %7 = arith.subf %6, %5 : vector<256x10xf32>
    %8 = math.exp %7 : vector<256x10xf32>
    %cst_6 = arith.constant 1.000000e+00 : f32
    %9 = vector.broadcast %cst_6 : f32 to vector<256x10xf32>
    %10 = arith.addf %9, %8 : vector<256x10xf32>
    %cst_7 = arith.constant 1.000000e+00 : f32
    %11 = vector.broadcast %cst_7 : f32 to vector<256x10xf32>
    %12 = arith.divf %11, %10 : vector<256x10xf32>
    %c0_8 = arith.constant 0 : index
    %c0_9 = arith.constant 0 : index
    %13 = vector.load %arg4[%c0_8, %c0_9] : memref<10x10xf32, #tpu.memory_space<vmem>>, vector<10x10xf32>
    %cst_10 = arith.constant dense<0.000000e+00> : vector<256x10xf32>
    %14 = tpu.matmul %12, %13, %cst_10 {dimension_numbers = #tpu.dot_dimension_numbers<[1], [0], [0], [1], [0, 0, 1, 1], [], []>, precision = #tpu.contract_precision<fp32>} : vector<256x10xf32>, vector<10x10xf32>, vector<256x10xf32> -> vector<256x10xf32>
    %c0_11 = arith.constant 0 : index
    %c0_12 = arith.constant 0 : index
    %15 = vector.load %arg5[%c0_11, %c0_12] : memref<1x10xf32, #tpu.memory_space<vmem>>, vector<1x10xf32>
    %16 = vector.broadcast %15 : vector<1x10xf32> to vector<256x10xf32>
    %17 = arith.addf %14, %16 : vector<256x10xf32>
    %cst_13 = arith.constant 0.000000e+00 : f32
    %18 = vector.broadcast %cst_13 : f32 to vector<256x10xf32>
    %19 = arith.subf %18, %17 : vector<256x10xf32>
    %20 = math.exp %19 : vector<256x10xf32>
    %cst_14 = arith.constant 1.000000e+00 : f32
    %21 = vector.broadcast %cst_14 : f32 to vector<256x10xf32>
    %22 = arith.addf %21, %20 : vector<256x10xf32>
    %cst_15 = arith.constant 1.000000e+00 : f32
    %23 = vector.broadcast %cst_15 : f32 to vector<256x10xf32>
    %24 = arith.divf %23, %22 : vector<256x10xf32>
    %c0_16 = arith.constant 0 : index
    %c0_17 = arith.constant 0 : index
    %25 = vector.load %arg6[%c0_16, %c0_17] : memref<10x128xf32, #tpu.memory_space<vmem>>, vector<10x128xf32>
    %cst_18 = arith.constant dense<0.000000e+00> : vector<256x128xf32>
    %26 = tpu.matmul %24, %25, %cst_18 {dimension_numbers = #tpu.dot_dimension_numbers<[1], [0], [0], [1], [0, 0, 1, 1], [], []>, precision = #tpu.contract_precision<fp32>} : vector<256x10xf32>, vector<10x128xf32>, vector<256x128xf32> -> vector<256x128xf32>
    %27 = vector.shape_cast %26 : vector<256x128xf32> to vector<2x128x128xf32>
    %28 = tpu.transpose %27, [0, 2, 1] : vector<2x128x128xf32> -> vector<2x128x128xf32>
    %29 = vector.extract_strided_slice %28 {offsets = [0, 0, 0], sizes = [2, 1, 128], strides = [1, 1, 1]} : vector<2x128x128xf32> to vector<2x1x128xf32>
    %30 = vector.shape_cast %29 : vector<2x1x128xf32> to vector<2x128xf32>
    %c0_19 = arith.constant 0 : index
    %c0_20 = arith.constant 0 : index
    %31 = vector.load %arg7[%c0_19, %c0_20] : memref<1x128xf32, #tpu.memory_space<vmem>>, vector<1x128xf32>
    %32 = vector.broadcast %31 : vector<1x128xf32> to vector<2x128xf32>
    %33 = arith.addf %30, %32 : vector<2x128xf32>
    %c0_21 = arith.constant 0 : index
    %c0_22 = arith.constant 0 : index
    %c0_23 = arith.constant 0 : index
    %34 = vector.load %arg8[%c0_21, %c0_22, %c0_23] : memref<1x2x128xf32, #tpu.memory_space<vmem>>, vector<1x2x128xf32>
    %35 = vector.shape_cast %34 : vector<1x2x128xf32> to vector<2x128xf32>
    %36 = vector.shape_cast %33 : vector<2x128xf32> to vector<1x2x128xf32>
    tpu.vector_store %arg8[%c0_21, %c0_22, %c0_23], %36 {strides = array<i32>} : memref<1x2x128xf32, #tpu.memory_space<vmem>>, vector<1x2x128xf32>,
    return
  }
  func.func @transform_0(%arg0: i32) -> (i32, i32) {
    %c0_i32 = arith.constant 0 : i32
    %c0_i32_0 = arith.constant 0 : i32
    return %arg0, %c0_i32 : i32, i32
  }
  func.func @transform_1(%arg0: i32) -> (i32, i32) {
    %c0_i32 = arith.constant 0 : i32
    %c0_i32_0 = arith.constant 0 : i32
    %c0_i32_1 = arith.constant 0 : i32
    return %c0_i32, %c0_i32_0 : i32, i32
  }
  func.func @transform_2(%arg0: i32) -> (i32, i32) {
    %c0_i32 = arith.constant 0 : i32
    %c0_i32_0 = arith.constant 0 : i32
    %c0_i32_1 = arith.constant 0 : i32
    return %c0_i32, %c0_i32_0 : i32, i32
  }
  func.func @transform_3(%arg0: i32) -> (i32, i32) {
    %c0_i32 = arith.constant 0 : i32
    %c0_i32_0 = arith.constant 0 : i32
    %c0_i32_1 = arith.constant 0 : i32
    return %c0_i32, %c0_i32_0 : i32, i32
  }
  func.func @transform_4(%arg0: i32) -> (i32, i32) {
    %c0_i32 = arith.constant 0 : i32
    %c0_i32_0 = arith.constant 0 : i32
    %c0_i32_1 = arith.constant 0 : i32
    return %c0_i32, %c0_i32_0 : i32, i32
  }
  func.func @transform_5(%arg0: i32) -> (i32, i32) {
    %c0_i32 = arith.constant 0 : i32
    %c0_i32_0 = arith.constant 0 : i32
    %c0_i32_1 = arith.constant 0 : i32
    return %c0_i32, %c0_i32_0 : i32, i32
  }
  func.func @transform_6(%arg0: i32) -> (i32, i32) {
    %c0_i32 = arith.constant 0 : i32
    %c0_i32_0 = arith.constant 0 : i32
    %c0_i32_1 = arith.constant 0 : i32
    return %c0_i32, %c0_i32_0 : i32, i32
  }
  func.func @transform_7(%arg0: i32) -> (i32, i32, i32) {
    %c0_i32 = arith.constant 0 : i32
    %c0_i32_0 = arith.constant 0 : i32
    %c0_i32_1 = arith.constant 0 : i32
    return %arg0, %c0_i32, %c0_i32_0 : i32, i32, i32
  }
}

</mosaic_0001>

<bundles_post_ra>
// kernel: tpu_custom_call.1
= control target key start
LH: loop header
LB: loop body
LE: loop exit
PB: predicated region body
PF: predicated region fallthrough
CT: control target
= control target key end

     0   :  { %12 = vsyncpa [#allocation3], 0  ;;  %s9196_s0 = inlined_call_operand.vmem [shape: f32[2000,10], index: 0, kind: input, shape index: {}]   ;;  %s9197_s1 = inlined_call_operand.vmem [shape: f32[10,10], index: 1, kind: input, shape index: {}]   ;;  %s9198_s2 = inlined_call_operand.vmem [shape: f32[1,10], index: 2, kind: input, shape index: {}]   ;;  %s9199_s3 = inlined_call_operand.vmem [shape: f32[10,10], index: 3, kind: input, shape index: {}]   ;;  %s9200_s4 = inlined_call_operand.vmem [shape: f32[1,10], index: 4, kind: input, shape index: {}]   ;;  %s9201_s5 = inlined_call_operand.vmem [shape: f32[10,128], index: 5, kind: input, shape index: {}]   ;;  %s9202_s6 = inlined_call_operand.vmem [shape: f32[1,128], index: 6, kind: input, shape index: {}]   ;;  %s9203_s7 = inlined_call_operand.hbm [shape: f32[8,2,128], index: 7, kind: output, shape index: {}]  }
   0x1   :  { %14 = vsyncpa [#allocation3 + $0x1], 0  ;;  %s5790_s24 = smov 0   ;;  %s5792_s25 = smov 0  }
   0x2   :  { %s5794_s26 = smov 0   ;;  %s5796_s27 = smov 0  }
   0x3 LB: > { %s5811_s28 = sadd.s32 4294967295, %s5748_s27   ;;  %s5372_s29 = sadd.s32 4294967294, %s5748_s27   ;;  %s5748_s27 = sphi %s5796_s27, %s9667_s27   ;;  %s5744_s26 = sphi %s5794_s26, %s9666_s26   ;;  %s5740_s25 = sphi %s5792_s25, %s9665_s25   ;;  %s5736_s24 = sphi %s5790_s24, %s9664_s24  }
   0x4   : > { %s5815_s30 = sadd.s32 1, %s5748_s27   ;;  %s179_s8 = sadd.s32 1, %s5744_s26 }
   0x5   : > { %s176_s9 = ssub.s32 %s5748_s27, %s5815_s30  ;;  %p189_p0 = scmp.ne.s32.totalorder %s5744_s26, %s5740_s25 }
   0x6   : > { %p177_p1 = scmp.eq.s32.totalorder %s176_s9, 0  ;;  %p190_p2 = scmp.eq.s32.totalorder %s5811_s28, 7 }
   0x7   : > { %p195_p3 = scmp.ne.s32.totalorder %s5740_s25, %s5736_s24  ;;  %p196_p4 = scmp.eq.s32.totalorder %s5372_s29, 7 }
   0x8   : > { %s5826_s10 = scalar_select %p177_p1, %s5744_s26, %s179_s8  }
   0x9   : > { %p5828_p5 = por %p190_p2, %p189_p0  ;;  %p5832_p6 = por %p196_p4, %p195_p3 }
   0xa   : > { %p5375_p7 = scmp.ge.s32.totalorder %s5748_s27, 1  ;;  %p249_p8 = scmp.lt.s32.totalorder %s5748_s27, 9 }
   0xc   : > { %p250_p9 = pnand %p5375_p7, %p249_p8 }
   0xe   : > { %253 = sbr.rel (%p250_p9) target bundleno = 1542 (0x606), region = 48 }
  0x13   : > { %v332_v0 = vld [vmem:[%s9197_s1 + $0x8] sm:$0x3]  ;;  %vm434_vm0 = vcmask 1041408   ;;  %v331_v1 = vld [vmem:[%s9197_s1] sm:$0xff]  ;;  %s5377_s17 = sshll.u32 %s5811_s28, 5  ;;  %vm337_vm1 = vcmask 80896  }
  0x14   : > { %v436_v2 = vsel %vm434_vm0, %v332_v0, 0  ;;  %v5846_v3 = vand.u32 4294901760, %v331_v1  ;;  %p290_p10 = scmp.lt.s32.totalorder %s5377_s17, 249  ;;  %s282_s22 = sand.u32 1, %s5740_s25  }
  0x15   : > { %v452_v4 = vand.u32 4294901760, %v436_v2  ;;  %s5376_s23 = sshll.u32 %s282_s22, 1  ;;  %s5380_s29 = sshll.u32 %s5811_s28, 1 }
  0x16   : > { %v734_v5 = vsub.f32 %v331_v1, %v5846_v3  ;;  %s9669_s17 = smov (!%p290_p10, %s5377_s17), 249  ;;  %s5308_s15 = scalar_lea.hbm %s9203_s7, %s5380_s29 }
  0x17   : > { %v728_v6 = vsub.f32 %v436_v2, %v452_v4  ;;  %453 = vmatpush.msra.mxu0 %v452_v4  ;;  %5383 = vmatpush.msra.mxu2 %v452_v4  ;;  %s5378_s18 = sshll.u32 %s9669_s17, 3  ;;  %s284_s16 = scalar_lea.vmem [#allocation2], %s5376_s23 }
  0x18   : > { %v735_v7 = vand.u32 4294901760, %v734_v5  ;;  %s5852_s21 = scalar_lea.vmem %s9196_s0, %s5378_s18  ;;  %s5310_s17 = sshll.u32 %s284_s16, 4  ;;  %s5311_s17 = int_to_ptr.vmem [resolvable:$true] %s5310_s17 }
  0x19   : > { %v729_v8 = vand.u32 4294901760, %v728_v6  ;;  %455 = vmatpush.msra.mxu0 %v5846_v3  ;;  %5384 = vmatpush.msra.mxu2 %v5846_v3  ;;  %v299_v10 = vld [vmem:[%s5852_s21] sm:$0xff]  ;;  %v300_v12 = vld [vmem:[%s5852_s21 + $0x8] sm:$0xff]  ;;  %v301_v18 = vld [vmem:[%s5852_s21 + $0x10] sm:$0xff]  ;;  %s5312_s18 = sshll.u32 %s5308_s15, 4  ;;  %s5298_s28 = scalar_lea.sflag [#allocation3], %s282_s22  ;;  %s5313_s18 = int_to_ptr.hbm [resolvable:$true] %s5312_s18 }
  0x1a   : > { %v736_v9 = vsub.f32 %v734_v5, %v735_v7  ;;  %v315_v11 = vld [vmem:[%s5852_s21 + $0x80] sm:$0xff]  ;;  %v339_v14 = vsel %vm337_vm1, %v299_v10, 0  ;;  %v342_v16 = vsel %vm337_vm1, %v300_v12, 0  ;;  %v316_v17 = vld [vmem:[%s5852_s21 + $0x88] sm:$0xff]  ;;  %v317_v19 = vld [vmem:[%s5852_s21 + $0x90] sm:$0xff]  ;;  %v345_v26 = vsel %vm337_vm1, %v301_v18, 0 }
  0x1b   : > { %884 = vmatpush.msrb.mxu2 %v728_v6  ;;  %v730_v13 = vsub.f32 %v728_v6, %v729_v8  ;;  %v387_v15 = vsel %vm337_vm1, %v315_v11, 0  ;;  %1277 = vmatpush.msrb.mxu0 %v729_v8  ;;  %v5865_v21 = vand.u32 4294901760, %v339_v14  ;;  %v5869_v23 = vand.u32 4294901760, %v342_v16  ;;  %v302_v41 = vld [vmem:[%s5852_s21 + $0x18] sm:$0xff]  ;;  %v303_v57 = vld [vmem:[%s5852_s21 + $0x20] sm:$0xff]  ;;  %v320_v8 = vld [vmem:[%s5852_s21 + $0xa8] sm:$0xff] }
  0x1c   : > { %v737_v20 = vand.u32 4294901760, %v736_v9  ;;  %v5867_v22 = vand.u32 4294901760, %v387_v15  ;;  %v390_v25 = vsel %vm337_vm1, %v316_v17, 0  ;;  %v393_v27 = vsel %vm337_vm1, %v317_v19, 0  ;;  %v318_v42 = vld [vmem:[%s5852_s21 + $0x98] sm:$0xff]  ;;  %v319_v58 = vld [vmem:[%s5852_s21 + $0xa0] sm:$0xff] }
  0x1d   : > { %887 = vmatpush.msrb.mxu2 %v734_v5  ;;  %v731_v24 = vand.u32 4294901760, %v730_v13  ;;  %1281 = vmatpush.msrb.mxu0 %v735_v7  ;;  %v5875_v28 = vsub.f32 %v339_v14, %v5865_v21  ;;  %v5880_v30 = vand.u32 4294901760, %v390_v25  ;;  %v5883_v31 = vsub.f32 %v342_v16, %v5869_v23  ;;  %v304_v7 = vld [vmem:[%s5852_s21 + $0x28] sm:$0xff]  ;;  %s5700_s19 = sshra.s32 %s5313_s18, 4  ;;  %s5706_s23 = scalar_lea.hbm %s9203_s7, 16  ;;  %s5701_s19 = int_to_ptr.hbm [resolvable:$true] %s5700_s19 }
  0x1e   : > { %v5878_v29 = vsub.f32 %v387_v15, %v5867_v22  ;;  %v5890_v35 = vand.u32 4294901760, %v345_v26  ;;  %v5892_v36 = vand.u32 4294901760, %v393_v27  ;;  %v348_v46 = vsel %vm337_vm1, %v302_v41, 0  ;;  %s5702_s20 = scalar_lea.hbm %s5701_s19, 2  ;;  %p5707_p0 = scmp.lt.s32.totalorder %s5701_s19, %s9203_s7 }
  0x1f   : > { %732 = vmatpush.msra.mxu1 %v731_v24  ;;  %5385 = vmatpush.msra.mxu3 %v731_v24  ;;  %v9225_v32 = vand.u32 4294901760, %v5875_v28  ;;  %v5888_v34 = vsub.f32 %v390_v25, %v5880_v30  ;;  %v9224_v39 = vand.u32 4294901760, %v5883_v31  ;;  %v396_v50 = vsel %vm337_vm1, %v318_v42, 0  ;;  %v305_v24 = vld [vmem:[%s5852_s21 + $0x30] sm:$0xff]  ;;  %p5703_p11 = scmp.ne.s32.totalorder %s5701_s19, %s5702_s20  ;;  %p5708_p1 = scmp.lt.s32.totalorder %s5706_s23, %s5702_s20 }
  0x20   : > { %v9212_v33 = vand.u32 4294901760, %v5878_v29  ;;  %v5907_v45 = vsub.f32 %v345_v26, %v5890_v35  ;;  %v5919_v49 = vsub.f32 %v393_v27, %v5892_v36  ;;  %v5922_v51 = vand.u32 4294901760, %v348_v46  ;;  %v321_v25 = vld [vmem:[%s5852_s21 + $0xb0] sm:$0xff] }
  0x21   : > { %738 = vmatpush.msra.mxu1 %v737_v20  ;;  %5386 = vmatpush.msra.mxu3 %v737_v20  ;;  %v459_v37 = vsub.f32 %v5875_v28, %v9225_v32  ;;  %v9211_v40 = vand.u32 4294901760, %v5888_v34  ;;  %v467_v47 = vsub.f32 %v5883_v31, %v9224_v39  ;;  %v5924_v52 = vand.u32 4294901760, %v396_v50  ;;  %p5704_p12 = pnand %p5703_p11, %p5828_p5  ;;  %p5709_p2 = por %p5708_p1, %p5707_p0 }
  0x22   : > { %740 = vmatmul.f32.vlgmr.msra.gmra.mxu1 %v5865_v21  ;;  %804 = vmatmul.f32.vlgmr.msra.gmra.mxu3 %v5867_v22  ;;  %v587_v38 = vsub.f32 %v5878_v29, %v9212_v33  ;;  %v9223_v55 = vand.u32 4294901760, %v5907_v45  ;;  %v9209_v56 = vand.u32 4294901760, %v5919_v49  ;;  %v5933_v59 = vsub.f32 %v348_v46, %v5922_v51 }
  0x23   : > { %1064 = vmatpush.msrb.mxu3 %v452_v4  ;;  %1426 = vmatpush.msrb.mxu1 %v452_v4  ;;  %v460_v43 = vand.u32 4294901760, %v459_v37  ;;  %v595_v48 = vsub.f32 %v5888_v34, %v9211_v40  ;;  %v468_v53 = vand.u32 4294901760, %v467_v47  ;;  %v5936_v60 = vsub.f32 %v396_v50, %v5924_v52  ;;  %v326_v40 = vld [vmem:[%s5852_s21 + $0xd8] sm:$0xff]  ;;  %p5705_p13 = pneg %p5704_p12 }
  0x24   : > { %v588_v44 = vand.u32 4294901760, %v587_v38  ;;  %v475_v61 = vsub.f32 %v5907_v45, %v9223_v55  ;;  %v603_v62 = vsub.f32 %v5919_v49, %v9209_v56  ;;  %v351_v63 = vsel %vm337_vm1, %v303_v57, 0  ;;  %v328_v55 = vld [vmem:[%s5852_s21 + $0xe8] sm:$0xff] }
  0x25   : > { %1066 = vmatpush.msrb.mxu3 %v5846_v3  ;;  %1428 = vmatpush.msrb.mxu1 %v5846_v3  ;;  %v596_v54 = vand.u32 4294901760, %v595_v48  ;;  %v399_v0 = vsel %vm337_vm1, %v319_v58, 0  ;;  %v9220_v1 = vand.u32 4294901760, %v5933_v59  ;;  %v9208_v2 = vand.u32 4294901760, %v5936_v60  ;;  %p5710_p3 = pnand %p5709_p2, %p5705_p13 }
  0x26   : > { %461 = vmatmul.f32.vlgmr.msra.gmra.mxu0 %v460_v43  ;;  %589 = vmatmul.f32.vlgmr.msra.gmra.mxu2 %v588_v44  ;;  %v476_v3 = vand.u32 4294901760, %v475_v61  ;;  %v604_v4 = vand.u32 4294901760, %v603_v62  ;;  %v5950_v5 = vand.u32 4294901760, %v351_v63  ;;  %v5952_v6 = vand.u32 4294901760, %v399_v0 }
  0x27   : > { %v483_v9 = vsub.f32 %v5933_v59, %v9220_v1  ;;  %v611_v10 = vsub.f32 %v5936_v60, %v9208_v2  ;;  %v354_v13 = vsel %vm337_vm1, %v304_v7, 0  ;;  %v402_v14 = vsel %vm337_vm1, %v320_v8, 0 }
  0x28   : > { %v5963_v11 = vsub.f32 %v351_v63, %v5950_v5  ;;  %v5966_v12 = vsub.f32 %v399_v0, %v5952_v6  ;;  %v5970_v16 = vand.u32 4294901760, %v354_v13  ;;  %v5976_v20 = vand.u32 4294901760, %v402_v14 }
  0x29   : > { %v484_v15 = vand.u32 4294901760, %v483_v9  ;;  %v612_v17 = vand.u32 4294901760, %v611_v10  ;;  %v357_v41 = vsel %vm337_vm1, %v305_v24, 0  ;;  %v405_v42 = vsel %vm337_vm1, %v321_v25, 0 }
  0x2a   : > { %744 = vmatmul.f32.gmra.mxu1 %v5869_v23  ;;  %808 = vmatmul.f32.gmra.mxu3 %v5880_v30  ;;  %v9219_v18 = vand.u32 4294901760, %v5963_v11  ;;  %v9207_v19 = vand.u32 4294901760, %v5966_v12  ;;  %v5981_v26 = vsub.f32 %v354_v13, %v5970_v16  ;;  %v5990_v38 = vsub.f32 %v402_v14, %v5976_v20  ;;  %v307_v13 = vld [vmem:[%s5852_s21 + $0x40] sm:$0xff] }
  0x2b   : > { %v5995_v44 = vand.u32 4294901760, %v357_v41  ;;  %v6000_v50 = vand.u32 4294901760, %v405_v42  ;;  %v323_v14 = vld [vmem:[%s5852_s21 + $0xc0] sm:$0xff] }
  0x2c   : > { %v491_v27 = vsub.f32 %v5963_v11, %v9219_v18  ;;  %v619_v37 = vsub.f32 %v5966_v12, %v9207_v19  ;;  %v9218_v43 = vand.u32 4294901760, %v5981_v26  ;;  %v9206_v48 = vand.u32 4294901760, %v5990_v38 }
  0x2d   : > { %v6005_v57 = vsub.f32 %v357_v41, %v5995_v44  ;;  %v6014_v62 = vsub.f32 %v405_v42, %v6000_v50 }
  0x2e   : > { %469 = vmatmul.f32.gmra.mxu0 %v468_v53  ;;  %597 = vmatmul.f32.gmra.mxu2 %v596_v54  ;;  %v492_v46 = vand.u32 4294901760, %v491_v27  ;;  %v620_v47 = vand.u32 4294901760, %v619_v37  ;;  %v306_v53 = vld [vmem:[%s5852_s21 + $0x38] sm:$0xff]  ;;  %v499_v58 = vsub.f32 %v5981_v26, %v9218_v43  ;;  %v627_v61 = vsub.f32 %v5990_v38, %v9206_v48 }
  0x2f   : > { %v322_v54 = vld [vmem:[%s5852_s21 + $0xb8] sm:$0xff]  ;;  %v360_v63 = vsel %vm337_vm1, %v306_v53, 0  ;;  %v9205_v9 = vand.u32 4294901760, %v6014_v62  ;;  %v363_v27 = vsel %vm337_vm1, %v307_v13, 0  ;;  %v411_v37 = vsel %vm337_vm1, %v323_v14, 0 }
  0x30   : > { %v408_v0 = vsel %vm337_vm1, %v322_v54, 0  ;;  %v500_v7 = vand.u32 4294901760, %v499_v58  ;;  %v628_v8 = vand.u32 4294901760, %v627_v61  ;;  %v6046_v53 = vand.u32 4294901760, %v363_v27  ;;  %v308_v58 = vld [vmem:[%s5852_s21 + $0x48] sm:$0xff] }
  0x31   : > { %v6024_v10 = vand.u32 4294901760, %v408_v0  ;;  %v635_v24 = vsub.f32 %v6014_v62, %v9205_v9  ;;  %v6048_v54 = vand.u32 4294901760, %v411_v37  ;;  %v324_v61 = vld [vmem:[%s5852_s21 + $0xc8] sm:$0xff]  ;;  %v366_v13 = vsel %vm337_vm1, %v308_v58, 0  ;;  %v325_v9 = vld [vmem:[%s5852_s21 + $0xd0] sm:$0xff] }
  0x32   : > { %748 = vmatmul.f32.gmra.mxu1 %v5890_v35  ;;  %812 = vmatmul.f32.gmra.mxu3 %v5892_v36  ;;  %v414_v14 = vsel %vm337_vm1, %v324_v61, 0 }
  0x33   : > { %9356 = vst [vmem:[#allocation5_spill] sm:$0xff] %v6024_v10  ;;  %v6038_v25 = vsub.f32 %v408_v0, %v6024_v10 }
  0x34   : > { %9358 = vst [vmem:[#allocation7_spill] sm:$0xff] %v6048_v54 }
  0x35   : > { %9357 = vst [vmem:[#allocation6_spill] sm:$0xff] %v6038_v25 }
  0x36   : > { %477 = vmatmul.f32.gmra.mxu0 %v476_v3  ;;  %605 = vmatmul.f32.gmra.mxu2 %v604_v4  ;;  %v9217_v3 = vand.u32 4294901760, %v6005_v57  ;;  %v6019_v4 = vand.u32 4294901760, %v360_v63 }
  0x3a   : > { %752 = vmatmul.f32.gmra.mxu1 %v5922_v51  ;;  %816 = vmatmul.f32.gmra.mxu3 %v5924_v52 }
  0x3e   : > { %485 = vmatmul.f32.gmra.mxu0 %v484_v15  ;;  %613 = vmatmul.f32.gmra.mxu2 %v612_v17  ;;  %v507_v15 = vsub.f32 %v6005_v57, %v9217_v3  ;;  %v6032_v17 = vsub.f32 %v360_v63, %v6019_v4  ;;  %v327_v3 = vld [vmem:[%s5852_s21 + $0xe0] sm:$0xff] }
  0x3f   : > { %v423_v18 = vsel %vm337_vm1, %v327_v3, 0 }
  0x40   : > { %v508_v41 = vand.u32 4294901760, %v507_v15  ;;  %v9214_v42 = vand.u32 4294901760, %v6032_v17 }
  0x42   : > { %756 = vmatmul.f32.gmra.mxu1 %v5950_v5  ;;  %820 = vmatmul.f32.gmra.mxu3 %v5952_v6  ;;  %v515_v63 = vsub.f32 %v6032_v17, %v9214_v42 }
  0x44   : > { %v516_v15 = vand.u32 4294901760, %v515_v63 }
  0x46   : > { %493 = vmatmul.f32.gmra.mxu0 %v492_v46  ;;  %621 = vmatmul.f32.gmra.mxu2 %v620_v47  ;;  %v636_v46 = vand.u32 4294901760, %v635_v24  ;;  %v9204_v47 = vand.u32 4294901760, %v6038_v25  ;;  %v6066_v24 = vand.u32 4294901760, %v366_v13 }
  0x48   : > { %v643_v0 = vsub.f32 %v6038_v25, %v9204_v47  ;;  %v6072_v47 = vand.u32 4294901760, %v414_v14  ;;  %v6077_v58 = vsub.f32 %v366_v13, %v6066_v24  ;;  %v417_v13 = vsel %vm337_vm1, %v325_v9, 0 }
  0x4a   : > { %760 = vmatmul.f32.gmra.mxu1 %v5970_v16  ;;  %824 = vmatmul.f32.gmra.mxu3 %v5976_v20  ;;  %9360 = vst [vmem:[#allocation9_spill] sm:$0xff] %v6072_v47  ;;  %v9215_v19 = vand.u32 4294901760, %v6077_v58 }
  0x4c   : > { %v531_v9 = vsub.f32 %v6077_v58, %v9215_v19 }
  0x4e   : > { %501 = vmatmul.f32.gmra.mxu0 %v500_v7  ;;  %629 = vmatmul.f32.gmra.mxu2 %v628_v8  ;;  %v6059_v7 = vsub.f32 %v363_v27, %v6046_v53  ;;  %v6062_v8 = vsub.f32 %v411_v37, %v6048_v54  ;;  %v309_v37 = vld [vmem:[%s5852_s21 + $0x50] sm:$0xff]  ;;  %v532_v42 = vand.u32 4294901760, %v531_v9 }
  0x4f   : > { %v369_v48 = vsel %vm337_vm1, %v309_v37, 0 }
  0x50   : > { %9359 = vst [vmem:[#allocation8_spill] sm:$0xff] %v6062_v8  ;;  %v9210_v27 = vand.u32 4294901760, %v6062_v8 }
  0x52   : > { %764 = vmatmul.f32.gmra.mxu1 %v5995_v44  ;;  %828 = vmatmul.f32.gmra.mxu3 %v6000_v50  ;;  %v651_v63 = vsub.f32 %v6062_v8, %v9210_v27  ;;  %v6096_v27 = vand.u32 4294901760, %v417_v13 }
  0x54   : > { %v652_v2 = vand.u32 4294901760, %v651_v63  ;;  %9362 = vst [vmem:[#allocation11_spill] sm:$0xff] %v6096_v27  ;;  %v6110_v63 = vsub.f32 %v417_v13, %v6096_v27  ;;  %v311_v13 = vld [vmem:[%s5852_s21 + $0x60] sm:$0xff] }
  0x55   : > { %v375_v43 = vsel %vm337_vm1, %v311_v13, 0 }
  0x56   : > { %509 = vmatmul.f32.gmra.mxu0 %v508_v41  ;;  %637 = vmatmul.f32.gmra.mxu2 %v636_v46  ;;  %v644_v41 = vand.u32 4294901760, %v643_v0  ;;  %v9213_v46 = vand.u32 4294901760, %v6059_v7  ;;  %v6086_v0 = vsub.f32 %v414_v14, %v6072_v47  ;;  %v310_v14 = vld [vmem:[%s5852_s21 + $0x58] sm:$0xff]  ;;  %9363 = vst [vmem:[#allocation12_spill] sm:$0xff] %v6110_v63 }
  0x57   : > { %v372_v33 = vsel %vm337_vm1, %v310_v14, 0 }
  0x58   : > { %v523_v61 = vsub.f32 %v6059_v7, %v9213_v46  ;;  %9361 = vst [vmem:[#allocation10_spill] sm:$0xff] %v6086_v0  ;;  %v9216_v56 = vand.u32 4294901760, %v6086_v0  ;;  %v420_v46 = vsel %vm337_vm1, %v326_v40, 0 }
  0x5a   : > { %768 = vmatmul.f32.gmra.mxu1 %v6019_v4  ;;  %832 = vmatmul.f32.gmra.mxu3 %v6024_v10 }
  0x5e   : > { %517 = vmatmul.f32.gmra.mxu0 %v516_v15  ;;  %645 = vmatmul.f32.gmra.mxu2 %v644_v41  ;;  %v6091_v15 = vand.u32 4294901760, %v369_v48  ;;  %v524_v41 = vand.u32 4294901760, %v523_v61  ;;  %v659_v61 = vsub.f32 %v6086_v0, %v9216_v56  ;;  %v6120_v56 = vand.u32 4294901760, %v420_v46 }
  0x60   : > { %v6104_v37 = vsub.f32 %v369_v48, %v6091_v15  ;;  %v660_v48 = vand.u32 4294901760, %v659_v61  ;;  %9364 = vst [vmem:[#allocation13_spill] sm:$0xff] %v6120_v56  ;;  %v6134_v61 = vsub.f32 %v420_v46, %v6120_v56  ;;  %v312_v46 = vld [vmem:[%s5852_s21 + $0x68] sm:$0xff] }
  0x61   : > { %v378_v39 = vsel %vm337_vm1, %v312_v46, 0 }
  0x62   : > { %772 = vmatmul.f32.gmra.mxu1 %v6046_v53  ;;  %836 = vmatmul.f32.gmra.mxu3 %v6048_v54  ;;  %v9221_v19 = vand.u32 4294901760, %v6104_v37  ;;  %9365 = vst [vmem:[#allocation14_spill] sm:$0xff] %v6134_v61 }
  0x64   : > { %v539_v40 = vsub.f32 %v6104_v37, %v9221_v19  ;;  %v6138_v19 = vand.u32 4294901760, %v375_v43 }
  0x66   : > { %525 = vmatmul.f32.gmra.mxu0 %v524_v41  ;;  %653 = vmatmul.f32.gmra.mxu2 %v652_v2  ;;  %v9222_v2 = vand.u32 4294901760, %v6110_v63  ;;  %v6118_v41 = vand.u32 4294901760, %v372_v33  ;;  %v540_v1 = vand.u32 4294901760, %v539_v40  ;;  %v6149_v13 = vsub.f32 %v375_v43, %v6138_v19 }
  0x67   : > { %v426_v43 = vsel %vm337_vm1, %v328_v55, 0 }
  0x68   : > { %v667_v14 = vsub.f32 %v6110_v63, %v9222_v2  ;;  %v6131_v9 = vsub.f32 %v372_v33, %v6118_v41  ;;  %v9229_v33 = vand.u32 4294901760, %v6134_v61  ;;  %v6144_v2 = vand.u32 4294901760, %v423_v18 }
  0x69   : > { %v9236_v32 = vand.u32 4294901760, %v6149_v13 }
  0x6a   : > { %776 = vmatmul.f32.gmra.mxu1 %v6066_v24  ;;  %840 = vmatmul.f32.gmra.mxu3 %v6072_v47  ;;  %9366 = vst [vmem:[#allocation15_spill] sm:$0xff] %v6144_v2  ;;  %v675_v40 = vsub.f32 %v6134_v61, %v9229_v33  ;;  %v6168_v33 = vand.u32 4294901760, %v426_v43  ;;  %v329_v61 = vld [vmem:[%s5852_s21 + $0xf0] sm:$0xff] }
  0x6b   : > { %v555_v55 = vsub.f32 %v6149_v13, %v9236_v32  ;;  %v429_v63 = vsel %vm337_vm1, %v329_v61, 0 }
  0x6c   : > { %9368 = vst [vmem:[#allocation17_spill] sm:$0xff] %v6168_v33 }
  0x6e   : > { %533 = vmatmul.f32.gmra.mxu0 %v532_v42  ;;  %661 = vmatmul.f32.gmra.mxu2 %v660_v48  ;;  %v668_v42 = vand.u32 4294901760, %v667_v14  ;;  %v9226_v48 = vand.u32 4294901760, %v6131_v9  ;;  %v6158_v14 = vsub.f32 %v423_v18, %v6144_v2  ;;  %v313_v18 = vld [vmem:[%s5852_s21 + $0x70] sm:$0xff] }
  0x70   : > { %v547_v3 = vsub.f32 %v6131_v9, %v9226_v48  ;;  %9367 = vst [vmem:[#allocation16_spill] sm:$0xff] %v6158_v14  ;;  %v676_v48 = vand.u32 4294901760, %v675_v40  ;;  %v6182_v40 = vsub.f32 %v426_v43, %v6168_v33  ;;  %v314_v43 = vld [vmem:[%s5852_s21 + $0x78] sm:$0xff] }
  0x72   : > { %780 = vmatmul.f32.gmra.mxu1 %v6091_v15  ;;  %844 = vmatmul.f32.gmra.mxu3 %v6096_v27  ;;  %v9239_v27 = vand.u32 4294901760, %v6158_v14  ;;  %9369 = vst [vmem:[#allocation18_spill] sm:$0xff] %v6182_v40 }
  0x76   : > { %541 = vmatmul.f32.gmra.mxu0 %v540_v1  ;;  %669 = vmatmul.f32.gmra.mxu2 %v668_v42  ;;  %v6163_v1 = vand.u32 4294901760, %v378_v39  ;;  %v548_v42 = vand.u32 4294901760, %v547_v3  ;;  %v683_v3 = vsub.f32 %v6158_v14, %v9239_v27  ;;  %v9249_v27 = vand.u32 4294901760, %v6182_v40  ;;  %v330_v14 = vld [vmem:[%s5852_s21 + $0xf8] sm:$0xff] }
  0x78   : > { %v6176_v46 = vsub.f32 %v378_v39, %v6163_v1  ;;  %v6189_v39 = vand.u32 4294901760, %v429_v63 }
  0x7a   : > { %784 = vmatmul.f32.gmra.mxu1 %v6118_v41  ;;  %848 = vmatmul.f32.gmra.mxu3 %v6120_v56  ;;  %v381_v56 = vsel %vm337_vm1, %v313_v18, 0  ;;  %v9246_v32 = vand.u32 4294901760, %v6176_v46  ;;  %9370 = vst [vmem:[#allocation19_spill] sm:$0xff] %v6189_v39  ;;  %v6203_v0 = vsub.f32 %v429_v63, %v6189_v39 }
  0x7b   : > { %v6187_v47 = vand.u32 4294901760, %v381_v56 }
  0x7c   : > { %v563_v61 = vsub.f32 %v6176_v46, %v9246_v32  ;;  %9371 = vst [vmem:[#allocation20_spill] sm:$0xff] %v6203_v0  ;;  %v432_v32 = vsel %vm337_vm1, %v330_v14, 0 }
  0x7d   : > { %v6200_v18 = vsub.f32 %v381_v56, %v6187_v47  ;;  %v6222_v8 = vand.u32 4294901760, %v432_v32 }
  0x7e   : > { %549 = vmatmul.f32.gmra.mxu0 %v548_v42  ;;  %677 = vmatmul.f32.gmra.mxu2 %v676_v48  ;;  %v556_v48 = vand.u32 4294901760, %v555_v55  ;;  %v684_v42 = vand.u32 4294901760, %v683_v3  ;;  %v691_v55 = vsub.f32 %v6182_v40, %v9249_v27  ;;  %v2167_v3 = vld [vmem:[%s9199_s3 + $0x8] sm:$0x3]  ;;  %v564_v63 = vand.u32 4294901760, %v563_v61 }
  0x7f   : > { %v2269_v56 = vsel %vm434_vm0, %v2167_v3, 0  ;;  %9372 = vst [vmem:[#allocation21_spill] sm:$0xff] %v6222_v8 }
  0x80   : > { %v6214_v54 = vand.u32 4294901760, %v2269_v56  ;;  %v692_v27 = vand.u32 4294901760, %v691_v55 }
  0x82   : > { %788 = vmatmul.f32.gmra.mxu1 %v6138_v19  ;;  %852 = vmatmul.f32.gmra.mxu3 %v6144_v2  ;;  %v384_v2 = vsel %vm337_vm1, %v314_v43, 0  ;;  %v6225_v14 = vsub.f32 %v2269_v56, %v6214_v54  ;;  %v6241_v56 = vsub.f32 %v432_v32, %v6222_v8 }
  0x83   : > { %v6220_v40 = vand.u32 4294901760, %v384_v2  ;;  %2286 = vmatpush.msra.mxu2 %v6214_v54  ;;  %2897 = vmatpush.msra.mxu1 %v6214_v54 }
  0x84   : > { %v9264_v43 = vand.u32 4294901760, %v6225_v14  ;;  %2717 = vmatpush.msra.mxu0 %v6225_v14  ;;  %9373 = vst [vmem:[#allocation22_spill] sm:$0xff] %v6241_v56 }
  0x85   : > { %v6238_v3 = vsub.f32 %v384_v2, %v6220_v40 }
  0x86   : > { %557 = vmatmul.f32.gmra.mxu0 %v556_v48  ;;  %685 = vmatmul.f32.gmra.mxu2 %v684_v42  ;;  %v9258_v48 = vand.u32 4294901760, %v6200_v18  ;;  %v9262_v42 = vand.u32 4294901760, %v6203_v0 }
  0x88   : > { %v571_v61 = vsub.f32 %v6200_v18, %v9258_v48  ;;  %v699_v55 = vsub.f32 %v6203_v0, %v9262_v42 }
  0x8a   : > { %792 = vmatmul.f32.gmra.mxu1 %v6163_v1  ;;  %856 = vmatmul.f32.gmra.mxu3 %v6168_v33  ;;  %v2563_v33 = vsub.f32 %v6225_v14, %v9264_v43  ;;  %v572_v48 = vand.u32 4294901760, %v571_v61  ;;  %v700_v25 = vand.u32 4294901760, %v699_v55 }
  0x8c   : > { %v2564_v10 = vand.u32 4294901760, %v2563_v33 }
  0x8e   : > { %565 = vmatmul.f32.gmra.mxu0 %v564_v63  ;;  %693 = vmatmul.f32.gmra.mxu2 %v692_v27  ;;  %v9263_v63 = vand.u32 4294901760, %v6238_v3  ;;  %v9261_v27 = vand.u32 4294901760, %v6241_v56 }
  0x8f   : > { %2565 = vmatpush.msra.mxu3 %v2564_v10  ;;  %v9374_v10 = vand.u32 4294901760, %v5875_v28 }
  0x90   : > { %v579_v32 = vsub.f32 %v6238_v3, %v9263_v63  ;;  %v707_v2 = vsub.f32 %v6241_v56, %v9261_v27  ;;  %v6268_v27 = vld [vmem:[%s9198_s2] ss:$0 sm:$0xff] }
  0x92   : > { %796 = vmatmul.f32.gmra.mxu1 %v6187_v47  ;;  %860 = vmatmul.f32.gmra.mxu3 %v6189_v39  ;;  %v580_v33 = vand.u32 4294901760, %v579_v32  ;;  %v708_v61 = vand.u32 4294901760, %v707_v2 }
  0x96   : > { %573 = vmatmul.f32.gmra.mxu0 %v572_v48  ;;  %701 = vmatmul.f32.gmra.mxu2 %v700_v25 }
  0x9a   : > { %800 = vmatmul.f32.gmra.mxu1 %v6220_v40  ;;  %864 = vmatmul.f32.gmra.mxu3 %v6222_v8 }
  0x9e   : > { %581 = vmatmul.f32.gmra.mxu0 %v580_v33  ;;  %709 = vmatmul.f32.gmra.mxu2 %v708_v61  ;;  %v9375_v61 = vand.u32 4294901760, %v5883_v31 }
  0x9f   : > { %v6258_v55 = vpop.f32.mrf.mxu1 }
  0xa2   : > { %1070 = vmatmul.f32.vlgmr.msrb.gmra.mxu3 %v9374_v10  ;;  %1430 = vmatmul.f32.vlgmr.msrb.gmra.mxu1 %v5865_v21 }
  0xa3   : > { %v6263_v25 = vpop.f32.mrf.mxu0 }
  0xa5   : > { %v805_v48 = vpop.f32.mrf.mxu3 }
  0xa6   : > { %890 = vmatmul.f32.vlgmr.msrb.gmra.mxu2 %v5875_v28  ;;  %1283 = vmatmul.f32.vlgmr.msrb.gmra.mxu0 %v5865_v21 }
  0xa7   : > { %v6272_v32 = vpop.f32.mrf.mxu1 }
  0xa9   : > { %v590_v2 = vpop.f32.mrf.mxu2 }
  0xaa   : > { %v591_v33 = vadd.f32 %v6268_v27, %v590_v2  ;;  %1076 = vmatmul.f32.gmra.mxu3 %v9375_v61  ;;  %1434 = vmatmul.f32.gmra.mxu1 %v5869_v23  ;;  %v9377_v2 = vand.u32 4294901760, %v5907_v45 }
  0xab   : > { %v6278_v10 = vpop.f32.mrf.mxu0 }
  0xac   : > { %v6280_v42 = vadd.f32 %v805_v48, %v591_v33 }
  0xad   : > { %v809_v63 = vpop.f32.mrf.mxu3 }
  0xae   : > { %9376 = vst [vmem:[#allocation23_spill] sm:$0xff] %v6280_v42  ;;  %895 = vmatmul.f32.gmra.mxu2 %v5883_v31  ;;  %1287 = vmatmul.f32.gmra.mxu0 %v5869_v23 }
  0xaf   : > { %v6284_v21 = vpop.f32.mrf.mxu1 }
  0xb1   : > { %v598_v28 = vpop.f32.mrf.mxu2 }
  0xb2   : > { %v599_v43 = vadd.f32 %v6268_v27, %v598_v28  ;;  %1082 = vmatmul.f32.gmra.mxu3 %v9377_v2  ;;  %1438 = vmatmul.f32.gmra.mxu1 %v5890_v35  ;;  %v9379_v28 = vand.u32 4294901760, %v5933_v59 }
  0xb3   : > { %v6290_v61 = vpop.f32.mrf.mxu0 }
  0xb4   : > { %v6292_v8 = vadd.f32 %v809_v63, %v599_v43 }
  0xb5   : > { %v813_v48 = vpop.f32.mrf.mxu3 }
  0xb6   : > { %9378 = vst [vmem:[#allocation24_spill] sm:$0xff] %v6292_v8  ;;  %900 = vmatmul.f32.gmra.mxu2 %v5907_v45  ;;  %1291 = vmatmul.f32.gmra.mxu0 %v5890_v35 }
  0xb7   : > { %v6296_v23 = vpop.f32.mrf.mxu1 }
  0xb9   : > { %v606_v31 = vpop.f32.mrf.mxu2 }
  0xba   : > { %v607_v33 = vadd.f32 %v6268_v27, %v606_v31  ;;  %1088 = vmatmul.f32.gmra.mxu3 %v9379_v28  ;;  %1442 = vmatmul.f32.gmra.mxu1 %v5922_v51  ;;  %v9381_v31 = vand.u32 4294901760, %v5963_v11 }
  0xbb   : > { %v6302_v2 = vpop.f32.mrf.mxu0 }
  0xbc   : > { %v6304_v42 = vadd.f32 %v813_v48, %v607_v33 }
  0xbd   : > { %v817_v43 = vpop.f32.mrf.mxu3 }
  0xbe   : > { %9380 = vst [vmem:[#allocation25_spill] sm:$0xff] %v6304_v42  ;;  %905 = vmatmul.f32.gmra.mxu2 %v5933_v59  ;;  %1295 = vmatmul.f32.gmra.mxu0 %v5922_v51 }
  0xbf   : > { %v6308_v35 = vpop.f32.mrf.mxu1 }
  0xc1   : > { %v614_v45 = vpop.f32.mrf.mxu2 }
  0xc2   : > { %v615_v63 = vadd.f32 %v6268_v27, %v614_v45  ;;  %1094 = vmatmul.f32.gmra.mxu3 %v9381_v31  ;;  %1446 = vmatmul.f32.gmra.mxu1 %v5950_v5  ;;  %v9383_v45 = vand.u32 4294901760, %v5981_v26 }
  0xc3   : > { %v6314_v28 = vpop.f32.mrf.mxu0 }
  0xc4   : > { %v6316_v8 = vadd.f32 %v817_v43, %v615_v63 }
  0xc5   : > { %v821_v48 = vpop.f32.mrf.mxu3 }
  0xc6   : > { %9382 = vst [vmem:[#allocation26_spill] sm:$0xff] %v6316_v8  ;;  %910 = vmatmul.f32.gmra.mxu2 %v5963_v11  ;;  %1299 = vmatmul.f32.gmra.mxu0 %v5950_v5 }
  0xc7   : > { %v6320_v51 = vpop.f32.mrf.mxu1 }
  0xc9   : > { %v622_v59 = vpop.f32.mrf.mxu2 }
  0xca   : > { %v623_v33 = vadd.f32 %v6268_v27, %v622_v59  ;;  %1100 = vmatmul.f32.gmra.mxu3 %v9383_v45  ;;  %1450 = vmatmul.f32.gmra.mxu1 %v5970_v16  ;;  %v9385_v59 = vand.u32 4294901760, %v6005_v57 }
  0xcb   : > { %v6326_v31 = vpop.f32.mrf.mxu0 }
  0xcc   : > { %v6328_v42 = vadd.f32 %v821_v48, %v623_v33 }
  0xcd   : > { %v825_v43 = vpop.f32.mrf.mxu3 }
  0xce   : > { %9384 = vst [vmem:[#allocation27_spill] sm:$0xff] %v6328_v42  ;;  %915 = vmatmul.f32.gmra.mxu2 %v5981_v26  ;;  %1303 = vmatmul.f32.gmra.mxu0 %v5970_v16 }
  0xcf   : > { %v6332_v5 = vpop.f32.mrf.mxu1 }
  0xd1   : > { %v630_v11 = vpop.f32.mrf.mxu2 }
  0xd2   : > { %v631_v63 = vadd.f32 %v6268_v27, %v630_v11  ;;  %1106 = vmatmul.f32.gmra.mxu3 %v9385_v59  ;;  %1454 = vmatmul.f32.gmra.mxu1 %v5995_v44  ;;  %v9387_v11 = vand.u32 4294901760, %v6032_v17 }
  0xd3   : > { %v6338_v45 = vpop.f32.mrf.mxu0 }
  0xd4   : > { %v6340_v8 = vadd.f32 %v825_v43, %v631_v63 }
  0xd5   : > { %v829_v48 = vpop.f32.mrf.mxu3 }
  0xd6   : > { %9386 = vst [vmem:[#allocation28_spill] sm:$0xff] %v6340_v8  ;;  %920 = vmatmul.f32.gmra.mxu2 %v6005_v57  ;;  %1307 = vmatmul.f32.gmra.mxu0 %v5995_v44 }
  0xd7   : > { %v6344_v16 = vpop.f32.mrf.mxu1 }
  0xd9   : > { %v638_v26 = vpop.f32.mrf.mxu2 }
  0xda   : > { %v639_v33 = vadd.f32 %v6268_v27, %v638_v26  ;;  %1112 = vmatmul.f32.gmra.mxu3 %v9387_v11  ;;  %1458 = vmatmul.f32.gmra.mxu1 %v6019_v4  ;;  %v9389_v26 = vand.u32 4294901760, %v6059_v7 }
  0xdb   : > { %v6350_v59 = vpop.f32.mrf.mxu0 }
  0xdc   : > { %v6352_v42 = vadd.f32 %v829_v48, %v639_v33 }
  0xdd   : > { %v833_v43 = vpop.f32.mrf.mxu3 }
  0xde   : > { %9388 = vst [vmem:[#allocation29_spill] sm:$0xff] %v6352_v42  ;;  %925 = vmatmul.f32.gmra.mxu2 %v6032_v17  ;;  %1311 = vmatmul.f32.gmra.mxu0 %v6019_v4 }
  0xdf   : > { %v6356_v44 = vpop.f32.mrf.mxu1 }
  0xe1   : > { %v646_v57 = vpop.f32.mrf.mxu2 }
  0xe2   : > { %v647_v63 = vadd.f32 %v6268_v27, %v646_v57  ;;  %1118 = vmatmul.f32.gmra.mxu3 %v9389_v26  ;;  %1462 = vmatmul.f32.gmra.mxu1 %v6046_v53  ;;  %v9391_v57 = vand.u32 4294901760, %v6077_v58 }
  0xe3   : > { %v6362_v11 = vpop.f32.mrf.mxu0 }
  0xe4   : > { %v6364_v8 = vadd.f32 %v833_v43, %v647_v63 }
  0xe5   : > { %v837_v48 = vpop.f32.mrf.mxu3 }
  0xe6   : > { %9390 = vst [vmem:[#allocation30_spill] sm:$0xff] %v6364_v8  ;;  %930 = vmatmul.f32.gmra.mxu2 %v6059_v7  ;;  %1315 = vmatmul.f32.gmra.mxu0 %v6046_v53 }
  0xe7   : > { %v6368_v4 = vpop.f32.mrf.mxu1 }
  0xe9   : > { %v654_v17 = vpop.f32.mrf.mxu2 }
  0xea   : > { %v655_v33 = vadd.f32 %v6268_v27, %v654_v17  ;;  %1124 = vmatmul.f32.gmra.mxu3 %v9391_v57  ;;  %1466 = vmatmul.f32.gmra.mxu1 %v6066_v24  ;;  %v9393_v17 = vand.u32 4294901760, %v6104_v37 }
  0xeb   : > { %v6374_v26 = vpop.f32.mrf.mxu0 }
  0xec   : > { %v6376_v42 = vadd.f32 %v837_v48, %v655_v33 }
  0xed   : > { %v841_v43 = vpop.f32.mrf.mxu3 }
  0xee   : > { %9392 = vst [vmem:[#allocation31_spill] sm:$0xff] %v6376_v42  ;;  %935 = vmatmul.f32.gmra.mxu2 %v6077_v58  ;;  %1319 = vmatmul.f32.gmra.mxu0 %v6066_v24 }
  0xef   : > { %v6380_v53 = vpop.f32.mrf.mxu1 }
  0xf1   : > { %v662_v7 = vpop.f32.mrf.mxu2 }
  0xf2   : > { %v663_v63 = vadd.f32 %v6268_v27, %v662_v7  ;;  %1130 = vmatmul.f32.gmra.mxu3 %v9393_v17  ;;  %1470 = vmatmul.f32.gmra.mxu1 %v6091_v15  ;;  %v9395_v7 = vand.u32 4294901760, %v6131_v9 }
  0xf3   : > { %v6386_v57 = vpop.f32.mrf.mxu0 }
  0xf4   : > { %v6388_v8 = vadd.f32 %v841_v43, %v663_v63 }
  0xf5   : > { %v845_v48 = vpop.f32.mrf.mxu3 }
  0xf6   : > { %9394 = vst [vmem:[#allocation32_spill] sm:$0xff] %v6388_v8  ;;  %940 = vmatmul.f32.gmra.mxu2 %v6104_v37  ;;  %1323 = vmatmul.f32.gmra.mxu0 %v6091_v15 }
  0xf7   : > { %v6392_v24 = vpop.f32.mrf.mxu1 }
  0xf9   : > { %v670_v58 = vpop.f32.mrf.mxu2 }
  0xfa   : > { %v671_v33 = vadd.f32 %v6268_v27, %v670_v58  ;;  %1136 = vmatmul.f32.gmra.mxu3 %v9395_v7  ;;  %1474 = vmatmul.f32.gmra.mxu1 %v6118_v41  ;;  %v9397_v58 = vand.u32 4294901760, %v6149_v13 }
  0xfb   : > { %v6398_v17 = vpop.f32.mrf.mxu0 }
  0xfc   : > { %v6400_v42 = vadd.f32 %v845_v48, %v671_v33 }
  0xfd   : > { %v849_v43 = vpop.f32.mrf.mxu3 }
  0xfe   : > { %9396 = vst [vmem:[#allocation33_spill] sm:$0xff] %v6400_v42  ;;  %945 = vmatmul.f32.gmra.mxu2 %v6131_v9  ;;  %1327 = vmatmul.f32.gmra.mxu0 %v6118_v41  ;;  %v2166_v41 = vld [vmem:[%s9199_s3] sm:$0xff] }
  0xff   : > { %v6404_v15 = vpop.f32.mrf.mxu1  ;;  %v2287_v33 = vand.u32 4294901760, %v2166_v41 }
 0x101   : > { %v678_v37 = vpop.f32.mrf.mxu2  ;;  %2288 = vmatpush.msra.mxu2 %v2287_v33  ;;  %2899 = vmatpush.msra.mxu1 %v2287_v33 }
 0x102   : > { %v679_v63 = vadd.f32 %v6268_v27, %v678_v37  ;;  %1142 = vmatmul.f32.gmra.mxu3 %v9397_v58  ;;  %1478 = vmatmul.f32.gmra.mxu1 %v6138_v19  ;;  %v2567_v58 = vsub.f32 %v2166_v41, %v2287_v33 }
 0x103   : > { %v6410_v7 = vpop.f32.mrf.mxu0 }
 0x104   : > { %v6412_v8 = vadd.f32 %v849_v43, %v679_v63  ;;  %v9400_v43 = vand.u32 4294901760, %v6176_v46  ;;  %2720 = vmatpush.msra.mxu0 %v2567_v58  ;;  %v9401_v63 = vand.u32 4294901760, %v6225_v14 }
 0x105   : > { %v853_v48 = vpop.f32.mrf.mxu3 }
 0x106   : > { %9398 = vst [vmem:[#allocation34_spill] sm:$0xff] %v6412_v8  ;;  %950 = vmatmul.f32.gmra.mxu2 %v6149_v13  ;;  %1331 = vmatmul.f32.gmra.mxu0 %v6138_v19  ;;  %v2568_v19 = vand.u32 4294901760, %v2567_v58 }
 0x107   : > { %v6419_v9 = vpop.f32.mrf.mxu1  ;;  %3110 = vmatpush.msrb.mxu2 %v9401_v63  ;;  %v463_v63 = vadd.f32 %v6268_v27, %v6263_v25  ;;  %v471_v25 = vadd.f32 %v6268_v27, %v6278_v10  ;;  %v479_v10 = vadd.f32 %v6268_v27, %v6290_v61  ;;  %v487_v61 = vadd.f32 %v6268_v27, %v6302_v2 }
 0x108   : > { %9399 = vst [vmem:[#allocation35_spill] sm:$0xff] %v6419_v9  ;;  %v2569_v39 = vsub.f32 %v2567_v58, %v2568_v19  ;;  %v9402_v9 = vand.u32 4294901760, %v6200_v18  ;;  %v495_v2 = vadd.f32 %v6268_v27, %v6314_v28  ;;  %v503_v28 = vadd.f32 %v6268_v27, %v6326_v31 }
 0x109   : > { %v686_v37 = vpop.f32.mrf.mxu2  ;;  %3114 = vmatpush.msrb.mxu2 %v2568_v19 }
 0x10a   : > { %v687_v42 = vadd.f32 %v6268_v27, %v686_v37  ;;  %1148 = vmatmul.f32.gmra.mxu3 %v9400_v43  ;;  %1482 = vmatmul.f32.gmra.mxu1 %v6163_v1  ;;  %v2570_v37 = vand.u32 4294901760, %v2569_v39 }
 0x10b   : > { %v6425_v13 = vpop.f32.mrf.mxu0 }
 0x10c   : > { %v6429_v8 = vadd.f32 %v853_v48, %v687_v42  ;;  %2571 = vmatpush.msra.mxu3 %v2570_v37 }
 0x10d   : > { %v857_v56 = vpop.f32.mrf.mxu3 }
 0x10e   : > { %955 = vmatmul.f32.gmra.mxu2 %v6176_v46  ;;  %1335 = vmatmul.f32.gmra.mxu0 %v6163_v1 }
 0x10f   : > { %v6433_v41 = vpop.f32.mrf.mxu1  ;;  %3259 = vmatpush.msrb.mxu3 %v6214_v54 }
 0x111   : > { %v694_v43 = vpop.f32.mrf.mxu2  ;;  %3261 = vmatpush.msrb.mxu3 %v2287_v33  ;;  %v9404_v33 = vand.u32 4294901760, %v5878_v29 }
 0x112   : > { %v695_v0 = vadd.f32 %v6268_v27, %v694_v43  ;;  %1154 = vmatmul.f32.gmra.mxu3 %v9402_v9  ;;  %1486 = vmatmul.f32.gmra.mxu1 %v6187_v47  ;;  %v9403_v9 = vand.u32 4294901760, %v6238_v3  ;;  %v742_v43 = vadd.f32 %v6258_v55, %v463_v63  ;;  %v746_v55 = vadd.f32 %v6272_v32, %v471_v25 }
 0x113   : > { %v6439_v42 = vpop.f32.mrf.mxu0  ;;  %v750_v32 = vadd.f32 %v6284_v21, %v479_v10  ;;  %v754_v21 = vadd.f32 %v6296_v23, %v487_v61  ;;  %v758_v23 = vadd.f32 %v6308_v35, %v495_v2  ;;  %v762_v35 = vadd.f32 %v6320_v51, %v503_v28 }
 0x114   : > { %v6442_v14 = vadd.f32 %v857_v56, %v695_v0 }
 0x115   : > { %v861_v46 = vpop.f32.mrf.mxu3 }
 0x116   : > { %960 = vmatmul.f32.gmra.mxu2 %v6200_v18  ;;  %1339 = vmatmul.f32.gmra.mxu0 %v6187_v47 }
 0x117   : > { %v6446_v1 = vpop.f32.mrf.mxu1 }
 0x119   : > { %v702_v39 = vpop.f32.mrf.mxu2 }
 0x11a   : > { %v703_v48 = vadd.f32 %v6268_v27, %v702_v39  ;;  %1160 = vmatmul.f32.gmra.mxu3 %v9403_v9  ;;  %1490 = vmatmul.f32.gmra.mxu1 %v6220_v40 }
 0x11b   : > { %v6452_v58 = vpop.f32.mrf.mxu0 }
 0x11c   : > { %v6454_v54 = vadd.f32 %v861_v46, %v703_v48  ;;  %v9405_v48 = vand.u32 4294901760, %v5888_v34 }
 0x11d   : > { %v865_v0 = vpop.f32.mrf.mxu3 }
 0x11e   : > { %965 = vmatmul.f32.gmra.mxu2 %v6238_v3  ;;  %1343 = vmatmul.f32.gmra.mxu0 %v6220_v40 }
 0x11f   : > { %v6458_v47 = vpop.f32.mrf.mxu1 }
 0x121   : > { %v710_v18 = vpop.f32.mrf.mxu2 }
 0x122   : > { %v711_v56 = vadd.f32 %v6268_v27, %v710_v18  ;;  %1166 = vmatmul.f32.gmra.mxu3 %v9404_v33  ;;  %1494 = vmatmul.f32.gmra.mxu1 %v5867_v22  ;;  %v9406_v33 = vand.u32 4294901760, %v5919_v49 }
 0x123   : > { %v6464_v19 = vpop.f32.mrf.mxu0 }
 0x124   : > { %v6468_v37 = vadd.f32 %v865_v0, %v711_v56 }
 0x125   : > { %v1071_v3 = vpop.f32.mrf.mxu3 }
 0x126   : > { %970 = vmatmul.f32.gmra.mxu2 %v5878_v29  ;;  %1347 = vmatmul.f32.gmra.mxu0 %v5867_v22 }
 0x127   : > { %v6472_v40 = vpop.f32.mrf.mxu1 }
 0x129   : > { %v891_v46 = vpop.f32.mrf.mxu2 }
 0x12a   : > { %v892_v39 = vadd.f32 %v891_v46, %v742_v43  ;;  %1172 = vmatmul.f32.gmra.mxu3 %v9405_v48  ;;  %1498 = vmatmul.f32.gmra.mxu1 %v5880_v30 }
 0x12b   : > { %v6478_v9 = vpop.f32.mrf.mxu0 }
 0x12c   : > { %v1072_v0 = vadd.f32 %v1071_v3, %v892_v39  ;;  %v9407_v39 = vand.u32 4294901760, %v5936_v60 }
 0x12d   : > { %v1077_v29 = vpop.f32.mrf.mxu3 }
 0x12e   : > { %975 = vmatmul.f32.gmra.mxu2 %v5888_v34  ;;  %1351 = vmatmul.f32.gmra.mxu0 %v5880_v30  ;;  %v1285_v61 = vadd.f32 %v6464_v19, %v1072_v0 }
 0x12f   : > { %v6484_v22 = vpop.f32.mrf.mxu1 }
 0x131   : > { %v896_v18 = vpop.f32.mrf.mxu2 }
 0x132   : > { %v897_v56 = vadd.f32 %v896_v18, %v746_v55  ;;  %1178 = vmatmul.f32.gmra.mxu3 %v9406_v33  ;;  %1502 = vmatmul.f32.gmra.mxu1 %v5892_v36  ;;  %v9408_v18 = vand.u32 4294901760, %v5966_v12 }
 0x133   : > { %v6490_v63 = vpop.f32.mrf.mxu0 }
 0x134   : > { %v1078_v3 = vadd.f32 %v1077_v29, %v897_v56 }
 0x135   : > { %v1083_v34 = vpop.f32.mrf.mxu3 }
 0x136   : > { %980 = vmatmul.f32.gmra.mxu2 %v5919_v49  ;;  %1355 = vmatmul.f32.gmra.mxu0 %v5892_v36  ;;  %v1289_v2 = vadd.f32 %v6478_v9, %v1078_v3 }
 0x137   : > { %v6496_v30 = vpop.f32.mrf.mxu1 }
 0x139   : > { %v901_v43 = vpop.f32.mrf.mxu2 }
 0x13a   : > { %v902_v46 = vadd.f32 %v901_v43, %v750_v32  ;;  %1184 = vmatmul.f32.gmra.mxu3 %v9407_v39  ;;  %1506 = vmatmul.f32.gmra.mxu1 %v5924_v52  ;;  %v9409_v32 = vand.u32 4294901760, %v5990_v38 }
 0x13b   : > { %v6502_v48 = vpop.f32.mrf.mxu0 }
 0x13c   : > { %v6506_v25 = vadd.f32 %v1083_v34, %v902_v46 }
 0x13d   : > { %v1089_v49 = vpop.f32.mrf.mxu3 }
 0x13e   : > { %985 = vmatmul.f32.gmra.mxu2 %v5936_v60  ;;  %1359 = vmatmul.f32.gmra.mxu0 %v5924_v52 }
 0x13f   : > { %v6510_v36 = vpop.f32.mrf.mxu1 }
 0x141   : > { %v906_v29 = vpop.f32.mrf.mxu2 }
 0x142   : > { %v907_v55 = vadd.f32 %v906_v29, %v754_v21  ;;  %1190 = vmatmul.f32.gmra.mxu3 %v9408_v18  ;;  %1510 = vmatmul.f32.gmra.mxu1 %v5952_v6  ;;  %v9410_v21 = vand.u32 4294901760, %v6014_v62 }
 0x143   : > { %v6516_v56 = vpop.f32.mrf.mxu0 }
 0x144   : > { %v6520_v33 = vadd.f32 %v1089_v49, %v907_v55  ;;  %v1432_v55 = vadd.f32 %v6458_v47, %v1285_v61 }
 0x145   : > { %v1095_v60 = vpop.f32.mrf.mxu3 }
 0x146   : > { %990 = vmatmul.f32.gmra.mxu2 %v5966_v12  ;;  %1363 = vmatmul.f32.gmra.mxu0 %v5952_v6  ;;  %v1558_v18 = vsub.f32 0.0, %v1432_v55 }
 0x147   : > { %v6524_v52 = vpop.f32.mrf.mxu1 }
 0x149   : > { %v911_v10 = vpop.f32.mrf.mxu2 }
 0x14a   : > { %v912_v34 = vadd.f32 %v911_v10, %v758_v23  ;;  %1196 = vmatmul.f32.gmra.mxu3 %v9409_v32  ;;  %1514 = vmatmul.f32.gmra.mxu1 %v5976_v20  ;;  %v9411_v23 = vld [vmem:[#allocation6_spill] sm:$0xff]  ;;  %v9413_v10 = vld [vmem:[#allocation5_spill] sm:$0xff]  ;;  %v1590_v32 = vmul.f32 1.442695, %v1558_v18 }
 0x14b   : > { %v6530_v43 = vpop.f32.mrf.mxu0 }
 0x14c   : > { %v6534_v46 = vadd.f32 %v1095_v60, %v912_v34  ;;  %5429 = vpow2.f32 %v1590_v32 }
 0x14d   : > { %v1101_v12 = vpop.f32.mrf.mxu3 }
 0x14e   : > { %995 = vmatmul.f32.gmra.mxu2 %v5990_v38  ;;  %1367 = vmatmul.f32.gmra.mxu0 %v5976_v20  ;;  %v511_v38 = vadd.f32 %v6268_v27, %v6338_v45  ;;  %v9412_v45 = vand.u32 4294901760, %v9411_v23 }
 0x14f   : > { %v6538_v6 = vpop.f32.mrf.mxu1 }
 0x150   : > { %v766_v19 = vadd.f32 %v6332_v5, %v511_v38  ;;  %v1436_v5 = vadd.f32 %v6472_v40, %v1289_v2 }
 0x151   : > { %v916_v39 = vpop.f32.mrf.mxu2 }
 0x152   : > { %v917_v49 = vadd.f32 %v916_v39, %v762_v35  ;;  %1202 = vmatmul.f32.gmra.mxu3 %v9410_v21  ;;  %1518 = vmatmul.f32.gmra.mxu1 %v6000_v50  ;;  %v9414_v39 = vld [vmem:[#allocation8_spill] sm:$0xff]  ;;  %v527_v21 = vadd.f32 %v6268_v27, %v6362_v11 }
 0x153   : > { %v6545_v31 = vpop.f32.mrf.mxu0  ;;  %v9415_v61 = vand.u32 4294901760, %v9414_v39 }
 0x154   : > { %v6549_v29 = vadd.f32 %v1101_v12, %v917_v49  ;;  %v1559_v12 = vsub.f32 0.0, %v1436_v5  ;;  %v9416_v49 = vld [vmem:[#allocation7_spill] sm:$0xff] }
 0x155   : > { %v1107_v20 = vpop.f32.mrf.mxu3 }
 0x156   : > { %1000 = vmatmul.f32.gmra.mxu2 %v6014_v62  ;;  %1371 = vmatmul.f32.gmra.mxu0 %v6000_v50  ;;  %v519_v62 = vadd.f32 %v6268_v27, %v6350_v59  ;;  %v1293_v59 = vadd.f32 %v6490_v63, %v6506_v25  ;;  %v5430_v25 = vpop.eup %5429 }
 0x157   : > { %v6554_v51 = vpop.f32.mrf.mxu1 }
 0x158   : > { %v770_v3 = vadd.f32 %v6344_v16, %v519_v62  ;;  %v1440_v55 = vadd.f32 %v6484_v22, %v1293_v59  ;;  %v9419_v22 = vld [vmem:[#allocation9_spill] sm:$0xff]  ;;  %v535_v62 = vadd.f32 %v6268_v27, %v6374_v26  ;;  %v1301_v26 = vadd.f32 %v6516_v56, %v6534_v46  ;;  %v9420_v59 = vld [vmem:[#allocation12_spill] sm:$0xff] }
 0x159   : > { %v921_v0 = vpop.f32.mrf.mxu2  ;;  %v1305_v46 = vadd.f32 %v6530_v43, %v6549_v29 }
 0x15a   : > { %v922_v60 = vadd.f32 %v921_v0, %v766_v19  ;;  %1208 = vmatmul.f32.gmra.mxu3 %v9412_v45  ;;  %1522 = vmatmul.f32.gmra.mxu1 %v9413_v10  ;;  %v774_v19 = vadd.f32 %v6356_v44, %v527_v21  ;;  %v1297_v0 = vadd.f32 %v6502_v48, %v6520_v33  ;;  %v1560_v11 = vsub.f32 0.0, %v1440_v55 }
 0x15b   : > { %v6561_v34 = vpop.f32.mrf.mxu0  ;;  %v6595_v45 = vadd.f32 1.0, %v5430_v25  ;;  %v543_v21 = vadd.f32 %v6268_v27, %v6386_v57  ;;  %v1448_v56 = vadd.f32 %v6510_v36, %v1301_v26  ;;  %v1452_v43 = vadd.f32 %v6524_v52, %v1305_v46 }
 0x15c   : > { %v6565_v50 = vadd.f32 %v1107_v20, %v922_v60  ;;  %v1592_v20 = vmul.f32 1.442695, %v1559_v12  ;;  %v9417_v60 = vld [vmem:[#allocation10_spill] sm:$0xff]  ;;  %v1444_v48 = vadd.f32 %v6496_v30, %v1297_v0 }
 0x15d   : > { %v1113_v47 = vpop.f32.mrf.mxu3  ;;  %v782_v0 = vadd.f32 %v6380_v53, %v543_v21  ;;  %v1562_v36 = vsub.f32 0.0, %v1448_v56  ;;  %v1563_v52 = vsub.f32 0.0, %v1452_v43  ;;  %v9426_v21 = vld [vmem:[#allocation16_spill] sm:$0xff]  ;;  %vm1691_vm3 = vweird.f32 %v6595_v45 }
 0x15e   : > { %1005 = vmatmul.f32.gmra.mxu2 %v9411_v23  ;;  %1375 = vmatmul.f32.gmra.mxu0 %v9413_v10  ;;  %5431 = vpow2.f32 %v1592_v20  ;;  %v9418_v23 = vand.u32 4294901760, %v9417_v60 }
 0x15f   : > { %v6570_v9 = vpop.f32.mrf.mxu1  ;;  %5433 = vrcp.f32 %v6595_v45  ;;  %v1600_v56 = vmul.f32 1.442695, %v1563_v52  ;;  %v9431_v52 = vld [vmem:[#allocation18_spill] sm:$0xff] }
 0x161   : > { %v926_v28 = vpop.f32.mrf.mxu2 }
 0x162   : > { %v927_v35 = vadd.f32 %v926_v28, %v770_v3  ;;  %1214 = vmatmul.f32.gmra.mxu3 %v9415_v61  ;;  %1526 = vmatmul.f32.gmra.mxu1 %v9416_v49  ;;  %v778_v3 = vadd.f32 %v6368_v4, %v535_v62  ;;  %v1561_v28 = vsub.f32 0.0, %v1444_v48  ;;  %v551_v62 = vadd.f32 %v6268_v27, %v6398_v17 }
 0x163   : > { %v6578_v40 = vpop.f32.mrf.mxu0 }
 0x164   : > { %v6582_v38 = vadd.f32 %v1113_v47, %v927_v35  ;;  %v1594_v47 = vmul.f32 1.442695, %v1560_v11  ;;  %v5432_v5 = vpop.eup %5431  ;;  %v9421_v35 = vand.u32 4294901760, %v9420_v59  ;;  %v1596_v20 = vmul.f32 1.442695, %v1561_v28 }
 0x165   : > { %v1119_v16 = vpop.f32.mrf.mxu3  ;;  %v6615_v61 = vadd.f32 1.0, %v5432_v5  ;;  %v1598_v5 = vmul.f32 1.442695, %v1562_v36 }
 0x166   : > { %1010 = vmatmul.f32.gmra.mxu2 %v9414_v39  ;;  %1379 = vmatmul.f32.gmra.mxu0 %v9416_v49  ;;  %5435 = vpow2.f32 %v1594_v47  ;;  %v9422_v39 = vld [vmem:[#allocation11_spill] sm:$0xff] }
 0x167   : > { %v6587_v63 = vpop.f32.mrf.mxu1  ;;  %5437 = vrcp.f32 %v6615_v61  ;;  %vm1706_vm7 = vweird.f32 %v6615_v61 }
 0x168   : > { %5439 = vpow2.f32 %v1596_v20  ;;  %v9427_v20 = vand.u32 4294901760, %v9426_v21 }
 0x169   : > { %v931_v18 = vpop.f32.mrf.mxu2 }
 0x16a   : > { %v932_v2 = vadd.f32 %v931_v18, %v774_v19  ;;  %1220 = vmatmul.f32.gmra.mxu3 %v9418_v23  ;;  %1530 = vmatmul.f32.gmra.mxu1 %v9419_v22  ;;  %v9425_v23 = vld [vmem:[#allocation13_spill] sm:$0xff] }
 0x16b   : > { %v6597_v10 = vpop.f32.mrf.mxu0 }
 0x16c   : > { %v6601_v44 = vadd.f32 %v1119_v16, %v932_v2  ;;  %v6623_v16 = vpop.eup %5433  ;;  %v9423_v2 = vld [vmem:[#allocation14_spill] sm:$0xff] }
 0x16d   : > { %v1125_v33 = vpop.f32.mrf.mxu3  ;;  %v5436_v57 = vpop.eup %5435  ;;  %v1687_v19 = vmul.f32 %v6623_v16, %v6595_v45  ;;  %vm1692_vm2 = vweird.f32 %v6623_v16 }
 0x16e   : > { %1015 = vmatmul.f32.gmra.mxu2 %v9417_v60  ;;  %1383 = vmatmul.f32.gmra.mxu0 %v9419_v22  ;;  %v9424_v60 = vand.u32 4294901760, %v9423_v2  ;;  %v6639_v22 = vadd.f32 1.0, %v5436_v57  ;;  %vm6685_vm4 = vmor %vm1691_vm3, %vm1692_vm2 }
 0x16f   : > { %v6607_v32 = vpop.f32.mrf.mxu1  ;;  %v1688_v48 = vsub.f32 1.0, %v1687_v19 }
 0x170   : > { %5441 = vrcp.f32 %v6639_v22  ;;  %vm1721_vm11 = vweird.f32 %v6639_v22 }
 0x171   : > { %v936_v12 = vpop.f32.mrf.mxu2  ;;  %v1689_v17 = vmul.f32 %v6623_v16, %v1688_v48  ;;  %5443 = vpow2.f32 %v1598_v5 }
 0x172   : > { %v937_v30 = vadd.f32 %v936_v12, %v778_v3  ;;  %1226 = vmatmul.f32.gmra.mxu3 %v9421_v35  ;;  %1534 = vmatmul.f32.gmra.mxu1 %v9422_v39  ;;  %v786_v12 = vadd.f32 %v6392_v24, %v551_v62  ;;  %v1309_v35 = vadd.f32 %v6545_v31, %v6565_v50 }
 0x173   : > { %v6617_v49 = vpop.f32.mrf.mxu0  ;;  %v559_v24 = vadd.f32 %v6268_v27, %v6410_v7  ;;  %v1690_v19 = vadd.f32 %v6623_v16, %v1689_v17  ;;  %v1695_v7 = vand.u32 2147483647, %v6595_v45 }
 0x174   : > { %v6621_v4 = vadd.f32 %v1125_v33, %v937_v30  ;;  %v6648_v33 = vpop.eup %5437  ;;  %v1456_v36 = vadd.f32 %v6538_v6, %v1309_v35 }
 0x175   : > { %v1131_v55 = vpop.f32.mrf.mxu3  ;;  %v5440_v3 = vpop.eup %5439  ;;  %v1702_v26 = vmul.f32 %v6648_v33, %v6615_v61  ;;  %v1694_v6 = vsel %vm6685_vm4, %v6623_v16, %v1690_v19  ;;  %vm1696_vm5 = vcmp.eq.f32.partialorder %v1695_v7, 8.507059e+37  ;;  %v567_v16 = vadd.f32 %v6268_v27, %v6425_v13 }
 0x176   : > { %1020 = vmatmul.f32.gmra.mxu2 %v9420_v59  ;;  %1387 = vmatmul.f32.gmra.mxu0 %v9422_v39  ;;  %v6659_v59 = vadd.f32 1.0, %v5440_v3  ;;  %v6674_v31 = vpop.eup %5441  ;;  %v1564_v5 = vsub.f32 0.0, %v1456_v36  ;;  %vm1707_vm6 = vweird.f32 %v6648_v33  ;;  %v1710_v13 = vand.u32 2147483647, %v6615_v61 }
 0x177   : > { %v6631_v25 = vpop.f32.mrf.mxu1  ;;  %v1717_v62 = vmul.f32 %v6674_v31, %v6639_v22  ;;  %vm6726_vm8 = vmor %vm1706_vm7, %vm1707_vm6  ;;  %vm1722_vm10 = vweird.f32 %v6674_v31 }
 0x178   : > { %5445 = vrcp.f32 %v6659_v59  ;;  %vm1711_vm9 = vcmp.eq.f32.partialorder %v1710_v13, 8.507059e+37  ;;  %vm6771_vm12 = vmor %vm1721_vm11, %vm1722_vm10  ;;  %vm1736_vm15 = vweird.f32 %v6659_v59 }
 0x179   : > { %v941_v18 = vpop.f32.mrf.mxu2  ;;  %5447 = vpow2.f32 %v1600_v56  ;;  %v1602_v56 = vmul.f32 1.442695, %v1564_v5  ;;  %v575_v5 = vadd.f32 %v6268_v27, %v6439_v42 }
 0x17a   : > { %v942_v11 = vadd.f32 %v941_v18, %v782_v0  ;;  %1232 = vmatmul.f32.gmra.mxu3 %v9424_v60  ;;  %1538 = vmatmul.f32.gmra.mxu1 %v9425_v23  ;;  %v1703_v0 = vsub.f32 1.0, %v1702_v26  ;;  %v1697_v18 = vand.u32 2147483648, %v6595_v45  ;;  %v5444_v60 = vpop.eup %5443  ;;  %v1313_v45 = vadd.f32 %v6561_v34, %v6582_v38 }
 0x17b   : > { %v6642_v29 = vpop.f32.mrf.mxu0  ;;  %v6703_v17 = vadd.f32 1.0, %v5444_v60 }
 0x17c   : > { %v6646_v53 = vadd.f32 %v1131_v55, %v942_v11  ;;  %v9428_v55 = vld [vmem:[#allocation15_spill] sm:$0xff]  ;;  %v1704_v43 = vmul.f32 %v6648_v33, %v1703_v0 }
 0x17d   : > { %v1137_v47 = vpop.f32.mrf.mxu3  ;;  %5449 = vrcp.f32 %v6703_v17  ;;  %v9434_v0 = vld [vmem:[#allocation35_spill] sm:$0xff] }
 0x17e   : > { %1025 = vmatmul.f32.gmra.mxu2 %v9423_v2  ;;  %1391 = vmatmul.f32.gmra.mxu0 %v9425_v23  ;;  %v790_v23 = vadd.f32 %v6404_v15, %v559_v24  ;;  %v9433_v15 = vld [vmem:[#allocation17_spill] sm:$0xff]  ;;  %v6707_v35 = vpop.eup %5445  ;;  %v1705_v38 = vadd.f32 %v6648_v33, %v1704_v43  ;;  %v1712_v24 = vand.u32 2147483648, %v6615_v61  ;;  %5451 = vpow2.f32 %v1602_v56 }
 0x17f   : > { %v6653_v28 = vpop.f32.mrf.mxu1  ;;  %v1732_v2 = vmul.f32 %v6707_v35, %v6659_v59  ;;  %v1317_v43 = vadd.f32 %v6578_v40, %v6601_v44  ;;  %v1321_v56 = vadd.f32 %v6597_v10, %v6621_v4  ;;  %v9442_v10 = vld [vmem:[#allocation22_spill] sm:$0xff]  ;;  %vm1737_vm14 = vweird.f32 %v6707_v35 }
 0x180   : > { %v1709_v61 = vsel %vm6726_vm8, %v6648_v33, %v1705_v38  ;;  %v1727_v38 = vand.u32 2147483648, %v6639_v22  ;;  %v9443_v4 = vand.u32 4294901760, %v9442_v10  ;;  %vm6819_vm2 = vmor %vm1736_vm15, %vm1737_vm14 }
 0x181   : > { %v946_v30 = vpop.f32.mrf.mxu2  ;;  %v1733_v44 = vsub.f32 1.0, %v1732_v2  ;;  %v1464_v42 = vadd.f32 %v6570_v9, %v1317_v43  ;;  %v1468_v43 = vadd.f32 %v6587_v63, %v1321_v56 }
 0x182   : > { %v947_v39 = vadd.f32 %v946_v30, %v786_v12  ;;  %1238 = vmatmul.f32.gmra.mxu3 %v9427_v20  ;;  %1542 = vmatmul.f32.gmra.mxu1 %v9428_v55  ;;  %v9432_v12 = vand.u32 4294901760, %v9431_v52  ;;  %v1460_v20 = vadd.f32 %v6554_v51, %v1313_v45  ;;  %v9437_v45 = vld [vmem:[#allocation20_spill] sm:$0xff] }
 0x183   : > { %v6668_v46 = vpop.f32.mrf.mxu0 }
 0x184   : > { %v6670_v57 = vadd.f32 %v1137_v47, %v947_v39  ;;  %v1698_v47 = vor.u32 1.1754944e-38, %v1697_v18  ;;  %v1718_v39 = vsub.f32 1.0, %v1717_v62  ;;  %v1565_v60 = vsub.f32 0.0, %v1460_v20 }
 0x185   : > { %v1143_v50 = vpop.f32.mrf.mxu3  ;;  %v1728_v18 = vor.u32 1.1754944e-38, %v1727_v38 }
 0x186   : > { %1030 = vmatmul.f32.gmra.mxu2 %v9426_v21  ;;  %1395 = vmatmul.f32.gmra.mxu0 %v9428_v55  ;;  %v1699_v30 = vsel %vm1696_vm5, %v1698_v47, %v1694_v6  ;;  %v5448_v21 = vpop.eup %5447  ;;  %v1719_v7 = vmul.f32 %v6674_v31, %v1718_v39  ;;  %v1713_v6 = vor.u32 1.1754944e-38, %v1712_v24  ;;  %v9439_v47 = vld [vmem:[#allocation19_spill] sm:$0xff]  ;;  %vm1751_vm5 = vweird.f32 %v6703_v17 }
 0x187   : > { %v6683_v11 = vpop.f32.mrf.mxu1  ;;  %v2173_v51 = vsel %vm337_vm1, %v1699_v30, 0  ;;  %v6730_v36 = vadd.f32 1.0, %v5448_v21  ;;  %v1725_v21 = vand.u32 2147483647, %v6639_v22 }
 0x188   : > { %v6743_v33 = vand.u32 4294901760, %v2173_v51  ;;  %v1720_v40 = vadd.f32 %v6674_v31, %v1719_v7  ;;  %v1566_v7 = vsub.f32 0.0, %v1464_v42 }
 0x189   : > { %v951_v48 = vpop.f32.mrf.mxu2  ;;  %5453 = vrcp.f32 %v6730_v36  ;;  %vm1726_vm13 = vcmp.eq.f32.partialorder %v1725_v21, 8.507059e+37  ;;  %v9449_v21 = vld [vmem:[#allocation23_spill] sm:$0xff] }
 0x18a   : > { %v952_v3 = vadd.f32 %v951_v48, %v790_v23  ;;  %1244 = vmatmul.f32.gmra.mxu3 %v9432_v12  ;;  %1546 = vmatmul.f32.gmra.mxu1 %v9433_v15  ;;  %v9438_v48 = vand.u32 4294901760, %v9437_v45  ;;  %v6761_v39 = vsub.f32 %v2173_v51, %v6743_v33  ;;  %v1724_v22 = vsel %vm6771_vm12, %v6674_v31, %v1720_v40 }
 0x18b   : > { %v6705_v26 = vpop.f32.mrf.mxu0 }
 0x18c   : > { %v6709_v34 = vadd.f32 %v1143_v50, %v952_v3  ;;  %v794_v50 = vadd.f32 %v9434_v0, %v567_v16  ;;  %v1604_v16 = vmul.f32 1.442695, %v1565_v60  ;;  %v1734_v0 = vmul.f32 %v6707_v35, %v1733_v44  ;;  %v9444_v60 = vld [vmem:[#allocation21_spill] sm:$0xff] }
 0x18d   : > { %v1149_v55 = vpop.f32.mrf.mxu3  ;;  %v2291_v31 = vand.u32 4294901760, %v6761_v39  ;;  %v1606_v44 = vmul.f32 1.442695, %v1566_v7 }
 0x18e   : > { %1035 = vmatmul.f32.gmra.mxu2 %v9431_v52  ;;  %1399 = vmatmul.f32.gmra.mxu0 %v9433_v15  ;;  %v1714_v52 = vsel %vm1711_vm9, %v1713_v6, %v1709_v61  ;;  %v6754_v15 = vpop.eup %5449  ;;  %5455 = vpow2.f32 %v1604_v16  ;;  %vm1766_vm9 = vweird.f32 %v6730_v36 }
 0x18f   : > { %v6720_v19 = vpop.f32.mrf.mxu1  ;;  %v2176_v13 = vsel %vm337_vm1, %v1714_v52, 0  ;;  %v5452_v24 = vpop.eup %5451  ;;  %v1742_v52 = vand.u32 2147483648, %v6659_v59  ;;  %v2292_v38 = vsub.f32 %v6761_v39, %v2291_v31  ;;  %vm1752_vm4 = vweird.f32 %v6754_v15 }
 0x190   : > { %v6785_v61 = vpop.eup %5453  ;;  %vm6858_vm6 = vmor %vm1751_vm5, %vm1752_vm4 }
 0x191   : > { %v956_v23 = vpop.f32.mrf.mxu2  ;;  %v1762_v40 = vmul.f32 %v6785_v61, %v6730_v36  ;;  %vm1767_vm8 = vweird.f32 %v6785_v61 }
 0x192   : > { %v957_v62 = vadd.f32 %v956_v23, %v794_v50  ;;  %1250 = vmatmul.f32.gmra.mxu3 %v9438_v48  ;;  %1550 = vmatmul.f32.gmra.mxu1 %v9439_v47  ;;  %v583_v50 = vadd.f32 %v6268_v27, %v6452_v58  ;;  %v6791_v23 = vadd.f32 1.0, %v5452_v24  ;;  %v6795_v27 = vand.u32 4294901760, %v2176_v13  ;;  %vm6889_vm10 = vmor %vm1766_vm9, %vm1767_vm8 }
 0x193   : > { %v6747_v3 = vpop.f32.mrf.mxu0  ;;  %v1729_v58 = vsel %vm1726_vm13, %v1728_v18, %v1724_v22 }
 0x194   : > { %v6751_v12 = vadd.f32 %v1149_v55, %v957_v62  ;;  %v798_v55 = vadd.f32 %v6433_v41, %v575_v5  ;;  %v1747_v41 = vmul.f32 %v6754_v15, %v6703_v17  ;;  %v1740_v5 = vand.u32 2147483647, %v6659_v59  ;;  %v5456_v16 = vpop.eup %5455 }
 0x195   : > { %v1155_v30 = vpop.f32.mrf.mxu3  ;;  %v2179_v63 = vsel %vm337_vm1, %v1729_v58, 0  ;;  %5457 = vrcp.f32 %v6791_v23  ;;  %v6815_v42 = vsub.f32 %v2176_v13, %v6795_v27  ;;  %v802_v9 = vadd.f32 %v6446_v1, %v583_v50 }
 0x196   : > { %1040 = vmatmul.f32.gmra.mxu2 %v9437_v45  ;;  %1403 = vmatmul.f32.gmra.mxu0 %v9439_v47  ;;  %v1735_v45 = vadd.f32 %v6707_v35, %v1734_v0  ;;  %v1748_v48 = vsub.f32 1.0, %v1747_v41  ;;  %v6828_v22 = vand.u32 4294901760, %v2179_v63  ;;  %vm1741_vm3 = vcmp.eq.f32.partialorder %v1740_v5, 8.507059e+37 }
 0x197   : > { %v6765_v20 = vpop.f32.mrf.mxu1  ;;  %v1743_v13 = vor.u32 1.1754944e-38, %v1742_v52  ;;  %v1763_v0 = vsub.f32 1.0, %v1762_v40  ;;  %v6830_v41 = vadd.f32 1.0, %v5456_v16  ;;  %5459 = vpow2.f32 %v1606_v44 }
 0x198   : > { %v1739_v59 = vsel %vm6819_vm2, %v6707_v35, %v1735_v45  ;;  %v1749_v24 = vmul.f32 %v6754_v15, %v1748_v48  ;;  %v2293_v35 = vand.u32 4294901760, %v2292_v38  ;;  %v2299_v50 = vand.u32 4294901760, %v6815_v42 }
 0x199   : > { %v961_v51 = vpop.f32.mrf.mxu2  ;;  %v1744_v7 = vsel %vm1741_vm3, %v1743_v13, %v1739_v59  ;;  %v1764_v58 = vmul.f32 %v6785_v61, %v1763_v0  ;;  %5461 = vrcp.f32 %v6830_v41  ;;  %v6852_v45 = vsub.f32 %v2179_v63, %v6828_v22 }
 0x19a   : > { %v962_v2 = vadd.f32 %v961_v51, %v798_v55  ;;  %1256 = vmatmul.f32.gmra.mxu3 %v9443_v4  ;;  %1554 = vmatmul.f32.gmra.mxu1 %v9444_v60  ;;  %v1567_v55 = vsub.f32 0.0, %v1468_v43  ;;  %v1325_v51 = vadd.f32 %v6617_v49, %v6646_v53  ;;  %v2182_v48 = vsel %vm337_vm1, %v1744_v7, 0 }
 0x19b   : > { %v6793_v6 = vpop.f32.mrf.mxu0  ;;  %v6843_v49 = vpop.eup %5457  ;;  %v2300_v5 = vsub.f32 %v6815_v42, %v2299_v50  ;;  %v6867_v44 = vand.u32 4294901760, %v2182_v48  ;;  %v1765_v16 = vadd.f32 %v6785_v61, %v1764_v58  ;;  %v1770_v13 = vand.u32 2147483647, %v6730_v36 }
 0x19c   : > { %v6799_v62 = vadd.f32 %v1155_v30, %v962_v2  ;;  %v1755_v2 = vand.u32 2147483647, %v6703_v17  ;;  %v1472_v43 = vadd.f32 %v6607_v32, %v1325_v51  ;;  %v1329_v51 = vadd.f32 %v6642_v29, %v6670_v57 }
 0x19d   : > { %v1161_v47 = vpop.f32.mrf.mxu3  ;;  %v5460_v52 = vpop.eup %5459  ;;  %vm1771_vm11 = vcmp.eq.f32.partialorder %v1770_v13, 8.507059e+37  ;;  %vm1782_vm12 = vweird.f32 %v6843_v49  ;;  %vm1781_vm13 = vweird.f32 %v6791_v23  ;;  %vm1796_vm3 = vweird.f32 %v6830_v41 }
 0x19e   : > { %1045 = vmatmul.f32.gmra.mxu2 %v9442_v10  ;;  %1407 = vmatmul.f32.gmra.mxu0 %v9444_v60  ;;  %v1608_v10 = vmul.f32 1.442695, %v1567_v55  ;;  %v1750_v60 = vadd.f32 %v6754_v15, %v1749_v24  ;;  %vm1756_vm7 = vcmp.eq.f32.partialorder %v1755_v2, 8.507059e+37  ;;  %v1568_v38 = vsub.f32 0.0, %v1472_v43  ;;  %vm6941_vm14 = vmor %vm1781_vm13, %vm1782_vm12 }
 0x19f   : > { %v6811_v30 = vpop.f32.mrf.mxu1  ;;  %v6875_v59 = vadd.f32 1.0, %v5460_v52  ;;  %v6881_v0 = vpop.eup %5461 }
 0x1a0   : > { %5463 = vpow2.f32 %v1608_v10  ;;  %v1754_v32 = vsel %vm6858_vm6, %v6754_v15, %v1750_v60  ;;  %v2307_v15 = vand.u32 4294901760, %v6852_v45  ;;  %v6894_v10 = vsub.f32 %v2182_v48, %v6867_v44 }
 0x1a1   : > { %v966_v56 = vpop.f32.mrf.mxu2  ;;  %v1610_v29 = vmul.f32 1.442695, %v1568_v38  ;;  %5465 = vrcp.f32 %v6875_v59  ;;  %v1792_v43 = vmul.f32 %v6881_v0, %v6830_v41  ;;  %vm1797_vm2 = vweird.f32 %v6881_v0 }
 0x1a2   : > { %v967_v18 = vadd.f32 %v966_v56, %v802_v9  ;;  %2573 = vmatmul.f32.vlgmr.msra.gmra.mxu3 %v6743_v33  ;;  %2903 = vmatmul.f32.vlgmr.msra.gmra.mxu1 %v2291_v31  ;;  %v1757_v31 = vand.u32 2147483648, %v6703_v17  ;;  %v1772_v9 = vand.u32 2147483648, %v6730_v36  ;;  %v1769_v36 = vsel %vm6889_vm10, %v6785_v61, %v1765_v16  ;;  %vm6984_vm4 = vmor %vm1796_vm3, %vm1797_vm2 }
 0x1a3   : > { %v6835_v1 = vpop.f32.mrf.mxu0  ;;  %v2308_v58 = vsub.f32 %v6852_v45, %v2307_v15  ;;  %v1476_v61 = vadd.f32 %v6631_v25, %v1329_v51  ;;  %v2315_v52 = vand.u32 4294901760, %v6894_v10  ;;  %5467 = vpow2.f32 %v1610_v29 }
 0x1a4   : > { %v6839_v4 = vadd.f32 %v1161_v47, %v967_v18  ;;  %v1758_v63 = vor.u32 1.1754944e-38, %v1757_v31  ;;  %v1787_v51 = vand.u32 2147483648, %v6791_v23 }
 0x1a5   : > { %v1167_v53 = vpop.f32.mrf.mxu3  ;;  %v2309_v16 = vand.u32 4294901760, %v2308_v58 }
 0x1a6   : > { %2294 = vmatmul.f32.vlgmr.msra.gmra.mxu2 %v2293_v35  ;;  %2723 = vmatmul.f32.vlgmr.msra.gmra.mxu0 %v6761_v39  ;;  %v1777_v39 = vmul.f32 %v6843_v49, %v6791_v23  ;;  %v1759_v56 = vsel %vm1756_vm7, %v1758_v63, %v1754_v32  ;;  %v2301_v35 = vand.u32 4294901760, %v2300_v5  ;;  %v5464_v60 = vpop.eup %5463  ;;  %vm1811_vm7 = vweird.f32 %v6875_v59 }
 0x1a7   : > { %v6855_v47 = vpop.f32.mrf.mxu1  ;;  %v2185_v57 = vsel %vm337_vm1, %v1759_v56, 0  ;;  %v6909_v17 = vadd.f32 1.0, %v5464_v60  ;;  %v6925_v13 = vpop.eup %5465 }
 0x1a8   : > { %v1778_v7 = vsub.f32 1.0, %v1777_v39  ;;  %v6912_v32 = vand.u32 4294901760, %v2185_v57  ;;  %v1333_v39 = vadd.f32 %v6668_v46, %v6709_v34  ;;  %v2316_v34 = vsub.f32 %v6894_v10, %v2315_v52 }
 0x1a9   : > { %v971_v40 = vpop.f32.mrf.mxu2  ;;  %5469 = vrcp.f32 %v6909_v17  ;;  %v5468_v29 = vpop.eup %5467  ;;  %vm1812_vm6 = vweird.f32 %v6925_v13  ;;  %vm1826_vm10 = vweird.f32 %v6909_v17 }
 0x1aa   : > { %v972_v55 = vadd.f32 %v971_v40, %v9449_v21  ;;  %2577 = vmatmul.f32.gmra.mxu3 %v6795_v27  ;;  %2909 = vmatmul.f32.gmra.mxu1 %v2299_v50  ;;  %v1779_v5 = vmul.f32 %v6843_v49, %v1778_v7  ;;  %v9452_v40 = vld [vmem:[#allocation24_spill] sm:$0xff]  ;;  %v1793_v21 = vsub.f32 1.0, %v1792_v43  ;;  %v1785_v7 = vand.u32 2147483647, %v6791_v23  ;;  %vm7023_vm8 = vmor %vm1811_vm7, %vm1812_vm6 }
 0x1ab   : > { %v6877_v24 = vpop.f32.mrf.mxu0  ;;  %v1807_v23 = vmul.f32 %v6925_v13, %v6875_v59  ;;  %v2317_v58 = vand.u32 4294901760, %v2316_v34 }
 0x1ac   : > { %v6885_v18 = vadd.f32 %v1167_v53, %v972_v55  ;;  %v1773_v53 = vor.u32 1.1754944e-38, %v1772_v9  ;;  %v1569_v55 = vsub.f32 0.0, %v1476_v61  ;;  %v1780_v56 = vadd.f32 %v6843_v49, %v1779_v5  ;;  %v9455_v5 = vld [vmem:[#allocation25_spill] sm:$0xff] }
 0x1ad   : > { %v1173_v2 = vpop.f32.mrf.mxu3  ;;  %v1794_v60 = vmul.f32 %v6881_v0, %v1793_v21  ;;  %v1788_v61 = vor.u32 1.1754944e-38, %v1787_v51  ;;  %vm1786_vm15 = vcmp.eq.f32.partialorder %v1785_v7, 8.507059e+37 }
 0x1ae   : > { %2302 = vmatmul.f32.gmra.mxu2 %v2301_v35  ;;  %2728 = vmatmul.f32.gmra.mxu0 %v6815_v42  ;;  %v1774_v48 = vsel %vm1771_vm11, %v1773_v53, %v1769_v36  ;;  %v1480_v35 = vadd.f32 %v6653_v28, %v1333_v39  ;;  %v1337_v28 = vadd.f32 %v6705_v26, %v6751_v12 }
 0x1af   : > { %v6902_v31 = vpop.f32.mrf.mxu1  ;;  %v2188_v38 = vsel %vm337_vm1, %v1774_v48, 0  ;;  %v6959_v12 = vpop.eup %5469 }
 0x1b0   : > { %v6935_v50 = vand.u32 4294901760, %v2188_v38  ;;  %v1570_v48 = vsub.f32 0.0, %v1480_v35  ;;  %v1800_v35 = vand.u32 2147483647, %v6830_v41  ;;  %vm1827_vm11 = vweird.f32 %v6959_v12 }
 0x1b1   : > { %v976_v42 = vpop.f32.mrf.mxu2  ;;  %vm7059_vm12 = vmor %vm1826_vm10, %vm1827_vm11 }
 0x1b2   : > { %v977_v63 = vadd.f32 %v976_v42, %v9452_v40  ;;  %2581 = vmatmul.f32.gmra.mxu3 %v6828_v22  ;;  %2915 = vmatmul.f32.gmra.mxu1 %v2307_v15  ;;  %v6930_v15 = vsub.f32 %v2185_v57, %v6912_v32  ;;  %v1612_v57 = vmul.f32 1.442695, %v1569_v55  ;;  %v6957_v26 = vsub.f32 %v2188_v38, %v6935_v50 }
 0x1b3   : > { %v6918_v25 = vpop.f32.mrf.mxu0  ;;  %v1614_v34 = vmul.f32 1.442695, %v1570_v48  ;;  %vm1801_vm5 = vcmp.eq.f32.partialorder %v1800_v35, 8.507059e+37 }
 0x1b4   : > { %v6921_v9 = vadd.f32 %v1173_v2, %v977_v63  ;;  %v2323_v43 = vand.u32 4294901760, %v6930_v15  ;;  %v1795_v63 = vadd.f32 %v6881_v0, %v1794_v60  ;;  %5471 = vpow2.f32 %v1612_v57 }
 0x1b5   : > { %v1179_v46 = vpop.f32.mrf.mxu3  ;;  %v2331_v7 = vand.u32 4294901760, %v6957_v26  ;;  %v1341_v60 = vadd.f32 %v6747_v3, %v6799_v62 }
 0x1b6   : > { %2310 = vmatmul.f32.gmra.mxu2 %v2309_v16  ;;  %2733 = vmatmul.f32.gmra.mxu0 %v6852_v45  ;;  %v1784_v45 = vsel %vm6941_vm14, %v6843_v49, %v1780_v56  ;;  %v6961_v49 = vadd.f32 1.0, %v5468_v29  ;;  %v1484_v16 = vadd.f32 %v6683_v11, %v1337_v28  ;;  %v2324_v55 = vsub.f32 %v6930_v15, %v2323_v43 }
 0x1b7   : > { %v6939_v2 = vpop.f32.mrf.mxu1  ;;  %v1789_v40 = vsel %vm1786_vm15, %v1788_v61, %v1784_v45  ;;  %v1802_v56 = vand.u32 2147483648, %v6830_v41  ;;  %v1822_v11 = vmul.f32 %v6959_v12, %v6909_v17  ;;  %v1799_v41 = vsel %vm6984_vm4, %v6881_v0, %v1795_v63 }
 0x1b8   : > { %v2191_v51 = vsel %vm337_vm1, %v1789_v40, 0  ;;  %5473 = vrcp.f32 %v6961_v49  ;;  %v2325_v28 = vand.u32 4294901760, %v2324_v55  ;;  %v2332_v0 = vsub.f32 %v6957_v26, %v2331_v7 }
 0x1b9   : > { %v981_v53 = vpop.f32.mrf.mxu2  ;;  %v6994_v45 = vand.u32 4294901760, %v2191_v51  ;;  %5475 = vpow2.f32 %v1614_v34  ;;  %v1823_v3 = vsub.f32 1.0, %v1822_v11  ;;  %v1488_v40 = vadd.f32 %v6720_v19, %v1341_v60 }
 0x1ba   : > { %v982_v42 = vadd.f32 %v981_v53, %v9455_v5  ;;  %2585 = vmatmul.f32.gmra.mxu3 %v6867_v44  ;;  %2921 = vmatmul.f32.gmra.mxu1 %v2315_v52  ;;  %v1808_v52 = vsub.f32 1.0, %v1807_v23  ;;  %v1803_v23 = vor.u32 1.1754944e-38, %v1802_v56  ;;  %v5472_v53 = vpop.eup %5471  ;;  %v1815_v5 = vand.u32 2147483647, %v6875_v59 }
 0x1bb   : > { %v6963_v39 = vpop.f32.mrf.mxu0  ;;  %v7012_v56 = vsub.f32 %v2191_v51, %v6994_v45  ;;  %v1817_v34 = vand.u32 2147483648, %v6875_v59  ;;  %v1824_v19 = vmul.f32 %v6959_v12, %v1823_v3  ;;  %v2333_v35 = vand.u32 4294901760, %v2332_v0 }
 0x1bc   : > { %v6968_v21 = vadd.f32 %v1179_v46, %v982_v42  ;;  %v1809_v29 = vmul.f32 %v6925_v13, %v1808_v52  ;;  %v1804_v48 = vsel %vm1801_vm5, %v1803_v23, %v1799_v41  ;;  %vm7027_vm9 = vcmp.eq.f32.partialorder %v1815_v5, 8.507059e+37  ;;  %v9463_v23 = vld [vmem:[#allocation27_spill] sm:$0xff] }
 0x1bd   : > { %v1185_v38 = vpop.f32.mrf.mxu3  ;;  %v2194_v11 = vsel %vm337_vm1, %v1804_v48, 0  ;;  %v1572_v59 = vsub.f32 0.0, %v1488_v40  ;;  %vm1841_vm15 = vweird.f32 %v6961_v49 }
 0x1be   : > { %2318 = vmatmul.f32.gmra.mxu2 %v2317_v58  ;;  %2738 = vmatmul.f32.gmra.mxu0 %v6894_v10  ;;  %v1571_v10 = vsub.f32 0.0, %v1484_v16  ;;  %v9458_v58 = vld [vmem:[#allocation26_spill] sm:$0xff]  ;;  %v1810_v16 = vadd.f32 %v6925_v13, %v1809_v29  ;;  %v7007_v52 = vpop.eup %5473  ;;  %v2339_v29 = vand.u32 4294901760, %v7012_v56  ;;  %v7049_v3 = vand.u32 4294901760, %v2194_v11 }
 0x1bf   : > { %v6979_v46 = vpop.f32.mrf.mxu1  ;;  %v1837_v60 = vmul.f32 %v7007_v52, %v6961_v49  ;;  %vm1842_vm14 = vweird.f32 %v7007_v52 }
 0x1c0   : > { %v1616_v42 = vmul.f32 1.442695, %v1571_v10  ;;  %v1814_v10 = vsel %vm7023_vm8, %v6925_v13, %v1810_v16  ;;  %v1825_v13 = vadd.f32 %v6959_v12, %v1824_v19  ;;  %9464 = vst [vmem:[#allocation6_spill] sm:$0xff] %v7049_v3  ;;  %v2340_v51 = vsub.f32 %v7012_v56, %v2339_v29  ;;  %vm7114_vm2 = vmor %vm1841_vm15, %vm1842_vm14 }
 0x1c1   : > { %v986_v57 = vpop.f32.mrf.mxu2  ;;  %v1838_v5 = vsub.f32 1.0, %v1837_v60 }
 0x1c2   : > { %v987_v61 = vadd.f32 %v986_v57, %v9458_v58  ;;  %2589 = vmatmul.f32.gmra.mxu3 %v6912_v32  ;;  %2927 = vmatmul.f32.gmra.mxu1 %v2323_v43  ;;  %v7009_v43 = vadd.f32 1.0, %v5472_v53  ;;  %5477 = vpow2.f32 %v1616_v42  ;;  %v1818_v57 = vor.u32 1.1754944e-38, %v1817_v34 }
 0x1c3   : > { %v6998_v62 = vpop.f32.mrf.mxu0 }
 0x1c4   : > { %v7004_v63 = vadd.f32 %v1185_v38, %v987_v61  ;;  %5479 = vrcp.f32 %v7009_v43  ;;  %v1819_v0 = vsel %vm7027_vm9, %v1818_v57, %v1814_v10  ;;  %v9468_v57 = vld [vmem:[#allocation28_spill] sm:$0xff]  ;;  %vm1856_vm5 = vweird.f32 %v7009_v43 }
 0x1c5   : > { %v1191_v55 = vpop.f32.mrf.mxu3  ;;  %v2197_v19 = vsel %vm337_vm1, %v1819_v0, 0  ;;  %v1845_v0 = vand.u32 2147483647, %v6961_v49 }
 0x1c6   : > { %2326 = vmatmul.f32.gmra.mxu2 %v2325_v28  ;;  %2743 = vmatmul.f32.gmra.mxu0 %v6930_v15  ;;  %v5476_v15 = vpop.eup %5475  ;;  %v1345_v28 = vadd.f32 %v6793_v6, %v6839_v4  ;;  %v1832_v6 = vand.u32 2147483648, %v6909_v17  ;;  %v1618_v4 = vmul.f32 1.442695, %v1572_v59 }
 0x1c7   : > { %v7018_v38 = vpop.f32.mrf.mxu1  ;;  %v7045_v58 = vadd.f32 1.0, %v5476_v15  ;;  %v7076_v15 = vsub.f32 %v2194_v11, %v7049_v3  ;;  %vm1846_vm3 = vcmp.eq.f32.partialorder %v1845_v0, 8.507059e+37 }
 0x1c8   : > { %v5478_v16 = vpop.eup %5477  ;;  %v1492_v34 = vadd.f32 %v6765_v20, %v1345_v28  ;;  %v1833_v20 = vor.u32 1.1754944e-38, %v1832_v6 }
 0x1c9   : > { %v991_v41 = vpop.f32.mrf.mxu2  ;;  %5481 = vrcp.f32 %v7045_v58  ;;  %vm1871_vm9 = vweird.f32 %v7045_v58 }
 0x1ca   : > { %v992_v53 = vadd.f32 %v991_v41, %v9463_v23  ;;  %2593 = vmatmul.f32.gmra.mxu3 %v6935_v50  ;;  %2933 = vmatmul.f32.gmra.mxu1 %v2331_v7  ;;  %v1830_v7 = vand.u32 2147483647, %v6909_v17  ;;  %v7069_v36 = vpop.eup %5479  ;;  %5483 = vpow2.f32 %v1618_v4  ;;  %v1573_v60 = vsub.f32 0.0, %v1492_v34 }
 0x1cb   : > { %v7047_v61 = vpop.f32.mrf.mxu0  ;;  %v1349_v41 = vadd.f32 %v6835_v1, %v6885_v18  ;;  %v1852_v11 = vmul.f32 %v7069_v36, %v7009_v43  ;;  %vm1857_vm4 = vweird.f32 %v7069_v36 }
 0x1cc   : > { %v7054_v48 = vadd.f32 %v1191_v55, %v992_v53  ;;  %v1829_v55 = vsel %vm7059_vm12, %v6959_v12, %v1825_v13  ;;  %vm1831_vm13 = vcmp.eq.f32.partialorder %v1830_v7, 8.507059e+37  ;;  %v7081_v12 = vand.u32 4294901760, %v2197_v19  ;;  %vm7162_vm6 = vmor %vm1856_vm5, %vm1857_vm4 }
 0x1cd   : > { %v1197_v42 = vpop.f32.mrf.mxu3  ;;  %v1834_v10 = vsel %vm1831_vm13, %v1833_v20, %v1829_v55  ;;  %v2341_v53 = vand.u32 4294901760, %v2340_v51  ;;  %v2347_v13 = vand.u32 4294901760, %v7076_v15  ;;  %v1853_v34 = vsub.f32 1.0, %v1852_v11 }
 0x1ce   : > { %2334 = vmatmul.f32.gmra.mxu2 %v2333_v35  ;;  %2748 = vmatmul.f32.gmra.mxu0 %v6957_v26  ;;  %v1839_v26 = vmul.f32 %v7007_v52, %v1838_v5  ;;  %v7079_v35 = vadd.f32 1.0, %v5478_v16  ;;  %9467 = vst [vmem:[#allocation5_spill] sm:$0xff] %v7081_v12  ;;  %v2200_v4 = vsel %vm337_vm1, %v1834_v10, 0  ;;  %v7102_v7 = vsub.f32 %v2197_v19, %v7081_v12 }
 0x1cf   : > { %v7072_v17 = vpop.f32.mrf.mxu1  ;;  %v7098_v18 = vpop.eup %5481  ;;  %v1847_v5 = vand.u32 2147483648, %v6961_v49  ;;  %v1620_v16 = vmul.f32 1.442695, %v1573_v60  ;;  %v7110_v51 = vand.u32 4294901760, %v2200_v4  ;;  %v1353_v20 = vadd.f32 %v6877_v24, %v6921_v9 }
 0x1d0   : > { %v1840_v1 = vadd.f32 %v7007_v52, %v1839_v26  ;;  %5485 = vrcp.f32 %v7079_v35  ;;  %v5484_v40 = vpop.eup %5483  ;;  %v1867_v60 = vmul.f32 %v7098_v18, %v7045_v58  ;;  %v1854_v9 = vmul.f32 %v7069_v36, %v1853_v34 }
 0x1d1   : > { %v996_v59 = vpop.f32.mrf.mxu2  ;;  %9469 = vst [vmem:[#allocation8_spill] sm:$0xff] %v7110_v51  ;;  %v1848_v10 = vor.u32 1.1754944e-38, %v1847_v5  ;;  %5487 = vpow2.f32 %v1620_v16  ;;  %v7137_v11 = vsub.f32 %v2200_v4, %v7110_v51  ;;  %v1500_v0 = vadd.f32 %v6855_v47, %v1353_v20 }
 0x1d2   : > { %v997_v28 = vadd.f32 %v996_v59, %v9468_v57  ;;  %2597 = vmatmul.f32.gmra.mxu3 %v6994_v45  ;;  %2939 = vmatmul.f32.gmra.mxu1 %v2339_v29  ;;  %v1844_v49 = vsel %vm7114_vm2, %v7007_v52, %v1840_v1  ;;  %v2355_v59 = vand.u32 4294901760, %v7102_v7  ;;  %v9472_v57 = vld [vmem:[#allocation29_spill] sm:$0xff]  ;;  %v1868_v16 = vsub.f32 1.0, %v1867_v60 }
 0x1d3   : > { %v7089_v23 = vpop.f32.mrf.mxu0  ;;  %v1855_v34 = vadd.f32 %v7069_v36, %v1854_v9  ;;  %v2363_v19 = vand.u32 4294901760, %v7137_v11  ;;  %v1860_v20 = vand.u32 2147483647, %v7009_v43  ;;  %v9476_v9 = vld [vmem:[#allocation30_spill] sm:$0xff]  ;;  %vm1872_vm8 = vweird.f32 %v7098_v18 }
 0x1d4   : > { %v7093_v6 = vadd.f32 %v1197_v42, %v997_v28  ;;  %v1496_v42 = vadd.f32 %v6811_v30, %v1349_v41  ;;  %v2348_v30 = vsub.f32 %v7076_v15, %v2347_v13  ;;  %vm7198_vm10 = vmor %vm1871_vm9, %vm1872_vm8  ;;  %vm1886_vm13 = vweird.f32 %v7079_v35 }
 0x1d5   : > { %v1203_v29 = vpop.f32.mrf.mxu3  ;;  %vm1861_vm7 = vcmp.eq.f32.partialorder %v1860_v20, 8.507059e+37 }
 0x1d6   : > { %2342 = vmatmul.f32.gmra.mxu2 %v2341_v53  ;;  %2753 = vmatmul.f32.gmra.mxu0 %v7012_v56  ;;  %v7124_v56 = vadd.f32 1.0, %v5484_v40  ;;  %v1574_v41 = vsub.f32 0.0, %v1496_v42  ;;  %v7132_v52 = vpop.eup %5485  ;;  %v1849_v53 = vsel %vm1846_vm3, %v1848_v10, %v1844_v49  ;;  %v2349_v5 = vand.u32 4294901760, %v2348_v30 }
 0x1d7   : > { %v7108_v55 = vpop.f32.mrf.mxu1  ;;  %v2203_v4 = vsel %vm337_vm1, %v1849_v53, 0  ;;  %v1882_v47 = vmul.f32 %v7132_v52, %v7079_v35  ;;  %v1862_v30 = vand.u32 2147483648, %v7009_v43  ;;  %v5488_v49 = vpop.eup %5487  ;;  %vm1887_vm12 = vweird.f32 %v7132_v52 }
 0x1d8   : > { %5489 = vrcp.f32 %v7124_v56  ;;  %v1622_v42 = vmul.f32 1.442695, %v1574_v41  ;;  %v7158_v41 = vand.u32 4294901760, %v2203_v4  ;;  %vm7234_vm14 = vmor %vm1886_vm13, %vm1887_vm12  ;;  %vm1901_vm3 = vweird.f32 %v7124_v56 }
 0x1d9   : > { %v1001_v26 = vpop.f32.mrf.mxu2 }
 0x1da   : > { %v1002_v24 = vadd.f32 %v1001_v26, %v9472_v57  ;;  %2601 = vmatmul.f32.gmra.mxu3 %v7049_v3  ;;  %2945 = vmatmul.f32.gmra.mxu1 %v2347_v13  ;;  %v2356_v13 = vsub.f32 %v7102_v7, %v2355_v59  ;;  %v1575_v26 = vsub.f32 0.0, %v1500_v0  ;;  %9473 = vst [vmem:[#allocation7_spill] sm:$0xff] %v7158_v41  ;;  %5491 = vpow2.f32 %v1622_v42 }
 0x1db   : > { %v7134_v28 = vpop.f32.mrf.mxu0  ;;  %v7174_v0 = vadd.f32 1.0, %v5488_v49 }
 0x1dc   : > { %v7140_v1 = vadd.f32 %v1203_v29, %v1002_v24  ;;  %v2357_v60 = vand.u32 4294901760, %v2356_v13  ;;  %v1869_v24 = vmul.f32 %v7098_v18, %v1868_v16  ;;  %v2364_v13 = vsub.f32 %v7137_v11, %v2363_v19 }
 0x1dd   : > { %v1209_v40 = vpop.f32.mrf.mxu3  ;;  %v1863_v16 = vor.u32 1.1754944e-38, %v1862_v30  ;;  %v1624_v42 = vmul.f32 1.442695, %v1575_v26  ;;  %5493 = vrcp.f32 %v7174_v0 }
 0x1de   : > { %2350 = vmatmul.f32.gmra.mxu2 %v2349_v5  ;;  %2758 = vmatmul.f32.gmra.mxu0 %v7076_v15  ;;  %v1357_v15 = vadd.f32 %v6918_v25, %v6968_v21  ;;  %v1859_v25 = vsel %vm7162_vm6, %v7069_v36, %v1855_v34  ;;  %v1883_v21 = vsub.f32 1.0, %v1882_v47  ;;  %v7172_v43 = vpop.eup %5489  ;;  %v7184_v36 = vsub.f32 %v2203_v4, %v7158_v41 }
 0x1df   : > { %v7150_v29 = vpop.f32.mrf.mxu1  ;;  %v1864_v34 = vsel %vm1861_vm7, %v1863_v16, %v1859_v25  ;;  %v1870_v47 = vadd.f32 %v7098_v18, %v1869_v24  ;;  %v1877_v4 = vand.u32 2147483648, %v7045_v58  ;;  %5495 = vpow2.f32 %v1624_v42 }
 0x1e0   : > { %v1884_v20 = vmul.f32 %v7132_v52, %v1883_v21  ;;  %v5492_v30 = vpop.eup %5491  ;;  %v2365_v26 = vand.u32 4294901760, %v2364_v13  ;;  %v2371_v24 = vand.u32 4294901760, %v7184_v36  ;;  %v9481_v21 = vld [vmem:[#allocation31_spill] sm:$0xff]  ;;  %vm1902_vm2 = vweird.f32 %v7172_v43 }
 0x1e1   : > { %v1006_v10 = vpop.f32.mrf.mxu2  ;;  %vm7277_vm4 = vmor %vm1901_vm3, %vm1902_vm2  ;;  %vm1916_vm7 = vweird.f32 %v7174_v0 }
 0x1e2   : > { %v1007_v53 = vadd.f32 %v1006_v10, %v9476_v9  ;;  %2605 = vmatmul.f32.gmra.mxu3 %v7081_v12  ;;  %2951 = vmatmul.f32.gmra.mxu1 %v2355_v59  ;;  %v1504_v10 = vadd.f32 %v6902_v31, %v1357_v15  ;;  %v1875_v59 = vand.u32 2147483647, %v7045_v58  ;;  %v1897_v31 = vmul.f32 %v7172_v43, %v7124_v56 }
 0x1e3   : > { %v7176_v5 = vpop.f32.mrf.mxu0  ;;  %v2206_v15 = vsel %vm337_vm1, %v1864_v34, 0  ;;  %v1361_v58 = vadd.f32 %v6963_v39, %v7004_v63  ;;  %v1885_v16 = vadd.f32 %v7132_v52, %v1884_v20  ;;  %v1878_v34 = vor.u32 1.1754944e-38, %v1877_v4  ;;  %v7227_v63 = vpop.eup %5493 }
 0x1e4   : > { %v7180_v9 = vadd.f32 %v1209_v40, %v1007_v53  ;;  %v1576_v49 = vsub.f32 0.0, %v1504_v10  ;;  %v1874_v53 = vsel %vm7198_vm10, %v7098_v18, %v1870_v47  ;;  %vm7206_vm11 = vcmp.eq.f32.partialorder %v1875_v59, 8.507059e+37 }
 0x1e5   : > { %v1215_v57 = vpop.f32.mrf.mxu3  ;;  %v1898_v42 = vsub.f32 1.0, %v1897_v31  ;;  %v7216_v10 = vadd.f32 1.0, %v5492_v30  ;;  %v7220_v59 = vand.u32 4294901760, %v2206_v15  ;;  %v1892_v47 = vand.u32 2147483648, %v7079_v35 }
 0x1e6   : > { %2358 = vmatmul.f32.gmra.mxu2 %v2357_v60  ;;  %2763 = vmatmul.f32.gmra.mxu0 %v7102_v7  ;;  %v1626_v7 = vmul.f32 1.442695, %v1576_v49  ;;  %v1890_v39 = vand.u32 2147483647, %v7079_v35  ;;  %v2372_v20 = vsub.f32 %v7184_v36, %v2371_v24  ;;  %v1879_v31 = vsel %vm7206_vm11, %v1878_v34, %v1874_v53 }
 0x1e7   : > { %v7193_v40 = vpop.f32.mrf.mxu1  ;;  %9482 = vst [vmem:[#allocation10_spill] sm:$0xff] %v7220_v59  ;;  %v1508_v30 = vadd.f32 %v6939_v2, %v1361_v58  ;;  %v1889_v35 = vsel %vm7234_vm14, %v7132_v52, %v1885_v16  ;;  %v1899_v49 = vmul.f32 %v7172_v43, %v1898_v42  ;;  %5497 = vrcp.f32 %v7216_v10  ;;  %v9485_v16 = vld [vmem:[#allocation32_spill] sm:$0xff] }
 0x1e8   : > { %v7248_v53 = vsub.f32 %v2206_v15, %v7220_v59  ;;  %v1893_v25 = vor.u32 1.1754944e-38, %v1892_v47  ;;  %5499 = vpow2.f32 %v1626_v7  ;;  %v2209_v2 = vsel %vm337_vm1, %v1879_v31, 0 }
 0x1e9   : > { %v1011_v60 = vpop.f32.mrf.mxu2  ;;  %vm1891_vm15 = vcmp.eq.f32.partialorder %v1890_v39, 8.507059e+37  ;;  %v2373_v58 = vand.u32 4294901760, %v2372_v20  ;;  %v1365_v15 = vadd.f32 %v6998_v62, %v7054_v48  ;;  %v1900_v34 = vadd.f32 %v7172_v43, %v1899_v49 }
 0x1ea   : > { %v1012_v13 = vadd.f32 %v1011_v60, %v9481_v21  ;;  %2609 = vmatmul.f32.gmra.mxu3 %v7110_v51  ;;  %2957 = vmatmul.f32.gmra.mxu1 %v2363_v19  ;;  %v1894_v21 = vsel %vm1891_vm15, %v1893_v25, %v1889_v35  ;;  %v2379_v7 = vand.u32 4294901760, %v7248_v53  ;;  %v7264_v39 = vand.u32 4294901760, %v2209_v2 }
 0x1eb   : > { %v7218_v18 = vpop.f32.mrf.mxu0  ;;  %v1907_v20 = vand.u32 2147483648, %v7124_v56  ;;  %v2212_v62 = vsel %vm337_vm1, %v1894_v21, 0  ;;  %v1905_v48 = vand.u32 2147483647, %v7124_v56  ;;  %v1904_v56 = vsel %vm7277_vm4, %v7172_v43, %v1900_v34 }
 0x1ec   : > { %v7223_v12 = vadd.f32 %v1215_v57, %v1012_v13  ;;  %v5496_v57 = vpop.eup %5495  ;;  %v1577_v13 = vsub.f32 0.0, %v1508_v30  ;;  %v7292_v21 = vand.u32 4294901760, %v2212_v62  ;;  %vm1917_vm6 = vweird.f32 %v7227_v63 }
 0x1ed   : > { %v1221_v19 = vpop.f32.mrf.mxu3  ;;  %vm1906_vm5 = vcmp.eq.f32.partialorder %v1905_v48, 8.507059e+37  ;;  %vm7328_vm8 = vmor %vm1916_vm7, %vm1917_vm6  ;;  %vm1931_vm11 = vweird.f32 %v7216_v10 }
 0x1ee   : > { %2366 = vmatmul.f32.gmra.mxu2 %v2365_v26  ;;  %2768 = vmatmul.f32.gmra.mxu0 %v7137_v11  ;;  %v1912_v11 = vmul.f32 %v7227_v63, %v7174_v0  ;;  %v7253_v26 = vadd.f32 1.0, %v5496_v57  ;;  %v1628_v49 = vmul.f32 1.442695, %v1577_v13 }
 0x1ef   : > { %v7245_v60 = vpop.f32.mrf.mxu1 }
 0x1f0   : > { %v1913_v4 = vsub.f32 1.0, %v1912_v11  ;;  %5501 = vrcp.f32 %v7253_v26  ;;  %v2380_v11 = vsub.f32 %v7248_v53, %v2379_v7  ;;  %vm1946_vm15 = vweird.f32 %v7253_v26 }
 0x1f1   : > { %v1016_v52 = vpop.f32.mrf.mxu2  ;;  %5503 = vpow2.f32 %v1628_v49 }
 0x1f2   : > { %v1017_v42 = vadd.f32 %v1016_v52, %v9485_v16  ;;  %2613 = vmatmul.f32.gmra.mxu3 %v7158_v41  ;;  %2963 = vmatmul.f32.gmra.mxu1 %v2371_v24  ;;  %v7272_v24 = vpop.eup %5497  ;;  %v7290_v52 = vsub.f32 %v2209_v2, %v7264_v39  ;;  %v1908_v16 = vor.u32 1.1754944e-38, %v1907_v20  ;;  %v9488_v2 = vld [vmem:[#allocation33_spill] sm:$0xff] }
 0x1f3   : > { %v7261_v47 = vpop.f32.mrf.mxu0  ;;  %v5500_v35 = vpop.eup %5499  ;;  %v1927_v43 = vmul.f32 %v7272_v24, %v7216_v10  ;;  %vm1932_vm10 = vweird.f32 %v7272_v24 }
 0x1f4   : > { %v7268_v31 = vadd.f32 %v1221_v19, %v1017_v42  ;;  %v1512_v19 = vadd.f32 %v6979_v46, %v1365_v15  ;;  %v1914_v46 = vmul.f32 %v7227_v63, %v1913_v4  ;;  %v1909_v13 = vsel %vm1906_vm5, %v1908_v16, %v1904_v56  ;;  %vm7373_vm12 = vmor %vm1931_vm11, %vm1932_vm10 }
 0x1f5   : > { %v1227_v57 = vpop.f32.mrf.mxu3  ;;  %v1369_v42 = vadd.f32 %v7047_v61, %v7093_v6  ;;  %v2381_v4 = vand.u32 4294901760, %v2380_v11  ;;  %v2387_v30 = vand.u32 4294901760, %v7290_v52  ;;  %v1922_v56 = vand.u32 2147483648, %v7174_v0 }
 0x1f6   : > { %2374 = vmatmul.f32.gmra.mxu2 %v2373_v58  ;;  %2773 = vmatmul.f32.gmra.mxu0 %v7184_v36  ;;  %v7295_v58 = vadd.f32 1.0, %v5500_v35  ;;  %v1578_v15 = vsub.f32 0.0, %v1512_v19  ;;  %v7303_v20 = vpop.eup %5501  ;;  %v7309_v35 = vsub.f32 %v2212_v62, %v7292_v21  ;;  %v2215_v19 = vsel %vm337_vm1, %v1909_v13, 0 }
 0x1f7   : > { %v7286_v25 = vpop.f32.mrf.mxu1  ;;  %v1915_v61 = vadd.f32 %v7227_v63, %v1914_v46  ;;  %v1928_v11 = vsub.f32 1.0, %v1927_v43  ;;  %v1516_v62 = vadd.f32 %v7018_v38, %v1369_v42  ;;  %v5504_v43 = vpop.eup %5503  ;;  %vm1947_vm14 = vweird.f32 %v7303_v20 }
 0x1f8   : > { %5505 = vrcp.f32 %v7295_v58  ;;  %v1630_v16 = vmul.f32 1.442695, %v1578_v15  ;;  %v2388_v15 = vsub.f32 %v7290_v52, %v2387_v30  ;;  %v2395_v38 = vand.u32 4294901760, %v7309_v35  ;;  %vm7410_vm2 = vmor %vm1946_vm15, %vm1947_vm14 }
 0x1f9   : > { %v1021_v36 = vpop.f32.mrf.mxu2  ;;  %v7344_v13 = vadd.f32 1.0, %v5504_v43  ;;  %v1937_v43 = vand.u32 2147483648, %v7216_v10  ;;  %vm1961_vm4 = vweird.f32 %v7295_v58 }
 0x1fa   : > { %v1022_v34 = vadd.f32 %v1021_v36, %v9488_v2  ;;  %2617 = vmatmul.f32.gmra.mxu3 %v7220_v59  ;;  %2969 = vmatmul.f32.gmra.mxu1 %v2379_v7  ;;  %v1920_v7 = vand.u32 2147483647, %v7174_v0  ;;  %v7326_v36 = vand.u32 4294901760, %v2215_v19  ;;  %v1919_v0 = vsel %vm7328_vm8, %v7227_v63, %v1915_v61  ;;  %v9491_v59 = vld [vmem:[#allocation34_spill] sm:$0xff] }
 0x1fb   : > { %v7305_v48 = vpop.f32.mrf.mxu0  ;;  %v1923_v2 = vor.u32 1.1754944e-38, %v1922_v56  ;;  %5507 = vpow2.f32 %v1630_v16  ;;  %v2396_v56 = vsub.f32 %v7309_v35, %v2395_v38 }
 0x1fc   : > { %v7311_v49 = vadd.f32 %v1227_v57, %v1022_v34  ;;  %v1942_v57 = vmul.f32 %v7303_v20, %v7253_v26  ;;  %vm1921_vm9 = vcmp.eq.f32.partialorder %v1920_v7, 8.507059e+37  ;;  %v1929_v34 = vmul.f32 %v7272_v24, %v1928_v11 }
 0x1fd   : > { %v1233_v6 = vpop.f32.mrf.mxu3  ;;  %v2389_v7 = vand.u32 4294901760, %v2388_v15  ;;  %5509 = vrcp.f32 %v7344_v13 }
 0x1fe   : > { %2382 = vmatmul.f32.gmra.mxu2 %v2381_v4  ;;  %2778 = vmatmul.f32.gmra.mxu0 %v7248_v53  ;;  %v1373_v53 = vadd.f32 %v7089_v23, %v7140_v1  ;;  %v1579_v4 = vsub.f32 0.0, %v1516_v62  ;;  %v1943_v51 = vsub.f32 1.0, %v1942_v57  ;;  %v7342_v3 = vpop.eup %5505  ;;  %v7349_v23 = vsub.f32 %v2215_v19, %v7326_v36 }
 0x1ff   : > { %v7324_v46 = vpop.f32.mrf.mxu1  ;;  %v1924_v1 = vsel %vm1921_vm9, %v1923_v2, %v1919_v0  ;;  %v1930_v16 = vadd.f32 %v7272_v24, %v1929_v34  ;;  %v2397_v0 = vand.u32 4294901760, %v2396_v56  ;;  %vm1962_vm5 = vweird.f32 %v7342_v3 }
 0x200   : > { %v1632_v62 = vmul.f32 1.442695, %v1579_v4  ;;  %v2218_v19 = vsel %vm337_vm1, %v1924_v1, 0  ;;  %vm7448_vm6 = vmor %vm1961_vm4, %vm1962_vm5  ;;  %vm1976_vm9 = vweird.f32 %v7344_v13 }
 0x201   : > { %v1026_v42 = vpop.f32.mrf.mxu2  ;;  %v5508_v15 = vpop.eup %5507  ;;  %v7381_v34 = vand.u32 4294901760, %v2218_v19 }
 0x202   : > { %v1027_v41 = vadd.f32 %v1026_v42, %v9491_v59  ;;  %2621 = vmatmul.f32.gmra.mxu3 %v7264_v39  ;;  %2975 = vmatmul.f32.gmra.mxu1 %v2387_v30  ;;  %v1935_v59 = vand.u32 2147483647, %v7216_v10  ;;  %v1520_v30 = vadd.f32 %v7072_v17, %v1373_v53  ;;  %v2403_v17 = vand.u32 4294901760, %v7349_v23 }
 0x203   : > { %v7346_v63 = vpop.f32.mrf.mxu0  ;;  %v1934_v10 = vsel %vm7373_vm12, %v7272_v24, %v1930_v16  ;;  %5511 = vpow2.f32 %v1632_v62  ;;  %v7390_v1 = vadd.f32 1.0, %v5508_v15  ;;  %v1952_v24 = vand.u32 2147483648, %v7253_v26 }
 0x204   : > { %v7351_v61 = vadd.f32 %v1233_v6, %v1027_v41  ;;  %v1944_v41 = vmul.f32 %v7303_v20, %v1943_v51  ;;  %v1957_v6 = vmul.f32 %v7342_v3, %v7295_v58  ;;  %vm7377_vm13 = vcmp.eq.f32.partialorder %v1935_v59, 8.507059e+37 }
 0x205   : > { %v1239_v11 = vpop.f32.mrf.mxu3  ;;  %v1580_v42 = vsub.f32 0.0, %v1520_v30  ;;  %v2404_v56 = vsub.f32 %v7349_v23, %v2403_v17  ;;  %v1938_v59 = vor.u32 1.1754944e-38, %v1937_v43  ;;  %5513 = vrcp.f32 %v7390_v1 }
 0x206   : > { %2390 = vmatmul.f32.gmra.mxu2 %v2389_v7  ;;  %2783 = vmatmul.f32.gmra.mxu0 %v7290_v52  ;;  %v1377_v52 = vadd.f32 %v7134_v28, %v7180_v9  ;;  %v1945_v9 = vadd.f32 %v7303_v20, %v1944_v41  ;;  %v1958_v4 = vsub.f32 1.0, %v1957_v6  ;;  %v7404_v6 = vsub.f32 %v2218_v19, %v7381_v34 }
 0x207   : > { %v7364_v57 = vpop.f32.mrf.mxu1  ;;  %v1634_v62 = vmul.f32 1.442695, %v1580_v42  ;;  %v1939_v43 = vsel %vm7377_vm13, %v1938_v59, %v1934_v10  ;;  %v2405_v15 = vand.u32 4294901760, %v2404_v56  ;;  %v1381_v10 = vadd.f32 %v7176_v5, %v7223_v12 }
 0x208   : > { %v1524_v30 = vadd.f32 %v7108_v55, %v1377_v52  ;;  %v1953_v52 = vor.u32 1.1754944e-38, %v1952_v24  ;;  %v2221_v42 = vsel %vm337_vm1, %v1939_v43, 0  ;;  %v1965_v24 = vand.u32 2147483647, %v7295_v58 }
 0x209   : > { %v1031_v2 = vpop.f32.mrf.mxu2  ;;  %5515 = vpow2.f32 %v1634_v62  ;;  %v7437_v59 = vand.u32 4294901760, %v2221_v42  ;;  %v1528_v55 = vadd.f32 %v7150_v29, %v1381_v10  ;;  %v1982_v43 = vand.u32 2147483648, %v7344_v13 }
 0x20a   : > { %v1032_v28 = vadd.f32 %v1031_v2, %v6429_v8  ;;  %2625 = vmatmul.f32.gmra.mxu3 %v7292_v21  ;;  %2981 = vmatmul.f32.gmra.mxu1 %v2395_v38  ;;  %v1950_v8 = vand.u32 2147483647, %v7253_v26  ;;  %v7401_v38 = vpop.eup %5509  ;;  %v1949_v26 = vsel %vm7410_vm2, %v7303_v20, %v1945_v9  ;;  %v1581_v53 = vsub.f32 0.0, %v1524_v30 }
 0x20b   : > { %v7392_v7 = vpop.f32.mrf.mxu0  ;;  %v5512_v51 = vpop.eup %5511  ;;  %v2411_v20 = vand.u32 4294901760, %v7404_v6  ;;  %v1967_v30 = vand.u32 2147483648, %v7295_v58  ;;  %v7462_v58 = vsub.f32 %v2221_v42, %v7437_v59  ;;  %vm1966_vm7 = vcmp.eq.f32.partialorder %v1965_v24, 8.507059e+37 }
 0x20c   : > { %v7397_v16 = vadd.f32 %v1239_v11, %v1032_v28  ;;  %v1959_v11 = vmul.f32 %v7342_v3, %v1958_v4  ;;  %vm1951_vm3 = vcmp.eq.f32.partialorder %v1950_v8, 8.507059e+37  ;;  %v7433_v4 = vadd.f32 1.0, %v5512_v51  ;;  %v7444_v8 = vpop.eup %5513 }
 0x20d   : > { %v1245_v41 = vpop.f32.mrf.mxu3  ;;  %v1954_v2 = vsel %vm1951_vm3, %v1953_v52, %v1949_v26  ;;  %v1636_v12 = vmul.f32 1.442695, %v1581_v53  ;;  %v1968_v29 = vor.u32 1.1754944e-38, %v1967_v30  ;;  %vm1977_vm8 = vweird.f32 %v7401_v38 }
 0x20e   : > { %2398 = vmatmul.f32.gmra.mxu2 %v2397_v0  ;;  %2788 = vmatmul.f32.gmra.mxu0 %v7309_v35  ;;  %v1972_v35 = vmul.f32 %v7401_v38, %v7344_v13  ;;  %v1960_v9 = vadd.f32 %v7342_v3, %v1959_v11  ;;  %5517 = vrcp.f32 %v7433_v4  ;;  %vm7499_vm10 = vmor %vm1976_vm9, %vm1977_vm8  ;;  %vm1992_vm12 = vweird.f32 %v7444_v8 }
 0x20f   : > { %v7420_v19 = vpop.f32.mrf.mxu1  ;;  %v5516_v11 = vpop.eup %5515  ;;  %5519 = vpow2.f32 %v1636_v12  ;;  %vm1991_vm13 = vweird.f32 %v7390_v1  ;;  %vm2006_vm3 = vweird.f32 %v7433_v4 }
 0x210   : > { %v1964_v26 = vsel %vm7448_vm6, %v7342_v3, %v1960_v9  ;;  %v2419_v9 = vand.u32 4294901760, %v7462_v58  ;;  %vm7543_vm14 = vmor %vm1991_vm13, %vm1992_vm12 }
 0x211   : > { %v1036_v0 = vpop.f32.mrf.mxu2  ;;  %v1969_v3 = vsel %vm1966_vm7, %v1968_v29, %v1964_v26 }
 0x212   : > { %v1037_v28 = vadd.f32 %v1036_v0, %v6442_v14  ;;  %2629 = vmatmul.f32.gmra.mxu3 %v7326_v36  ;;  %2987 = vmatmul.f32.gmra.mxu1 %v2403_v17  ;;  %v2224_v14 = vsel %vm337_vm1, %v1954_v2, 0  ;;  %v1973_v17 = vsub.f32 1.0, %v1972_v35  ;;  %v7469_v35 = vadd.f32 1.0, %v5516_v11 }
 0x213   : > { %v7435_v56 = vpop.f32.mrf.mxu0  ;;  %v7464_v51 = vand.u32 4294901760, %v2224_v14  ;;  %v1582_v0 = vsub.f32 0.0, %v1528_v55  ;;  %v1385_v2 = vadd.f32 %v7218_v18, %v7268_v31  ;;  %v2227_v12 = vsel %vm337_vm1, %v1969_v3, 0 }
 0x214   : > { %v7441_v5 = vadd.f32 %v1245_v41, %v1037_v28  ;;  %v2412_v41 = vsub.f32 %v7404_v6, %v2411_v20  ;;  %v7486_v31 = vpop.eup %5517  ;;  %5521 = vrcp.f32 %v7469_v35  ;;  %v7495_v26 = vand.u32 4294901760, %v2227_v12 }
 0x215   : > { %v1251_v62 = vpop.f32.mrf.mxu3  ;;  %v7479_v24 = vsub.f32 %v2224_v14, %v7464_v51  ;;  %v5520_v55 = vpop.eup %5519  ;;  %v1638_v14 = vmul.f32 1.442695, %v1582_v0  ;;  %v2002_v3 = vmul.f32 %v7486_v31, %v7433_v4  ;;  %vm2007_vm2 = vweird.f32 %v7486_v31 }
 0x216   : > { %2406 = vmatmul.f32.gmra.mxu2 %v2405_v15  ;;  %2793 = vmatmul.f32.gmra.mxu0 %v7349_v23  ;;  %v1974_v23 = vmul.f32 %v7401_v38, %v1973_v17  ;;  %v1987_v15 = vmul.f32 %v7444_v8, %v7390_v1  ;;  %v2413_v28 = vand.u32 4294901760, %v2412_v41  ;;  %v1980_v17 = vand.u32 2147483647, %v7344_v13  ;;  %9500 = vst [vmem:[#allocation9_spill] sm:$0xff] %v7495_v26  ;;  %vm7581_vm4 = vmor %vm2006_vm3, %vm2007_vm2 }
 0x217   : > { %v7459_v52 = vpop.f32.mrf.mxu1  ;;  %v1532_v41 = vadd.f32 %v7193_v40, %v1385_v2  ;;  %v2427_v29 = vand.u32 4294901760, %v7479_v24  ;;  %5523 = vpow2.f32 %v1638_v14  ;;  %v1389_v2 = vadd.f32 %v7261_v47, %v7311_v49 }
 0x218   : > { %v1975_v18 = vadd.f32 %v7401_v38, %v1974_v23  ;;  %v7508_v23 = vadd.f32 1.0, %v5520_v55  ;;  %vm1981_vm11 = vcmp.eq.f32.partialorder %v1980_v17, 8.507059e+37  ;;  %v1995_v49 = vand.u32 2147483647, %v7390_v1 }
 0x219   : > { %v1041_v53 = vpop.f32.mrf.mxu2  ;;  %v1583_v0 = vsub.f32 0.0, %v1532_v41  ;;  %v2428_v55 = vsub.f32 %v7479_v24, %v2427_v29  ;;  %v7539_v41 = vld [vmem:[%s9200_s4] ss:$0 sm:$0xff]  ;;  %vm2021_vm7 = vweird.f32 %v7469_v35 }
 0x21a   : > { %v1042_v42 = vadd.f32 %v1041_v53, %v6454_v54  ;;  %2633 = vmatmul.f32.gmra.mxu3 %v7381_v34  ;;  %2993 = vmatmul.f32.gmra.mxu1 %v2411_v20  ;;  %v1988_v54 = vsub.f32 1.0, %v1987_v15  ;;  %v1979_v40 = vsel %vm7499_vm10, %v7401_v38, %v1975_v18  ;;  %v1983_v53 = vor.u32 1.1754944e-38, %v1982_v43  ;;  %v7523_v17 = vpop.eup %5521 }
 0x21b   : > { %v7475_v10 = vpop.f32.mrf.mxu0  ;;  %v7521_v18 = vsub.f32 %v2227_v12, %v7495_v26  ;;  %v2003_v12 = vsub.f32 1.0, %v2002_v3  ;;  %5525 = vrcp.f32 %v7508_v23  ;;  %v1640_v14 = vmul.f32 1.442695, %v1583_v0 }
 0x21c   : > { %v7482_v30 = vadd.f32 %v1251_v62, %v1042_v42  ;;  %v2420_v62 = vsub.f32 %v7462_v58, %v2419_v9  ;;  %vm1996_vm15 = vcmp.eq.f32.partialorder %v1995_v49, 8.507059e+37  ;;  %vm2022_vm6 = vweird.f32 %v7523_v17 }
 0x21d   : > { %v1257_v20 = vpop.f32.mrf.mxu3  ;;  %v2435_v11 = vand.u32 4294901760, %v7521_v18  ;;  %v2004_v0 = vmul.f32 %v7486_v31, %v2003_v12  ;;  %5527 = vpow2.f32 %v1640_v14  ;;  %v1393_v12 = vadd.f32 %v7305_v48, %v7351_v61  ;;  %vm7625_vm8 = vmor %vm2021_vm7, %vm2022_vm6 }
 0x21e   : > { %2414 = vmatmul.f32.gmra.mxu2 %v2413_v28  ;;  %2798 = vmatmul.f32.gmra.mxu0 %v7404_v6  ;;  %v1989_v6 = vmul.f32 %v7444_v8, %v1988_v54  ;;  %v2421_v28 = vand.u32 4294901760, %v2420_v62  ;;  %v1984_v54 = vsel %vm1981_vm11, %v1983_v53, %v1979_v40  ;;  %v2017_v40 = vmul.f32 %v7523_v17, %v7469_v35 }
 0x21f   : > { %v7510_v13 = vpop.f32.mrf.mxu1  ;;  %v2230_v62 = vsel %vm337_vm1, %v1984_v54, 0  ;;  %vm2036_vm10 = vweird.f32 %v7508_v23 }
 0x220   : > { %v1990_v47 = vadd.f32 %v7444_v8, %v1989_v6  ;;  %v7552_v53 = vand.u32 4294901760, %v2230_v62 }
 0x221   : > { %v1046_v15 = vpop.f32.mrf.mxu2 }
 0x222   : > { %v1047_v42 = vadd.f32 %v1046_v15, %v6468_v37  ;;  %2637 = vmatmul.f32.gmra.mxu3 %v7437_v59  ;;  %2999 = vmatmul.f32.gmra.mxu1 %v2419_v9  ;;  %v1997_v9 = vand.u32 2147483648, %v7390_v1  ;;  %v2429_v15 = vand.u32 4294901760, %v2428_v55  ;;  %v2436_v55 = vsub.f32 %v7521_v18, %v2435_v11 }
 0x223   : > { %v7518_v38 = vpop.f32.mrf.mxu0  ;;  %v2018_v1 = vsub.f32 1.0, %v2017_v40 }
 0x224   : > { %v7525_v43 = vadd.f32 %v1257_v20, %v1047_v42  ;;  %v1536_v20 = vadd.f32 %v7245_v60, %v1389_v2  ;;  %v5524_v60 = vpop.eup %5523  ;;  %v1998_v3 = vor.u32 1.1754944e-38, %v1997_v9 }
 0x225   : > { %v2574_v37 = vpop.f32.mrf.mxu3  ;;  %v7562_v9 = vpop.eup %5525  ;;  %v2019_v48 = vmul.f32 %v7523_v17, %v2018_v1  ;;  %v2027_v1 = vand.u32 2147483648, %v7469_v35 }
 0x226   : > { %2422 = vmatmul.f32.gmra.mxu2 %v2421_v28  ;;  %2803 = vmatmul.f32.gmra.mxu0 %v7462_v58  ;;  %v1994_v58 = vsel %vm7543_vm14, %v7444_v8, %v1990_v47  ;;  %v1584_v2 = vsub.f32 0.0, %v1536_v20  ;;  %v7557_v28 = vadd.f32 1.0, %v5524_v60  ;;  %v2010_v20 = vand.u32 2147483647, %v7433_v4 }
 0x227   : > { %v7559_v54 = vpop.f32.mrf.mxu1  ;;  %v1999_v47 = vsel %vm1996_vm15, %v1998_v3, %v1994_v58  ;;  %v7569_v60 = vsub.f32 %v2230_v62, %v7552_v53  ;;  %v2032_v61 = vmul.f32 %v7562_v9, %v7508_v23  ;;  %v1540_v62 = vadd.f32 %v7286_v25, %v1393_v12 }
 0x228   : > { %v1642_v58 = vmul.f32 1.442695, %v1584_v2  ;;  %v2233_v40 = vsel %vm337_vm1, %v1999_v47, 0  ;;  %5529 = vrcp.f32 %v7557_v28  ;;  %v2437_v3 = vand.u32 4294901760, %v2436_v55 }
 0x229   : > { %v2295_v6 = vpop.f32.mrf.mxu2  ;;  %vm7585_vm5 = vcmp.eq.f32.partialorder %v2010_v20, 8.507059e+37  ;;  %vm2051_vm14 = vweird.f32 %v7557_v28 }
 0x22a   : > { %v2296_v42 = vadd.f32 %v7539_v41, %v2295_v6  ;;  %2641 = vmatmul.f32.gmra.mxu3 %v7464_v51  ;;  %3005 = vmatmul.f32.gmra.mxu1 %v2427_v29  ;;  %v2012_v29 = vand.u32 2147483648, %v7433_v4  ;;  %v2005_v6 = vadd.f32 %v7486_v31, %v2004_v0  ;;  %v2443_v4 = vand.u32 4294901760, %v7569_v60 }
 0x22b   : > { %v2729_v8 = vpop.f32.mrf.mxu0  ;;  %5531 = vpow2.f32 %v1642_v58  ;;  %v2033_v0 = vsub.f32 1.0, %v2032_v61 }
 0x22c   : > { %v2575_v14 = vadd.f32 %v2574_v37, %v2296_v42  ;;  %v5528_v37 = vpop.eup %5527  ;;  %v7590_v42 = vand.u32 4294901760, %v2233_v40  ;;  %v2009_v47 = vsel %vm7581_vm4, %v7486_v31, %v2005_v6 }
 0x22d   : > { %v2578_v49 = vpop.f32.mrf.mxu3  ;;  %v7600_v12 = vadd.f32 1.0, %v5528_v37 }
 0x22e   : > { %2430 = vmatmul.f32.gmra.mxu2 %v2429_v15  ;;  %2808 = vmatmul.f32.gmra.mxu0 %v7479_v24  ;;  %v2013_v15 = vor.u32 1.1754944e-38, %v2012_v29  ;;  %v2725_v25 = vadd.f32 %v7518_v38, %v2575_v14  ;;  %v2020_v29 = vadd.f32 %v7523_v17, %v2019_v48  ;;  %v1585_v38 = vsub.f32 0.0, %v1540_v62  ;;  %v7612_v58 = vpop.eup %5529 }
 0x22f   : > { %v1397_v14 = vadd.f32 %v7346_v63, %v7397_v16  ;;  %v7614_v37 = vpop.f32.mrf.mxu1  ;;  %v7618_v48 = vsub.f32 %v2233_v40, %v7590_v42  ;;  %v2028_v16 = vor.u32 1.1754944e-38, %v2027_v1  ;;  %5533 = vrcp.f32 %v7600_v12 }
 0x230   : > { %v7606_v31 = vadd.f32 %v7510_v13, %v2725_v25  ;;  %v2025_v13 = vand.u32 2147483647, %v7469_v35  ;;  %v2024_v61 = vsel %vm7625_vm8, %v7523_v17, %v2020_v29  ;;  %v4000_v35 = vld [vmem:[%s9201_s5 + $0x8] sm:$0x3]  ;;  %vm2052_vm13 = vweird.f32 %v7612_v58 }
 0x231   : > { %v2303_v2 = vpop.f32.mrf.mxu2  ;;  %v5532_v62 = vpop.eup %5531  ;;  %v1544_v24 = vadd.f32 %v7324_v46, %v1397_v14  ;;  %vm7721_vm15 = vmor %vm2051_vm14, %vm2052_vm13  ;;  %vm2066_vm4 = vweird.f32 %v7600_v12 }
 0x232   : > { %v2304_v55 = vadd.f32 %v7539_v41, %v2303_v2  ;;  %2645 = vmatmul.f32.gmra.mxu3 %v7495_v26  ;;  %3011 = vmatmul.f32.gmra.mxu1 %v2435_v11  ;;  %v2014_v11 = vsel %vm7585_vm5, %v2013_v15, %v2009_v47  ;;  %v2444_v26 = vsub.f32 %v7569_v60, %v2443_v4  ;;  %vm2026_vm9 = vcmp.eq.f32.partialorder %v2025_v13, 8.507059e+37 }
 0x233   : > { %v7602_v20 = vpop.f32.mrf.mxu0  ;;  %v2236_v40 = vsel %vm337_vm1, %v2014_v11, 0  ;;  %v2047_v15 = vmul.f32 %v7612_v58, %v7557_v28  ;;  %v2029_v46 = vsel %vm2026_vm9, %v2028_v16, %v2024_v61  ;;  %v2042_v61 = vand.u32 2147483648, %v7508_v23 }
 0x234   : > { %v2579_v6 = vadd.f32 %v2578_v49, %v2304_v55  ;;  %v2445_v25 = vand.u32 4294901760, %v2444_v26  ;;  %v2451_v55 = vand.u32 4294901760, %v7618_v48  ;;  %v7647_v29 = vand.u32 4294901760, %v2236_v40 }
 0x235   : > { %v2582_v2 = vpop.f32.mrf.mxu3  ;;  %v2048_v11 = vsub.f32 1.0, %v2047_v15  ;;  %v7661_v13 = vpop.eup %5533 }
 0x236   : > { %2438 = vmatmul.f32.gmra.mxu2 %v2437_v3  ;;  %2813 = vmatmul.f32.gmra.mxu0 %v7521_v18  ;;  %v2730_v49 = vadd.f32 %v2729_v8, %v2579_v6  ;;  %v2034_v18 = vmul.f32 %v7562_v9, %v2033_v0  ;;  %v1644_v3 = vmul.f32 1.442695, %v1585_v38  ;;  %v4098_v8 = vsel %vm434_vm0, %v4000_v35, 0 }
 0x237   : > { %v7643_v17 = vand.u32 4294901760, %v4098_v8  ;;  %v7652_v38 = vadd.f32 1.0, %v5532_v62  ;;  %vm2037_vm0 = vweird.f32 %v7562_v9  ;;  %v7672_v35 = vsub.f32 %v2236_v40, %v7647_v29  ;;  %v2922_v62 = vpop.f32.mrf.mxu1 }
 0x238   : > { %v7650_v0 = vadd.f32 %v7559_v54, %v2730_v49  ;;  %v2035_v14 = vadd.f32 %v7562_v9, %v2034_v18  ;;  %5535 = vpow2.f32 %v1644_v3  ;;  %v1401_v54 = vadd.f32 %v7392_v7, %v7441_v5  ;;  %vm7676_vm11 = vmor %vm2036_vm10, %vm2037_vm0 }
 0x239   : > { %v2311_v47 = vpop.f32.mrf.mxu2  ;;  %4115 = vmatpush.msrb.mxu0 %v7643_v17  ;;  %v7656_v26 = vsub.f32 %v4098_v8, %v7643_v17  ;;  %4726 = vmatpush.msra.mxu3 %v7643_v17  ;;  %v2040_v5 = vand.u32 2147483647, %v7508_v23  ;;  %5537 = vrcp.f32 %v7652_v38  ;;  %v2049_v8 = vmul.f32 %v7612_v58, %v2048_v11 }
 0x23a   : > { %v2312_v1 = vadd.f32 %v7539_v41, %v2311_v47  ;;  %2649 = vmatmul.f32.gmra.mxu3 %v7552_v53  ;;  %3017 = vmatmul.f32.gmra.mxu1 %v2443_v4  ;;  %v1586_v4 = vsub.f32 0.0, %v1544_v24  ;;  %v2039_v3 = vsel %vm7676_vm11, %v7562_v9, %v2035_v14  ;;  %v2062_v23 = vmul.f32 %v7661_v13, %v7600_v12 }
 0x23b   : > { %v2739_v63 = vpop.f32.mrf.mxu0  ;;  %v4391_v49 = vand.u32 4294901760, %v7656_v26  ;;  %4546 = vmatpush.msra.mxu2 %v7656_v26  ;;  %v1548_v15 = vadd.f32 %v7364_v57, %v1401_v54  ;;  %vm2041_vm12 = vcmp.eq.f32.partialorder %v2040_v5, 8.507059e+37  ;;  %v2459_v14 = vand.u32 4294901760, %v7672_v35 }
 0x23c   : > { %v2583_v6 = vadd.f32 %v2582_v2, %v2312_v1  ;;  %v2452_v2 = vsub.f32 %v7618_v48, %v2451_v55  ;;  %v1646_v24 = vmul.f32 1.442695, %v1586_v4  ;;  %v2043_v1 = vor.u32 1.1754944e-38, %v2042_v61 }
 0x23d   : > { %v2586_v16 = vpop.f32.mrf.mxu3  ;;  %v4392_v40 = vsub.f32 %v7656_v26, %v4391_v49  ;;  %v2050_v11 = vadd.f32 %v7612_v58, %v2049_v8  ;;  %v2063_v54 = vsub.f32 1.0, %v2062_v23  ;;  %vm2067_vm3 = vweird.f32 %v7661_v13 }
 0x23e   : > { %2446 = vmatmul.f32.gmra.mxu2 %v2445_v25  ;;  %2818 = vmatmul.f32.gmra.mxu0 %v7569_v60  ;;  %v2735_v18 = vadd.f32 %v7602_v20, %v2583_v6  ;;  %v2239_v60 = vsel %vm337_vm1, %v2029_v46, 0  ;;  %v5536_v46 = vpop.eup %5535  ;;  %v2453_v9 = vand.u32 4294901760, %v2452_v2  ;;  %5539 = vpow2.f32 %v1646_v24  ;;  %vm7754_vm5 = vmor %vm2066_vm4, %vm2067_vm3 }
 0x23f   : > { %v4393_v25 = vand.u32 4294901760, %v4392_v40  ;;  %v7700_v4 = vand.u32 4294901760, %v2239_v60  ;;  %v7704_v61 = vpop.eup %5537  ;;  %v7706_v7 = vadd.f32 1.0, %v5536_v46  ;;  %v1405_v2 = vadd.f32 %v7435_v56, %v7482_v30 }
 0x240   : > { %v7694_v20 = vadd.f32 %v7614_v37, %v2735_v18  ;;  %v2044_v37 = vsel %vm2041_vm12, %v2043_v1, %v2039_v3  ;;  %v2057_v18 = vand.u32 2147483648, %v7557_v28  ;;  %v2460_v24 = vsub.f32 %v7672_v35, %v2459_v14 }
 0x241   : > { %v2319_v47 = vpop.f32.mrf.mxu2  ;;  %4394 = vmatpush.msrb.mxu1 %v4393_v25  ;;  %v7716_v8 = vsub.f32 %v2239_v60, %v7700_v4  ;;  %v2242_v23 = vsel %vm337_vm1, %v2044_v37, 0  ;;  %v2054_v30 = vsel %vm7721_vm15, %v7612_v58, %v2050_v11  ;;  %5541 = vrcp.f32 %v7706_v7 }
 0x242   : > { %v2320_v6 = vadd.f32 %v7539_v41, %v2319_v47  ;;  %2653 = vmatmul.f32.gmra.mxu3 %v7590_v42  ;;  %3023 = vmatmul.f32.gmra.mxu1 %v2451_v55  ;;  %v1587_v55 = vsub.f32 0.0, %v1548_v15  ;;  %v1552_v15 = vadd.f32 %v7420_v19, %v1405_v2  ;;  %v2928_v47 = vpop.f32.mrf.mxu1  ;;  %v2058_v1 = vor.u32 1.1754944e-38, %v2057_v18 }
 0x243   : > { %v2744_v3 = vpop.f32.mrf.mxu0  ;;  %v2461_v58 = vand.u32 4294901760, %v2460_v24  ;;  %vm2082_vm7 = vweird.f32 %v7704_v61  ;;  %vm2081_vm8 = vweird.f32 %v7652_v38  ;;  %vm2096_vm11 = vweird.f32 %v7706_v7 }
 0x244   : > { %v2587_v57 = vadd.f32 %v2586_v16, %v2320_v6  ;;  %v2055_v16 = vand.u32 2147483647, %v7557_v28  ;;  %v2064_v28 = vmul.f32 %v7661_v13, %v2063_v54  ;;  %v1648_v60 = vmul.f32 1.442695, %v1587_v55  ;;  %v5540_v46 = vpop.eup %5539  ;;  %vm7788_vm9 = vmor %vm2081_vm8, %vm2082_vm7 }
 0x245   : > { %v2590_v5 = vpop.f32.mrf.mxu3  ;;  %v7742_v54 = vadd.f32 1.0, %v5540_v46  ;;  %v1588_v55 = vsub.f32 0.0, %v1552_v15 }
 0x246   : > { %2454 = vmatmul.f32.gmra.mxu2 %v2453_v9  ;;  %2823 = vmatmul.f32.gmra.mxu0 %v7618_v48  ;;  %v2740_v40 = vadd.f32 %v2739_v63, %v2587_v57  ;;  %v2077_v48 = vmul.f32 %v7704_v61, %v7652_v38  ;;  %vm2056_vm2 = vcmp.eq.f32.partialorder %v2055_v16, 8.507059e+37  ;;  %v2467_v9 = vand.u32 4294901760, %v7716_v8 }
 0x247   : > { %v2059_v37 = vsel %vm2056_vm2, %v2058_v1, %v2054_v30  ;;  %v2065_v11 = vadd.f32 %v7661_v13, %v2064_v28  ;;  %5543 = vpow2.f32 %v1648_v60  ;;  %v7749_v16 = vpop.eup %5541  ;;  %vm2111_vm15 = vweird.f32 %v7742_v54 }
 0x248   : > { %v7731_v63 = vadd.f32 %v2922_v62, %v2740_v40  ;;  %v7738_v62 = vand.u32 4294901760, %v2242_v23  ;;  %v2078_v19 = vsub.f32 1.0, %v2077_v48  ;;  %5545 = vrcp.f32 %v7742_v54 }
 0x249   : > { %v2327_v25 = vpop.f32.mrf.mxu2  ;;  %v2069_v56 = vsel %vm7754_vm5, %v7661_v13, %v2065_v11  ;;  %v2092_v13 = vmul.f32 %v7749_v16, %v7706_v7  ;;  %vm2097_vm10 = vweird.f32 %v7749_v16 }
 0x24a   : > { %v2328_v6 = vadd.f32 %v7539_v41, %v2327_v25  ;;  %2657 = vmatmul.f32.gmra.mxu3 %v7647_v29  ;;  %3029 = vmatmul.f32.gmra.mxu1 %v2459_v14  ;;  %v1409_v14 = vadd.f32 %v7475_v10, %v7525_v43  ;;  %v7752_v40 = vsub.f32 %v2242_v23, %v7738_v62  ;;  %v2070_v10 = vand.u32 2147483647, %v7600_v12  ;;  %v2934_v25 = vpop.f32.mrf.mxu1  ;;  %vm7822_vm12 = vmor %vm2096_vm11, %vm2097_vm10 }
 0x24b   : > { %v2468_v43 = vsub.f32 %v7716_v8, %v2467_v9  ;;  %v1650_v23 = vmul.f32 1.442695, %v1588_v55  ;;  %v2749_v28 = vpop.f32.mrf.mxu0  ;;  %v2079_v60 = vmul.f32 %v7704_v61, %v2078_v19  ;;  %v2093_v19 = vsub.f32 1.0, %v2092_v13 }
 0x24c   : > { %v2591_v57 = vadd.f32 %v2590_v5, %v2328_v6  ;;  %v2072_v5 = vand.u32 2147483648, %v7600_v12  ;;  %v1556_v30 = vadd.f32 %v7459_v52, %v1409_v14  ;;  %v2475_v1 = vand.u32 4294901760, %v7752_v40 }
 0x24d   : > { %v2594_v2 = vpop.f32.mrf.mxu3  ;;  %vm2071_vm6 = vcmp.eq.f32.partialorder %v2070_v10, 8.507059e+37  ;;  %v2469_v52 = vand.u32 4294901760, %v2468_v43  ;;  %5547 = vpow2.f32 %v1650_v23  ;;  %v2080_v11 = vadd.f32 %v7704_v61, %v2079_v60 }
 0x24e   : > { %2462 = vmatmul.f32.gmra.mxu2 %v2461_v58  ;;  %2828 = vmatmul.f32.gmra.mxu0 %v7672_v35  ;;  %v2745_v18 = vadd.f32 %v2744_v3, %v2591_v57  ;;  %v2245_v35 = vsel %vm337_vm1, %v2059_v37, 0  ;;  %v2073_v15 = vor.u32 1.1754944e-38, %v2072_v5  ;;  %v1589_v37 = vsub.f32 0.0, %v1556_v30 }
 0x24f   : > { %v7774_v6 = vand.u32 4294901760, %v2245_v35  ;;  %v2087_v5 = vand.u32 2147483648, %v7652_v38  ;;  %v2084_v30 = vsel %vm7788_vm9, %v7704_v61, %v2080_v11 }
 0x250   : > { %v7764_v3 = vadd.f32 %v2928_v47, %v2745_v18  ;;  %v5544_v47 = vpop.eup %5543  ;;  %v2074_v58 = vsel %vm2071_vm6, %v2073_v15, %v2069_v56  ;;  %v1652_v56 = vmul.f32 1.442695, %v1589_v37 }
 0x251   : > { %v2335_v48 = vpop.f32.mrf.mxu2  ;;  %v7781_v14 = vpop.eup %5545  ;;  %v2482_v18 = vsub.f32 %v2245_v35, %v7774_v6  ;;  %v2248_v24 = vsel %vm337_vm1, %v2074_v58, 0  ;;  %v2088_v15 = vor.u32 1.1754944e-38, %v2087_v5  ;;  %v2100_v5 = vand.u32 2147483647, %v7706_v7 }
 0x252   : > { %v2336_v12 = vadd.f32 %v7539_v41, %v2335_v48  ;;  %2661 = vmatmul.f32.gmra.mxu3 %v7700_v4  ;;  %3035 = vmatmul.f32.gmra.mxu1 %v2467_v9  ;;  %v7778_v9 = vadd.f32 1.0, %v5544_v47  ;;  %vm2112_vm14 = vweird.f32 %v7781_v14 }
 0x253   : > { %v5548_v48 = vpop.eup %5547  ;;  %v2754_v60 = vpop.f32.mrf.mxu0  ;;  %v2483_v61 = vand.u32 4294901760, %v2482_v18  ;;  %vm2101_vm13 = vcmp.eq.f32.partialorder %v2100_v5, 8.507059e+37  ;;  %v2115_v5 = vand.u32 2147483647, %v7742_v54  ;;  %vm7850_vm2 = vmor %vm2111_vm15, %vm2112_vm14 }
 0x254   : > { %v2595_v46 = vadd.f32 %v2594_v2, %v2336_v12  ;;  %v2476_v2 = vsub.f32 %v7752_v40, %v2475_v1  ;;  %5549 = vrcp.f32 %v7778_v9  ;;  %v7804_v12 = vand.u32 4294901760, %v2248_v24 }
 0x255   : > { %v2598_v57 = vpop.f32.mrf.mxu3  ;;  %5551 = vpow2.f32 %v1652_v56  ;;  %vm2116_vm3 = vcmp.eq.f32.partialorder %v2115_v5, 8.507059e+37  ;;  %vm2126_vm5 = vweird.f32 %v7778_v9 }
 0x256   : > { %2470 = vmatmul.f32.gmra.mxu2 %v2469_v52  ;;  %2833 = vmatmul.f32.gmra.mxu0 %v7716_v8  ;;  %v2750_v55 = vadd.f32 %v2749_v28, %v2595_v46  ;;  %v2085_v8 = vand.u32 2147483647, %v7652_v38  ;;  %v2094_v28 = vmul.f32 %v7749_v16, %v2093_v19  ;;  %v2107_v38 = vmul.f32 %v7781_v14, %v7742_v54 }
 0x257   : > { %v2477_v47 = vand.u32 4294901760, %v2476_v2  ;;  %v2102_v19 = vand.u32 2147483648, %v7706_v7  ;;  %v2484_v2 = vsub.f32 %v2482_v18, %v2483_v61 }
 0x258   : > { %v7793_v43 = vadd.f32 %v2934_v25, %v2750_v55  ;;  %vm2086_vm0 = vcmp.eq.f32.partialorder %v2085_v8, 8.507059e+37  ;;  %v2940_v25 = vpop.f32.mrf.mxu1  ;;  %v2095_v58 = vadd.f32 %v7749_v16, %v2094_v28  ;;  %v2108_v37 = vsub.f32 1.0, %v2107_v38 }
 0x259   : > { %v2343_v23 = vpop.f32.mrf.mxu2  ;;  %v2089_v52 = vsel %vm2086_vm0, %v2088_v15, %v2084_v30  ;;  %v2103_v28 = vor.u32 1.1754944e-38, %v2102_v19 }
 0x25a   : > { %v2344_v35 = vadd.f32 %v7539_v41, %v2343_v23  ;;  %2665 = vmatmul.f32.gmra.mxu3 %v7738_v62  ;;  %3041 = vmatmul.f32.gmra.mxu1 %v2475_v1  ;;  %v7807_v1 = vadd.f32 1.0, %v5548_v48  ;;  %v7813_v55 = vpop.eup %5549  ;;  %v2099_v7 = vsel %vm7822_vm12, %v7749_v16, %v2095_v58  ;;  %v2109_v23 = vmul.f32 %v7781_v14, %v2108_v37 }
 0x25b   : > { %v5552_v30 = vpop.eup %5551  ;;  %v2122_v38 = vmul.f32 %v7813_v55, %v7778_v9  ;;  %vm2127_vm4 = vweird.f32 %v7813_v55 }
 0x25c   : > { %v2599_v13 = vadd.f32 %v2598_v57, %v2344_v35  ;;  %v2490_v57 = vsub.f32 %v2248_v24, %v7804_v12  ;;  %5553 = vrcp.f32 %v7807_v1  ;;  %v2110_v16 = vadd.f32 %v7781_v14, %v2109_v23  ;;  %vm2128_vm6 = vmor %vm2126_vm5, %vm2127_vm4 }
 0x25d   : > { %v2602_v46 = vpop.f32.mrf.mxu3  ;;  %vm2141_vm9 = vweird.f32 %v7807_v1 }
 0x25e   : > { %2478 = vmatmul.f32.gmra.mxu2 %v2477_v47  ;;  %2838 = vmatmul.f32.gmra.mxu0 %v7752_v40  ;;  %v2755_v11 = vadd.f32 %v2754_v60, %v2599_v13  ;;  %v2251_v40 = vsel %vm337_vm1, %v2089_v52, 0  ;;  %v2491_v35 = vand.u32 4294901760, %v2490_v57  ;;  %v2485_v60 = vand.u32 4294901760, %v2484_v2  ;;  %v2759_v13 = vpop.f32.mrf.mxu0 }
 0x25f   : > { %v7835_v15 = vand.u32 4294901760, %v2251_v40 }
 0x260   : > { %v7817_v10 = vadd.f32 %v2940_v25, %v2755_v11  ;;  %v7837_v25 = vadd.f32 1.0, %v5552_v30  ;;  %v2946_v58 = vpop.f32.mrf.mxu1  ;;  %v2492_v37 = vsub.f32 %v2490_v57, %v2491_v35  ;;  %v2123_v11 = vsub.f32 1.0, %v2122_v38 }
 0x261   : > { %v2351_v8 = vpop.f32.mrf.mxu2  ;;  %v2498_v2 = vsub.f32 %v2251_v40, %v7835_v15 }
 0x262   : > { %v2352_v24 = vadd.f32 %v7539_v41, %v2351_v8  ;;  %2669 = vmatmul.f32.gmra.mxu3 %v7774_v6  ;;  %3047 = vmatmul.f32.gmra.mxu1 %v2483_v61  ;;  %v2104_v61 = vsel %vm2101_vm13, %v2103_v28, %v2099_v7  ;;  %v7842_v19 = vpop.eup %5553  ;;  %5555 = vrcp.f32 %v7837_v25  ;;  %v2493_v40 = vand.u32 4294901760, %v2492_v37 }
 0x263   : > { %v2254_v56 = vsel %vm337_vm1, %v2104_v61, 0  ;;  %v2124_v30 = vmul.f32 %v7813_v55, %v2123_v11  ;;  %v2137_v28 = vmul.f32 %v7842_v19, %v7807_v1  ;;  %v2132_v37 = vand.u32 2147483648, %v7778_v9 }
 0x264   : > { %v2603_v48 = vadd.f32 %v2602_v46, %v2352_v24  ;;  %v2117_v46 = vand.u32 2147483648, %v7742_v54  ;;  %v2114_v54 = vsel %vm7850_vm2, %v7781_v14, %v2110_v16  ;;  %v2130_v11 = vand.u32 2147483647, %v7778_v9 }
 0x265   : > { %v2606_v47 = vpop.f32.mrf.mxu3  ;;  %v2138_v14 = vsub.f32 1.0, %v2137_v28  ;;  %v2133_v9 = vor.u32 1.1754944e-38, %v2132_v37  ;;  %vm2142_vm8 = vweird.f32 %v7842_v19  ;;  %vm2156_vm12 = vweird.f32 %v7837_v25 }
 0x266   : > { %2486 = vmatmul.f32.gmra.mxu2 %v2485_v60  ;;  %2843 = vmatmul.f32.gmra.mxu0 %v2482_v18  ;;  %v2760_v52 = vadd.f32 %v2759_v13, %v2603_v48  ;;  %v2118_v23 = vor.u32 1.1754944e-38, %v2117_v46  ;;  %v2499_v48 = vand.u32 4294901760, %v2498_v2  ;;  %v7865_v60 = vand.u32 4294901760, %v2254_v56  ;;  %vm2143_vm0 = vmor %vm2141_vm9, %vm2142_vm8 }
 0x267   : > { %vm2131_vm7 = vcmp.eq.f32.partialorder %v2130_v11, 8.507059e+37 }
 0x268   : > { %v7847_v8 = vadd.f32 %v2946_v58, %v2760_v52  ;;  %v2119_v61 = vsel %vm2116_vm3, %v2118_v23, %v2114_v54  ;;  %v7869_v16 = vpop.eup %5555  ;;  %v2500_v52 = vsub.f32 %v2498_v2, %v2499_v48  ;;  %v2506_v58 = vsub.f32 %v2254_v56, %v7865_v60 }
 0x269   : > { %v2359_v18 = vpop.f32.mrf.mxu2  ;;  %v2139_v56 = vmul.f32 %v7842_v19, %v2138_v14  ;;  %v2152_v24 = vmul.f32 %v7869_v16, %v7837_v25  ;;  %vm2157_vm11 = vweird.f32 %v7869_v16 }
 0x26a   : > { %v2360_v7 = vadd.f32 %v7539_v41, %v2359_v18  ;;  %2673 = vmatmul.f32.gmra.mxu3 %v7804_v12  ;;  %3053 = vmatmul.f32.gmra.mxu1 %v2491_v35  ;;  %v2125_v35 = vadd.f32 %v7813_v55, %v2124_v30  ;;  %v2501_v54 = vand.u32 4294901760, %v2500_v52  ;;  %v2145_v52 = vand.u32 2147483647, %v7807_v1  ;;  %vm2158_vm13 = vmor %vm2156_vm12, %vm2157_vm11 }
 0x26c   : > { %v7863_v38 = vadd.f32 %v2606_v47, %v2360_v7  ;;  %v2257_v47 = vsel %vm337_vm1, %v2119_v61, 0  ;;  %v2129_v18 = vsel %vm2128_vm6, %v7813_v55, %v2125_v35  ;;  %v2153_v55 = vsub.f32 1.0, %v2152_v24 }
 0x26d   : > { %v2610_v13 = vpop.f32.mrf.mxu3  ;;  %v7878_v5 = vand.u32 4294901760, %v2257_v47  ;;  %v2134_v30 = vsel %vm2131_vm7, %v2133_v9, %v2129_v18  ;;  %v2147_v35 = vand.u32 2147483648, %v7807_v1  ;;  %vm2146_vm10 = vcmp.eq.f32.partialorder %v2145_v52, 8.507059e+37 }
 0x26e   : > { %2494 = vmatmul.f32.gmra.mxu2 %v2493_v40  ;;  %2848 = vmatmul.f32.gmra.mxu0 %v2490_v57  ;;  %v2507_v40 = vand.u32 4294901760, %v2506_v58  ;;  %v2260_v14 = vsel %vm337_vm1, %v2134_v30, 0  ;;  %v2162_v9 = vand.u32 2147483648, %v7837_v25 }
 0x26f   : > { %v2514_v28 = vsub.f32 %v2257_v47, %v7878_v5  ;;  %v7899_v18 = vand.u32 4294901760, %v2260_v14 }
 0x270   : > { %v2508_v61 = vsub.f32 %v2506_v58, %v2507_v40  ;;  %v2163_v52 = vor.u32 1.1754944e-38, %v2162_v9 }
 0x271   : > { %v2367_v46 = vpop.f32.mrf.mxu2  ;;  %v2515_v47 = vand.u32 4294901760, %v2514_v28 }
 0x272   : > { %v2368_v57 = vadd.f32 %v7539_v41, %v2367_v46  ;;  %2677 = vmatmul.f32.gmra.mxu3 %v7835_v15  ;;  %3059 = vmatmul.f32.gmra.mxu1 %v2499_v48  ;;  %v2140_v48 = vadd.f32 %v7842_v19, %v2139_v56  ;;  %v2154_v46 = vmul.f32 %v7869_v16, %v2153_v55  ;;  %v2148_v56 = vor.u32 1.1754944e-38, %v2147_v35 }
 0x274   : > { %v7884_v7 = vadd.f32 %v2610_v13, %v2368_v57  ;;  %v2144_v37 = vsel %vm2143_vm0, %v7842_v19, %v2140_v48  ;;  %v2509_v57 = vand.u32 4294901760, %v2508_v61  ;;  %v2522_v19 = vsub.f32 %v2260_v14, %v7899_v18 }
 0x275   : > { %v2614_v23 = vpop.f32.mrf.mxu3  ;;  %v2149_v1 = vsel %vm2146_vm10, %v2148_v56, %v2144_v37  ;;  %v2160_v48 = vand.u32 2147483647, %v7837_v25 }
 0x276   : > { %2502 = vmatmul.f32.gmra.mxu2 %v2501_v54  ;;  %2853 = vmatmul.f32.gmra.mxu0 %v2498_v2  ;;  %v2516_v54 = vsub.f32 %v2514_v28, %v2515_v47  ;;  %v2263_v30 = vsel %vm337_vm1, %v2149_v1, 0 }
 0x277   : > { %v7913_v14 = vand.u32 4294901760, %v2263_v30  ;;  %vm2161_vm14 = vcmp.eq.f32.partialorder %v2160_v48, 8.507059e+37 }
 0x279   : > { %v2375_v13 = vpop.f32.mrf.mxu2 }
 0x27a   : > { %v2376_v2 = vadd.f32 %v7539_v41, %v2375_v13  ;;  %2681 = vmatmul.f32.gmra.mxu3 %v7865_v60  ;;  %3065 = vmatmul.f32.gmra.mxu1 %v2507_v40  ;;  %v2155_v40 = vadd.f32 %v7869_v16, %v2154_v46  ;;  %v2523_v13 = vand.u32 4294901760, %v2522_v19  ;;  %v2530_v46 = vsub.f32 %v2263_v30, %v7913_v14 }
 0x27c   : > { %v7897_v11 = vadd.f32 %v2614_v23, %v2376_v2  ;;  %v2159_v61 = vsel %vm2158_vm13, %v7869_v16, %v2155_v40  ;;  %v2524_v37 = vsub.f32 %v2522_v19, %v2523_v13  ;;  %v2531_v1 = vand.u32 4294901760, %v2530_v46 }
 0x27d   : > { %v2618_v24 = vpop.f32.mrf.mxu3  ;;  %v2164_v25 = vsel %vm2161_vm14, %v2163_v52, %v2159_v61 }
 0x27e   : > { %2510 = vmatmul.f32.gmra.mxu2 %v2509_v57  ;;  %2858 = vmatmul.f32.gmra.mxu0 %v2506_v58  ;;  %v2517_v58 = vand.u32 4294901760, %v2516_v54 }
 0x281   : > { %v2383_v23 = vpop.f32.mrf.mxu2 }
 0x282   : > { %v2384_v55 = vadd.f32 %v7539_v41, %v2383_v23  ;;  %2685 = vmatmul.f32.gmra.mxu3 %v7878_v5  ;;  %3071 = vmatmul.f32.gmra.mxu1 %v2515_v47  ;;  %v2266_v47 = vsel %vm337_vm1, %v2164_v25, 0 }
 0x283   : > { %v7921_v54 = vand.u32 4294901760, %v2266_v47 }
 0x284   : > { %v7911_v35 = vadd.f32 %v2618_v24, %v2384_v55  ;;  %v2525_v24 = vand.u32 4294901760, %v2524_v37 }
 0x285   : > { %v2622_v2 = vpop.f32.mrf.mxu3  ;;  %v2538_v9 = vsub.f32 %v2266_v47, %v7921_v54 }
 0x286   : > { %2518 = vmatmul.f32.gmra.mxu2 %v2517_v58  ;;  %2863 = vmatmul.f32.gmra.mxu0 %v2514_v28  ;;  %v2532_v28 = vsub.f32 %v2530_v46, %v2531_v1 }
 0x287   : > { %v2539_v58 = vand.u32 4294901760, %v2538_v9 }
 0x288   : > { %v2533_v55 = vand.u32 4294901760, %v2532_v28 }
 0x289   : > { %v2391_v57 = vpop.f32.mrf.mxu2 }
 0x28a   : > { %v2392_v56 = vadd.f32 %v7539_v41, %v2391_v57  ;;  %2689 = vmatmul.f32.gmra.mxu3 %v7899_v18  ;;  %3077 = vmatmul.f32.gmra.mxu1 %v2523_v13  ;;  %v2540_v13 = vsub.f32 %v2538_v9, %v2539_v58 }
 0x28c   : > { %v7919_v16 = vadd.f32 %v2622_v2, %v2392_v56  ;;  %v2541_v25 = vand.u32 4294901760, %v2540_v13 }
 0x28d   : > { %v2626_v40 = vpop.f32.mrf.mxu3 }
 0x28e   : > { %2526 = vmatmul.f32.gmra.mxu2 %v2525_v24  ;;  %2868 = vmatmul.f32.gmra.mxu0 %v2522_v19 }
 0x291   : > { %v2399_v23 = vpop.f32.mrf.mxu2 }
 0x292   : > { %v2400_v30 = vadd.f32 %v7539_v41, %v2399_v23  ;;  %2693 = vmatmul.f32.gmra.mxu3 %v7913_v14  ;;  %3083 = vmatmul.f32.gmra.mxu1 %v2531_v1 }
 0x294   : > { %v7926_v48 = vadd.f32 %v2626_v40, %v2400_v30 }
 0x295   : > { %v2630_v61 = vpop.f32.mrf.mxu3 }
 0x296   : > { %2534 = vmatmul.f32.gmra.mxu2 %v2533_v55  ;;  %2873 = vmatmul.f32.gmra.mxu0 %v2530_v46 }
 0x299   : > { %v2407_v52 = vpop.f32.mrf.mxu2 }
 0x29a   : > { %v2408_v19 = vadd.f32 %v7539_v41, %v2407_v52  ;;  %2697 = vmatmul.f32.gmra.mxu3 %v7921_v54  ;;  %3089 = vmatmul.f32.gmra.mxu1 %v2539_v58 }
 0x29c   : > { %v7930_v2 = vadd.f32 %v2630_v61, %v2408_v19 }
 0x29d   : > { %v2634_v37 = vpop.f32.mrf.mxu3 }
 0x29e   : > { %2542 = vmatmul.f32.gmra.mxu2 %v2541_v25  ;;  %2878 = vmatmul.f32.gmra.mxu0 %v2538_v9 }
 0x2a1   : > { %v2415_v57 = vpop.f32.mrf.mxu2 }
 0x2a2   : > { %v2416_v47 = vadd.f32 %v7539_v41, %v2415_v57  ;;  %3263 = vmatmul.f32.vlgmr.msrb.gmra.mxu3 %v6743_v33 }
 0x2a4   : > { %v7934_v56 = vadd.f32 %v2634_v37, %v2416_v47 }
 0x2a5   : > { %v2638_v46 = vpop.f32.mrf.mxu3 }
 0x2a6   : > { %3116 = vmatmul.f32.vlgmr.msrb.gmra.mxu2 %v6743_v33  ;;  %v3999_v33 = vld [vmem:[%s9201_s5] sm:$0xff] }
 0x2a7   : > { %v4116_v58 = vand.u32 4294901760, %v3999_v33 }
 0x2a9   : > { %v2423_v24 = vpop.f32.mrf.mxu2  ;;  %4117 = vmatpush.msrb.mxu0 %v4116_v58  ;;  %4728 = vmatpush.msra.mxu3 %v4116_v58  ;;  %v4396_v52 = vsub.f32 %v3999_v33, %v4116_v58  ;;  %v9527_v33 = vld [vmem:[#allocation6_spill] sm:$0xff] }
 0x2aa   : > { %v2424_v1 = vadd.f32 %v7539_v41, %v2423_v24  ;;  %3267 = vmatmul.f32.gmra.mxu3 %v6795_v27 }
 0x2ab   : > { %4939 = vmatpush.msra.mxu0 %v4391_v49  ;;  %4549 = vmatpush.msra.mxu2 %v4396_v52 }
 0x2ac   : > { %v7939_v40 = vadd.f32 %v2638_v46, %v2424_v1 }
 0x2ad   : > { %v2642_v28 = vpop.f32.mrf.mxu3 }
 0x2ae   : > { %3120 = vmatmul.f32.gmra.mxu2 %v6795_v27 }
 0x2b1   : > { %v2431_v9 = vpop.f32.mrf.mxu2 }
 0x2b2   : > { %v2432_v23 = vadd.f32 %v7539_v41, %v2431_v9  ;;  %3271 = vmatmul.f32.gmra.mxu3 %v6828_v22 }
 0x2b4   : > { %v7944_v30 = vadd.f32 %v2642_v28, %v2432_v23 }
 0x2b5   : > { %v2646_v55 = vpop.f32.mrf.mxu3 }
 0x2b6   : > { %3124 = vmatmul.f32.gmra.mxu2 %v6828_v22  ;;  %v4397_v22 = vand.u32 4294901760, %v4396_v52 }
 0x2b8   : > { %v4398_v25 = vsub.f32 %v4396_v52, %v4397_v22  ;;  %4943 = vmatpush.msra.mxu0 %v4397_v22  ;;  %v5685_v52 = vld [vmem:[%s9200_s4] ss:$0 sm:$0xff]  ;;  %v9529_v22 = vld [vmem:[#allocation5_spill] sm:$0xff] }
 0x2b9   : > { %v2439_v61 = vpop.f32.mrf.mxu2 }
 0x2ba   : > { %v2440_v13 = vadd.f32 %v7539_v41, %v2439_v61  ;;  %3275 = vmatmul.f32.gmra.mxu3 %v6867_v44  ;;  %v4399_v47 = vand.u32 4294901760, %v4398_v25  ;;  %v7986_v25 = vpop.f32.mrf.mxu0 }
 0x2bc   : > { %v7954_v27 = vadd.f32 %v2646_v55, %v2440_v13  ;;  %4400 = vmatpush.msrb.mxu1 %v4399_v47  ;;  %v7977_v13 = vpop.f32.mrf.mxu1 }
 0x2bd   : > { %v2650_v19 = vpop.f32.mrf.mxu3 }
 0x2be   : > { %9523 = vst [vmem:[#allocation12_spill] sm:$0xff] %v7954_v27  ;;  %3128 = vmatmul.f32.gmra.mxu2 %v6867_v44  ;;  %5088 = vmatpush.msra.mxu1 %v7643_v17 }
 0x2c0   : > { %5090 = vmatpush.msra.mxu1 %v4116_v58 }
 0x2c1   : > { %v2447_v37 = vpop.f32.mrf.mxu2 }
 0x2c2   : > { %v2448_v57 = vadd.f32 %v7539_v41, %v2447_v37  ;;  %3279 = vmatmul.f32.gmra.mxu3 %v6912_v32 }
 0x2c4   : > { %v7959_v46 = vadd.f32 %v2650_v19, %v2448_v57  ;;  %v7989_v37 = vpop.f32.mrf.mxu1 }
 0x2c5   : > { %v2654_v26 = vpop.f32.mrf.mxu3 }
 0x2c6   : > { %9524 = vst [vmem:[#allocation11_spill] sm:$0xff] %v7959_v46  ;;  %3132 = vmatmul.f32.gmra.mxu2 %v6912_v32 }
 0x2c9   : > { %v2455_v44 = vpop.f32.mrf.mxu2 }
 0x2ca   : > { %v2456_v49 = vadd.f32 %v7539_v41, %v2455_v44  ;;  %3283 = vmatmul.f32.gmra.mxu3 %v6935_v50 }
 0x2cc   : > { %v7965_v24 = vadd.f32 %v2654_v26, %v2456_v49  ;;  %v9531_v26 = vld [vmem:[#allocation8_spill] sm:$0xff] }
 0x2cd   : > { %v2658_v1 = vpop.f32.mrf.mxu3 }
 0x2ce   : > { %9525 = vst [vmem:[#allocation14_spill] sm:$0xff] %v7965_v24  ;;  %3136 = vmatmul.f32.gmra.mxu2 %v6935_v50 }
 0x2d1   : > { %v2463_v28 = vpop.f32.mrf.mxu2 }
 0x2d2   : > { %v2464_v9 = vadd.f32 %v7539_v41, %v2463_v28  ;;  %3287 = vmatmul.f32.gmra.mxu3 %v6994_v45 }
 0x2d4   : > { %v7970_v23 = vadd.f32 %v2658_v1, %v2464_v9  ;;  %v7995_v1 = vpop.f32.mrf.mxu0  ;;  %v7997_v9 = vpop.f32.mrf.mxu1 }
 0x2d5   : > { %v2662_v17 = vpop.f32.mrf.mxu3 }
 0x2d6   : > { %9526 = vst [vmem:[#allocation13_spill] sm:$0xff] %v7970_v23  ;;  %3140 = vmatmul.f32.gmra.mxu2 %v6994_v45 }
 0x2d9   : > { %v2471_v32 = vpop.f32.mrf.mxu2 }
 0x2da   : > { %v2472_v55 = vadd.f32 %v7539_v41, %v2471_v32  ;;  %3291 = vmatmul.f32.gmra.mxu3 %v9527_v33  ;;  %v9533_v32 = vld [vmem:[#allocation7_spill] sm:$0xff] }
 0x2dc   : > { %v7975_v58 = vadd.f32 %v2662_v17, %v2472_v55 }
 0x2dd   : > { %v2666_v61 = vpop.f32.mrf.mxu3 }
 0x2de   : > { %9528 = vst [vmem:[#allocation16_spill] sm:$0xff] %v7975_v58  ;;  %3144 = vmatmul.f32.gmra.mxu2 %v9527_v33 }
 0x2e1   : > { %v2479_v50 = vpop.f32.mrf.mxu2 }
 0x2e2   : > { %v2480_v19 = vadd.f32 %v5685_v52, %v2479_v50  ;;  %3295 = vmatmul.f32.gmra.mxu3 %v9529_v22  ;;  %v8003_v50 = vpop.f32.mrf.mxu0 }
 0x2e4   : > { %v7984_v45 = vadd.f32 %v2666_v61, %v2480_v19 }
 0x2e5   : > { %v2670_v41 = vpop.f32.mrf.mxu3 }
 0x2e6   : > { %9530 = vst [vmem:[#allocation15_spill] sm:$0xff] %v7984_v45  ;;  %3148 = vmatmul.f32.gmra.mxu2 %v9529_v22  ;;  %v9535_v22 = vld [vmem:[#allocation10_spill] sm:$0xff] }
 0x2e9   : > { %v2487_v57 = vpop.f32.mrf.mxu2 }
 0x2ea   : > { %v2488_v47 = vadd.f32 %v5685_v52, %v2487_v57  ;;  %3299 = vmatmul.f32.gmra.mxu3 %v9531_v26 }
 0x2ec   : > { %v7992_v44 = vadd.f32 %v2670_v41, %v2488_v47  ;;  %v8006_v41 = vpop.f32.mrf.mxu1 }
 0x2ed   : > { %v2674_v49 = vpop.f32.mrf.mxu3 }
 0x2ee   : > { %9532 = vst [vmem:[#allocation18_spill] sm:$0xff] %v7992_v44  ;;  %3152 = vmatmul.f32.gmra.mxu2 %v9531_v26 }
 0x2f1   : > { %v2495_v28 = vpop.f32.mrf.mxu2 }
 0x2f2   : > { %v2496_v17 = vadd.f32 %v5685_v52, %v2495_v28  ;;  %3303 = vmatmul.f32.gmra.mxu3 %v9533_v32 }
 0x2f4   : > { %v8000_v55 = vadd.f32 %v2674_v49, %v2496_v17  ;;  %v8012_v49 = vpop.f32.mrf.mxu0 }
 0x2f5   : > { %v2678_v33 = vpop.f32.mrf.mxu3 }
 0x2f6   : > { %9534 = vst [vmem:[#allocation17_spill] sm:$0xff] %v8000_v55  ;;  %3156 = vmatmul.f32.gmra.mxu2 %v9533_v32  ;;  %v8016_v55 = vpop.f32.mrf.mxu1 }
 0x2f9   : > { %v2503_v61 = vpop.f32.mrf.mxu2 }
 0x2fa   : > { %v2504_v19 = vadd.f32 %v5685_v52, %v2503_v61  ;;  %3307 = vmatmul.f32.gmra.mxu3 %v9535_v22 }
 0x2fc   : > { %v8008_v57 = vadd.f32 %v2678_v33, %v2504_v19 }
 0x2fd   : > { %v2682_v47 = vpop.f32.mrf.mxu3 }
 0x2fe   : > { %9536 = vst [vmem:[#allocation35_spill] sm:$0xff] %v8008_v57  ;;  %3160 = vmatmul.f32.gmra.mxu2 %v9535_v22  ;;  %v8022_v22 = vpop.f32.mrf.mxu0 }
 0x301   : > { %v2511_v26 = vpop.f32.mrf.mxu2 }
 0x302   : > { %v2512_v28 = vadd.f32 %v5685_v52, %v2511_v26  ;;  %3311 = vmatmul.f32.gmra.mxu3 %v7264_v39  ;;  %v8025_v26 = vpop.f32.mrf.mxu1 }
 0x304   : > { %v8014_v17 = vadd.f32 %v2682_v47, %v2512_v28 }
 0x305   : > { %v2686_v32 = vpop.f32.mrf.mxu3 }
 0x306   : > { %9537 = vst [vmem:[#allocation20_spill] sm:$0xff] %v8014_v17  ;;  %3164 = vmatmul.f32.gmra.mxu2 %v7264_v39 }
 0x309   : > { %v2519_v61 = vpop.f32.mrf.mxu2 }
 0x30a   : > { %v2520_v44 = vadd.f32 %v5685_v52, %v2519_v61  ;;  %3315 = vmatmul.f32.gmra.mxu3 %v7292_v21  ;;  %v8031_v61 = vpop.f32.mrf.mxu0 }
 0x30c   : > { %v8020_v33 = vadd.f32 %v2686_v32, %v2520_v44  ;;  %v8033_v32 = vpop.f32.mrf.mxu1 }
 0x30d   : > { %v2690_v19 = vpop.f32.mrf.mxu3 }
 0x30e   : > { %9538 = vst [vmem:[#allocation19_spill] sm:$0xff] %v8020_v33  ;;  %3168 = vmatmul.f32.gmra.mxu2 %v7292_v21 }
 0x311   : > { %v2527_v47 = vpop.f32.mrf.mxu2 }
 0x312   : > { %v2528_v28 = vadd.f32 %v5685_v52, %v2527_v47  ;;  %3319 = vmatmul.f32.gmra.mxu3 %v7326_v36  ;;  %v8039_v45 = vpop.f32.mrf.mxu0 }
 0x314   : > { %v8028_v17 = vadd.f32 %v2690_v19, %v2528_v28 }
 0x315   : > { %v2694_v39 = vpop.f32.mrf.mxu3 }
 0x316   : > { %9539 = vst [vmem:[#allocation22_spill] sm:$0xff] %v8028_v17  ;;  %3172 = vmatmul.f32.gmra.mxu2 %v7326_v36  ;;  %v8042_v36 = vpop.f32.mrf.mxu1 }
 0x319   : > { %v2535_v44 = vpop.f32.mrf.mxu2 }
 0x31a   : > { %v2536_v33 = vadd.f32 %v5685_v52, %v2535_v44  ;;  %3323 = vmatmul.f32.gmra.mxu3 %v7381_v34 }
 0x31c   : > { %v8036_v21 = vadd.f32 %v2694_v39, %v2536_v33  ;;  %v8049_v39 = vpop.f32.mrf.mxu0 }
 0x31d   : > { %v2698_v57 = vpop.f32.mrf.mxu3 }
 0x31e   : > { %9540 = vst [vmem:[#allocation21_spill] sm:$0xff] %v8036_v21  ;;  %3176 = vmatmul.f32.gmra.mxu2 %v7381_v34  ;;  %v8051_v58 = vpop.f32.mrf.mxu1 }
 0x321   : > { %v2543_v47 = vpop.f32.mrf.mxu2 }
 0x322   : > { %v2544_v19 = vadd.f32 %v5685_v52, %v2543_v47  ;;  %3327 = vmatmul.f32.gmra.mxu3 %v7437_v59 }
 0x324   : > { %v8044_v28 = vadd.f32 %v2698_v57, %v2544_v19 }
 0x325   : > { %v3264_v17 = vpop.f32.mrf.mxu3 }
 0x326   : > { %9541 = vst [vmem:[#allocation23_spill] sm:$0xff] %v8044_v28  ;;  %3180 = vmatmul.f32.gmra.mxu2 %v7437_v59  ;;  %v9542_v59 = vld [vmem:[#allocation9_spill] sm:$0xff] }
 0x329   : > { %v3117_v44 = vpop.f32.mrf.mxu2 }
 0x32a   : > { %v3118_v33 = vadd.f32 %v3117_v44, %v7606_v31  ;;  %3331 = vmatmul.f32.gmra.mxu3 %v7464_v51  ;;  %v8056_v44 = vpop.f32.mrf.mxu0 }
 0x32c   : > { %v3265_v34 = vadd.f32 %v3264_v17, %v3118_v33  ;;  %v8059_v33 = vpop.f32.mrf.mxu1 }
 0x32d   : > { %v3268_v21 = vpop.f32.mrf.mxu3  ;;  %9543 = vst [vmem:[#allocation24_spill] sm:$0xff] %v8059_v33 }
 0x32e   : > { %v3391_v52 = vsub.f32 0.0, %v3265_v34  ;;  %3184 = vmatmul.f32.gmra.mxu2 %v7464_v51 }
 0x330   : > { %v3423_v47 = vmul.f32 1.442695, %v3391_v52 }
 0x331   : > { %v3121_v57 = vpop.f32.mrf.mxu2 }
 0x332   : > { %5557 = vpow2.f32 %v3423_v47  ;;  %v3122_v19 = vadd.f32 %v3121_v57, %v7650_v0  ;;  %3335 = vmatmul.f32.gmra.mxu3 %v9542_v59  ;;  %v8064_v57 = vpop.f32.mrf.mxu0 }
 0x333   : > { %9544 = vst [vmem:[#allocation25_spill] sm:$0xff] %v8064_v57 }
 0x334   : > { %v3269_v28 = vadd.f32 %v3268_v21, %v3122_v19 }
 0x335   : > { %v3272_v31 = vpop.f32.mrf.mxu3 }
 0x336   : > { %v3392_v23 = vsub.f32 0.0, %v3269_v28  ;;  %3188 = vmatmul.f32.gmra.mxu2 %v9542_v59 }
 0x338   : > { %v5558_v17 = vpop.eup %5557  ;;  %v3425_v34 = vmul.f32 1.442695, %v3392_v23 }
 0x339   : > { %v3487_v24 = vadd.f32 1.0, %v5558_v17  ;;  %v3125_v51 = vpop.f32.mrf.mxu2  ;;  %v8066_v17 = vpop.f32.mrf.mxu1 }
 0x33a   : > { %5559 = vpow2.f32 %v3425_v34  ;;  %v3126_v52 = vadd.f32 %v3125_v51, %v7694_v20  ;;  %3339 = vmatmul.f32.gmra.mxu3 %v7552_v53  ;;  %9545 = vst [vmem:[#allocation26_spill] sm:$0xff] %v8066_v17 }
 0x33b   : > { %5561 = vrcp.f32 %v3487_v24  ;;  %vm3524_vm2 = vweird.f32 %v3487_v24 }
 0x33c   : > { %v3273_v0 = vadd.f32 %v3272_v31, %v3126_v52 }
 0x33d   : > { %v3276_v21 = vpop.f32.mrf.mxu3 }
 0x33e   : > { %v3393_v47 = vsub.f32 0.0, %v3273_v0  ;;  %3192 = vmatmul.f32.gmra.mxu2 %v7552_v53  ;;  %v3528_v53 = vand.u32 2147483647, %v3487_v24  ;;  %v3530_v0 = vand.u32 2147483648, %v3487_v24 }
 0x340   : > { %v5560_v28 = vpop.eup %5559  ;;  %v3427_v19 = vmul.f32 1.442695, %v3393_v47  ;;  %vm3529_vm4 = vcmp.eq.f32.partialorder %v3528_v53, 8.507059e+37 }
 0x341   : > { %v5562_v59 = vpop.eup %5561  ;;  %v3488_v46 = vadd.f32 1.0, %v5560_v28  ;;  %v3129_v23 = vpop.f32.mrf.mxu2 }
 0x342   : > { %v3520_v34 = vmul.f32 %v5562_v59, %v3487_v24  ;;  %5563 = vpow2.f32 %v3427_v19  ;;  %v3130_v20 = vadd.f32 %v3129_v23, %v7731_v63  ;;  %3343 = vmatmul.f32.gmra.mxu3 %v7590_v42  ;;  %vm3525_vm15 = vweird.f32 %v5562_v59  ;;  %v8078_v24 = vpop.f32.mrf.mxu1 }
 0x343   : > { %5565 = vrcp.f32 %v3488_v46  ;;  %vm3526_vm3 = vmor %vm3524_vm2, %vm3525_vm15  ;;  %v3531_v23 = vor.u32 1.1754944e-38, %v3530_v0  ;;  %vm3539_vm6 = vweird.f32 %v3488_v46 }
 0x344   : > { %v3521_v31 = vsub.f32 1.0, %v3520_v34  ;;  %v3277_v51 = vadd.f32 %v3276_v21, %v3130_v20  ;;  %v8073_v21 = vpop.f32.mrf.mxu0 }
 0x345   : > { %v3280_v52 = vpop.f32.mrf.mxu3  ;;  %9546 = vst [vmem:[#allocation27_spill] sm:$0xff] %v8073_v21  ;;  %v3545_v21 = vand.u32 2147483648, %v3488_v46 }
 0x346   : > { %v3522_v27 = vmul.f32 %v5562_v59, %v3521_v31  ;;  %v3394_v33 = vsub.f32 0.0, %v3277_v51  ;;  %3196 = vmatmul.f32.gmra.mxu2 %v7590_v42 }
 0x348   : > { %v5564_v47 = vpop.eup %5563  ;;  %v3429_v28 = vmul.f32 1.442695, %v3394_v33  ;;  %v3523_v17 = vadd.f32 %v5562_v59, %v3522_v27 }
 0x349   : > { %v5566_v19 = vpop.eup %5565  ;;  %v8071_v57 = vadd.f32 1.0, %v5564_v47  ;;  %v3133_v63 = vpop.f32.mrf.mxu2  ;;  %v3543_v47 = vand.u32 2147483647, %v3488_v46 }
 0x34a   : > { %v3535_v34 = vmul.f32 %v5566_v19, %v3488_v46  ;;  %5567 = vpow2.f32 %v3429_v28  ;;  %v3134_v20 = vadd.f32 %v3133_v63, %v7764_v3  ;;  %3347 = vmatmul.f32.gmra.mxu3 %v7647_v29  ;;  %v3527_v42 = vsel %vm3526_vm3, %v5562_v59, %v3523_v17 }
 0x34b   : > { %5569 = vrcp.f32 %v8071_v57  ;;  %v3532_v27 = vsel %vm3529_vm4, %v3531_v23, %v3527_v42  ;;  %vm3540_vm5 = vweird.f32 %v5566_v19  ;;  %vm3544_vm8 = vcmp.eq.f32.partialorder %v3543_v47, 8.507059e+37 }
 0x34c   : > { %v3536_v33 = vsub.f32 1.0, %v3535_v34  ;;  %v3281_v31 = vadd.f32 %v3280_v52, %v3134_v20  ;;  %v4002_v51 = vsel %vm337_vm1, %v3532_v27, 0  ;;  %vm3541_vm7 = vmor %vm3539_vm6, %vm3540_vm5  ;;  %vm3554_vm0 = vweird.f32 %v8071_v57 }
 0x34d   : > { %v3284_v53 = vpop.f32.mrf.mxu3  ;;  %v8081_v0 = vand.u32 4294901760, %v4002_v51 }
 0x34e   : > { %v3395_v28 = vsub.f32 0.0, %v3281_v31  ;;  %3200 = vmatmul.f32.gmra.mxu2 %v7647_v29  ;;  %v3537_v3 = vmul.f32 %v5566_v19, %v3536_v33  ;;  %v3546_v29 = vor.u32 1.1754944e-38, %v3545_v21 }
 0x34f   : > { %9547 = vst [vmem:[#allocation28_spill] sm:$0xff] %v8081_v0  ;;  %v8085_v59 = vsub.f32 %v4002_v51, %v8081_v0  ;;  %4402 = vmatmul.f32.vlgmr.msrb.gmra.mxu1 %v8081_v0 }
 0x350   : > { %v5568_v17 = vpop.eup %5567  ;;  %v3431_v63 = vmul.f32 1.442695, %v3395_v28  ;;  %v3538_v52 = vadd.f32 %v5566_v19, %v3537_v3  ;;  %v8098_v28 = vpop.f32.mrf.mxu0 }
 0x351   : > { %v5570_v23 = vpop.eup %5569  ;;  %v8088_v34 = vadd.f32 1.0, %v5568_v17  ;;  %v3137_v20 = vpop.f32.mrf.mxu2  ;;  %v9287_v42 = vand.u32 4294901760, %v8085_v59 }
 0x352   : > { %v3550_v27 = vmul.f32 %v5570_v23, %v8071_v57  ;;  %5571 = vpow2.f32 %v3431_v63  ;;  %v3138_v33 = vadd.f32 %v3137_v20, %v7793_v43  ;;  %3351 = vmatmul.f32.gmra.mxu3 %v7700_v4  ;;  %v3542_v31 = vsel %vm3541_vm7, %v5566_v19, %v3538_v52  ;;  %v8105_v52 = vpop.f32.mrf.mxu1 }
 0x353   : > { %5573 = vrcp.f32 %v8088_v34  ;;  %v4121_v46 = vsub.f32 %v8085_v59, %v9287_v42  ;;  %v3547_v51 = vsel %vm3544_vm8, %v3546_v29, %v3542_v31  ;;  %v3558_v43 = vand.u32 2147483647, %v8071_v57  ;;  %9549 = vst [vmem:[#allocation30_spill] sm:$0xff] %v8105_v52 }
 0x354   : > { %v3551_v3 = vsub.f32 1.0, %v3550_v27  ;;  %v3285_v47 = vadd.f32 %v3284_v53, %v3138_v33  ;;  %v4005_v21 = vsel %vm337_vm1, %v3547_v51, 0  ;;  %v3560_v19 = vand.u32 2147483648, %v8071_v57 }
 0x355   : > { %v3288_v17 = vpop.f32.mrf.mxu3  ;;  %v4122_v63 = vand.u32 4294901760, %v4121_v46  ;;  %v8101_v0 = vand.u32 4294901760, %v4005_v21  ;;  %vm3555_vm9 = vweird.f32 %v5570_v23  ;;  %vm3559_vm11 = vcmp.eq.f32.partialorder %v3558_v43, 8.507059e+37 }
 0x356   : > { %v3396_v20 = vsub.f32 0.0, %v3285_v47  ;;  %3204 = vmatmul.f32.gmra.mxu2 %v7700_v4  ;;  %v3552_v29 = vmul.f32 %v5570_v23, %v3551_v3  ;;  %vm3556_vm10 = vmor %vm3554_vm0, %vm3555_vm9  ;;  %v3561_v4 = vor.u32 1.1754944e-38, %v3560_v19  ;;  %vm3569_vm13 = vweird.f32 %v8088_v34 }
 0x357   : > { %9548 = vst [vmem:[#allocation29_spill] sm:$0xff] %v8101_v0  ;;  %4123 = vmatmul.f32.vlgmr.msrb.gmra.mxu0 %v4122_v63  ;;  %4406 = vmatmul.f32.gmra.mxu1 %v8101_v0  ;;  %v8110_v53 = vsub.f32 %v4005_v21, %v8101_v0 }
 0x358   : > { %v5572_v27 = vpop.eup %5571  ;;  %v3433_v33 = vmul.f32 1.442695, %v3396_v20  ;;  %v3553_v31 = vadd.f32 %v5570_v23, %v3552_v29 }
 0x359   : > { %v5574_v46 = vpop.eup %5573  ;;  %v8113_v51 = vadd.f32 1.0, %v5572_v27  ;;  %v3141_v42 = vpop.f32.mrf.mxu2  ;;  %v9290_v47 = vand.u32 4294901760, %v8110_v53 }
 0x35a   : > { %v3565_v3 = vmul.f32 %v5574_v46, %v8088_v34  ;;  %5575 = vpow2.f32 %v3433_v33  ;;  %v3142_v21 = vadd.f32 %v3141_v42, %v7817_v10  ;;  %3355 = vmatmul.f32.gmra.mxu3 %v7738_v62  ;;  %v3557_v63 = vsel %vm3556_vm10, %v5570_v23, %v3553_v31  ;;  %v8128_v23 = vpop.f32.mrf.mxu0 }
 0x35b   : > { %5577 = vrcp.f32 %v8113_v51  ;;  %v4129_v57 = vsub.f32 %v8110_v53, %v9290_v47  ;;  %v3562_v20 = vsel %vm3559_vm11, %v3561_v4, %v3557_v63  ;;  %v3573_v10 = vand.u32 2147483647, %v8088_v34 }
 0x35c   : > { %v3566_v29 = vsub.f32 1.0, %v3565_v3  ;;  %v3289_v27 = vadd.f32 %v3288_v17, %v3142_v21  ;;  %v4008_v43 = vsel %vm337_vm1, %v3562_v20, 0  ;;  %v3575_v42 = vand.u32 2147483648, %v8088_v34  ;;  %v8135_v3 = vpop.f32.mrf.mxu1 }
 0x35d   : > { %v3292_v19 = vpop.f32.mrf.mxu3  ;;  %v4130_v0 = vand.u32 4294901760, %v4129_v57  ;;  %v8124_v52 = vand.u32 4294901760, %v4008_v43  ;;  %vm3570_vm12 = vweird.f32 %v5574_v46  ;;  %vm3574_vm15 = vcmp.eq.f32.partialorder %v3573_v10, 8.507059e+37 }
 0x35e   : > { %v3397_v33 = vsub.f32 0.0, %v3289_v27  ;;  %3208 = vmatmul.f32.gmra.mxu2 %v7738_v62  ;;  %v3567_v31 = vmul.f32 %v5574_v46, %v3566_v29  ;;  %vm3571_vm14 = vmor %vm3569_vm13, %vm3570_vm12  ;;  %vm3584_vm3 = vweird.f32 %v8113_v51 }
 0x35f   : > { %9550 = vst [vmem:[#allocation31_spill] sm:$0xff] %v8124_v52  ;;  %4131 = vmatmul.f32.gmra.mxu0 %v4130_v0  ;;  %4410 = vmatmul.f32.gmra.mxu1 %v8124_v52  ;;  %v8133_v17 = vsub.f32 %v4008_v43, %v8124_v52  ;;  %v3576_v0 = vor.u32 1.1754944e-38, %v3575_v42  ;;  %v2765_v42 = vadd.f32 %v7986_v25, %v7863_v38 }
 0x360   : > { %v5576_v4 = vpop.eup %5575  ;;  %v3435_v21 = vmul.f32 1.442695, %v3397_v33  ;;  %v3568_v63 = vadd.f32 %v5574_v46, %v3567_v31 }
 0x361   : > { %v5578_v57 = vpop.eup %5577  ;;  %v8138_v20 = vadd.f32 1.0, %v5576_v4  ;;  %v3145_v27 = vpop.f32.mrf.mxu2  ;;  %v9293_v62 = vand.u32 4294901760, %v8133_v17 }
 0x362   : > { %v3580_v29 = vmul.f32 %v5578_v57, %v8113_v51  ;;  %5579 = vpow2.f32 %v3435_v21  ;;  %v3146_v43 = vadd.f32 %v3145_v27, %v7847_v8  ;;  %3359 = vmatmul.f32.gmra.mxu3 %v7774_v6  ;;  %v3572_v33 = vsel %vm3571_vm14, %v5574_v46, %v3568_v63  ;;  %v8160_v25 = vpop.f32.mrf.mxu0 }
 0x363   : > { %5581 = vrcp.f32 %v8138_v20  ;;  %v4137_v34 = vsub.f32 %v8133_v17, %v9293_v62  ;;  %v3577_v31 = vsel %vm3574_vm15, %v3576_v0, %v3572_v33  ;;  %v3588_v46 = vand.u32 2147483647, %v8113_v51 }
 0x364   : > { %v3581_v4 = vsub.f32 1.0, %v3580_v29  ;;  %v3293_v47 = vadd.f32 %v3292_v19, %v3146_v43  ;;  %v4011_v10 = vsel %vm337_vm1, %v3577_v31, 0  ;;  %v3590_v63 = vand.u32 2147483648, %v8113_v51  ;;  %v8167_v31 = vpop.f32.mrf.mxu1 }
 0x365   : > { %v3296_v21 = vpop.f32.mrf.mxu3  ;;  %v4138_v52 = vand.u32 4294901760, %v4137_v34  ;;  %v8151_v8 = vand.u32 4294901760, %v4011_v10  ;;  %vm3585_vm2 = vweird.f32 %v5578_v57  ;;  %v2953_v29 = vadd.f32 %v7977_v13, %v2765_v42 }
 0x366   : > { %v3398_v27 = vsub.f32 0.0, %v3293_v47  ;;  %3212 = vmatmul.f32.gmra.mxu2 %v7774_v6  ;;  %v3582_v62 = vmul.f32 %v5578_v57, %v3581_v4  ;;  %vm3586_vm4 = vmor %vm3584_vm3, %vm3585_vm2  ;;  %vm3589_vm5 = vcmp.eq.f32.partialorder %v3588_v46, 8.507059e+37  ;;  %v3591_v34 = vor.u32 1.1754944e-38, %v3590_v63 }
 0x367   : > { %4139 = vmatmul.f32.gmra.mxu0 %v4138_v52  ;;  %4414 = vmatmul.f32.gmra.mxu1 %v8151_v8  ;;  %v8158_v19 = vsub.f32 %v4011_v10, %v8151_v8  ;;  %v2770_v63 = vadd.f32 %v7995_v1, %v7884_v7  ;;  %vm3599_vm7 = vweird.f32 %v8138_v20 }
 0x368   : > { %v5580_v38 = vpop.eup %5579  ;;  %v3437_v0 = vmul.f32 1.442695, %v3398_v27  ;;  %v3583_v43 = vadd.f32 %v5578_v57, %v3582_v62 }
 0x369   : > { %v5582_v47 = vpop.eup %5581  ;;  %v8164_v33 = vadd.f32 1.0, %v5580_v38  ;;  %v3149_v6 = vpop.f32.mrf.mxu2  ;;  %v9294_v52 = vand.u32 4294901760, %v8158_v19 }
 0x36a   : > { %v3595_v4 = vmul.f32 %v5582_v47, %v8138_v20  ;;  %5583 = vpow2.f32 %v3437_v0  ;;  %v3150_v10 = vadd.f32 %v3149_v6, %v2953_v29  ;;  %3363 = vmatmul.f32.gmra.mxu3 %v7804_v12  ;;  %v3587_v13 = vsel %vm3586_vm4, %v5578_v57, %v3583_v43 }
 0x36b   : > { %5585 = vrcp.f32 %v8164_v33  ;;  %v4145_v51 = vsub.f32 %v8158_v19, %v9294_v52  ;;  %v3592_v62 = vsel %vm3589_vm5, %v3591_v34, %v3587_v13  ;;  %v3603_v57 = vand.u32 2147483647, %v8138_v20 }
 0x36c   : > { %v3596_v42 = vsub.f32 1.0, %v3595_v4  ;;  %v3297_v27 = vadd.f32 %v3296_v21, %v3150_v10  ;;  %v4014_v46 = vsel %vm337_vm1, %v3592_v62, 0  ;;  %v3605_v43 = vand.u32 2147483648, %v8138_v20 }
 0x36d   : > { %v3300_v38 = vpop.f32.mrf.mxu3  ;;  %v4146_v0 = vand.u32 4294901760, %v4145_v51  ;;  %v8178_v29 = vand.u32 4294901760, %v4014_v46  ;;  %vm3600_vm6 = vweird.f32 %v5582_v47  ;;  %v2959_v34 = vadd.f32 %v7989_v37, %v2770_v63  ;;  %v8200_v63 = vpop.f32.mrf.mxu1 }
 0x36e   : > { %v3399_v6 = vsub.f32 0.0, %v3297_v27  ;;  %3216 = vmatmul.f32.gmra.mxu2 %v7804_v12  ;;  %v3597_v52 = vmul.f32 %v5582_v47, %v3596_v42  ;;  %vm3601_vm8 = vmor %vm3599_vm7, %vm3600_vm6  ;;  %vm3604_vm9 = vcmp.eq.f32.partialorder %v3603_v57, 8.507059e+37  ;;  %v3606_v62 = vor.u32 1.1754944e-38, %v3605_v43  ;;  %v8192_v42 = vpop.f32.mrf.mxu0 }
 0x36f   : > { %4147 = vmatmul.f32.gmra.mxu0 %v4146_v0  ;;  %4418 = vmatmul.f32.gmra.mxu1 %v8178_v29  ;;  %v8185_v21 = vsub.f32 %v4014_v46, %v8178_v29  ;;  %vm3614_vm10 = vweird.f32 %v8164_v33 }
 0x370   : > { %v5584_v7 = vpop.eup %5583  ;;  %v3439_v1 = vmul.f32 1.442695, %v3399_v6  ;;  %v3598_v4 = vadd.f32 %v5582_v47, %v3597_v52  ;;  %v2775_v6 = vadd.f32 %v8003_v50, %v7897_v11 }
 0x371   : > { %v5586_v10 = vpop.eup %5585  ;;  %v8189_v13 = vadd.f32 1.0, %v5584_v7  ;;  %v3153_v51 = vpop.f32.mrf.mxu2  ;;  %v9302_v12 = vand.u32 4294901760, %v8185_v21 }
 0x372   : > { %v3610_v27 = vmul.f32 %v5586_v10, %v8164_v33  ;;  %5587 = vpow2.f32 %v3439_v1  ;;  %v3154_v46 = vadd.f32 %v3153_v51, %v2959_v34  ;;  %3367 = vmatmul.f32.gmra.mxu3 %v7835_v15  ;;  %v3602_v37 = vsel %vm3601_vm8, %v5582_v47, %v3598_v4 }
 0x373   : > { %5589 = vrcp.f32 %v8189_v13  ;;  %v4153_v20 = vsub.f32 %v8185_v21, %v9302_v12  ;;  %v3607_v52 = vsel %vm3604_vm9, %v3606_v62, %v3602_v37  ;;  %v3618_v47 = vand.u32 2147483647, %v8164_v33 }
 0x374   : > { %v3611_v0 = vsub.f32 1.0, %v3610_v27  ;;  %v3301_v57 = vadd.f32 %v3300_v38, %v3154_v46  ;;  %v4017_v43 = vsel %vm337_vm1, %v3607_v52, 0  ;;  %v3620_v4 = vand.u32 2147483648, %v8164_v33 }
 0x375   : > { %v3304_v7 = vpop.f32.mrf.mxu3  ;;  %v4154_v1 = vand.u32 4294901760, %v4153_v20  ;;  %v8205_v34 = vand.u32 4294901760, %v4017_v43  ;;  %vm3615_vm0 = vweird.f32 %v5586_v10  ;;  %v2965_v27 = vadd.f32 %v7997_v9, %v2775_v6 }
 0x376   : > { %v3400_v51 = vsub.f32 0.0, %v3301_v57  ;;  %3220 = vmatmul.f32.gmra.mxu2 %v7835_v15  ;;  %v3612_v62 = vmul.f32 %v5586_v10, %v3611_v0  ;;  %vm3616_vm11 = vmor %vm3614_vm10, %vm3615_vm0  ;;  %vm3619_vm12 = vcmp.eq.f32.partialorder %v3618_v47, 8.507059e+37  ;;  %v3621_v0 = vor.u32 1.1754944e-38, %v3620_v4  ;;  %v8225_v6 = vpop.f32.mrf.mxu0 }
 0x377   : > { %4155 = vmatmul.f32.gmra.mxu0 %v4154_v1  ;;  %4422 = vmatmul.f32.gmra.mxu1 %v8205_v34  ;;  %v8212_v38 = vsub.f32 %v4017_v43, %v8205_v34  ;;  %v2780_v4 = vadd.f32 %v8012_v49, %v7911_v35  ;;  %vm3629_vm14 = vweird.f32 %v8189_v13 }
 0x378   : > { %v5588_v11 = vpop.eup %5587  ;;  %v3441_v50 = vmul.f32 1.442695, %v3400_v51  ;;  %v3613_v46 = vadd.f32 %v5586_v10, %v3612_v62 }
 0x379   : > { %v5590_v37 = vpop.eup %5589  ;;  %v8216_v20 = vadd.f32 1.0, %v5588_v11  ;;  %v3157_v52 = vpop.f32.mrf.mxu2  ;;  %v9295_v15 = vand.u32 4294901760, %v8212_v38 }
 0x37a   : > { %v3625_v57 = vmul.f32 %v5590_v37, %v8189_v13  ;;  %5591 = vpow2.f32 %v3441_v50  ;;  %v3158_v43 = vadd.f32 %v3157_v52, %v2965_v27  ;;  %3371 = vmatmul.f32.gmra.mxu3 %v7865_v60  ;;  %v3617_v1 = vsel %vm3616_vm11, %v5586_v10, %v3613_v46  ;;  %v8234_v52 = vpop.f32.mrf.mxu1 }
 0x37b   : > { %5593 = vrcp.f32 %v8216_v20  ;;  %v4161_v9 = vsub.f32 %v8212_v38, %v9295_v15  ;;  %v3622_v33 = vsel %vm3619_vm12, %v3621_v0, %v3617_v1  ;;  %v3633_v10 = vand.u32 2147483647, %v8189_v13 }
 0x37c   : > { %v3626_v51 = vsub.f32 1.0, %v3625_v57  ;;  %v3305_v62 = vadd.f32 %v3304_v7, %v3158_v43  ;;  %v4020_v47 = vsel %vm337_vm1, %v3622_v33, 0  ;;  %v3635_v46 = vand.u32 2147483648, %v8189_v13 }
 0x37d   : > { %v3308_v11 = vpop.f32.mrf.mxu3  ;;  %v4162_v50 = vand.u32 4294901760, %v4161_v9  ;;  %v8230_v27 = vand.u32 4294901760, %v4020_v47  ;;  %vm3630_vm13 = vweird.f32 %v5590_v37  ;;  %v2971_v43 = vadd.f32 %v8006_v41, %v2780_v4 }
 0x37e   : > { %v3401_v0 = vsub.f32 0.0, %v3305_v62  ;;  %3224 = vmatmul.f32.gmra.mxu2 %v7865_v60  ;;  %v3627_v57 = vmul.f32 %v5590_v37, %v3626_v51  ;;  %vm3631_vm15 = vmor %vm3629_vm14, %vm3630_vm13  ;;  %vm3634_vm2 = vcmp.eq.f32.partialorder %v3633_v10, 8.507059e+37  ;;  %v3636_v51 = vor.u32 1.1754944e-38, %v3635_v46 }
 0x37f   : > { %4163 = vmatmul.f32.gmra.mxu0 %v4162_v50  ;;  %4426 = vmatmul.f32.gmra.mxu1 %v8230_v27  ;;  %v8239_v35 = vsub.f32 %v4020_v47, %v8230_v27  ;;  %v2785_v10 = vadd.f32 %v8022_v22, %v7919_v16  ;;  %vm3644_vm4 = vweird.f32 %v8216_v20 }
 0x380   : > { %v5592_v49 = vpop.eup %5591  ;;  %v3443_v7 = vmul.f32 1.442695, %v3401_v0  ;;  %v3628_v1 = vadd.f32 %v5590_v37, %v3627_v57 }
 0x381   : > { %v5594_v9 = vpop.eup %5593  ;;  %v8243_v33 = vadd.f32 1.0, %v5592_v49  ;;  %v3161_v62 = vpop.f32.mrf.mxu2  ;;  %v9301_v60 = vand.u32 4294901760, %v8239_v35 }
 0x382   : > { %v3640_v50 = vmul.f32 %v5594_v9, %v8216_v20  ;;  %5595 = vpow2.f32 %v3443_v7  ;;  %v3162_v47 = vadd.f32 %v3161_v62, %v2971_v43  ;;  %3375 = vmatmul.f32.gmra.mxu3 %v7878_v5  ;;  %v3632_v0 = vsel %vm3631_vm15, %v5590_v37, %v3628_v1  ;;  %v8259_v62 = vpop.f32.mrf.mxu0 }
 0x383   : > { %5597 = vrcp.f32 %v8243_v33  ;;  %v4169_v41 = vsub.f32 %v8239_v35, %v9301_v60  ;;  %v3637_v13 = vsel %vm3634_vm2, %v3636_v51, %v3632_v0  ;;  %v3648_v37 = vand.u32 2147483647, %v8216_v20  ;;  %v9558_v60 = vld [vmem:[#allocation27_spill] sm:$0xff] }
 0x384   : > { %v3641_v4 = vsub.f32 1.0, %v3640_v50  ;;  %v3309_v57 = vadd.f32 %v3308_v11, %v3162_v47  ;;  %v4023_v49 = vsel %vm337_vm1, %v3637_v13, 0  ;;  %v3650_v1 = vand.u32 2147483648, %v8216_v20  ;;  %v8266_v11 = vpop.f32.mrf.mxu1 }
 0x385   : > { %v3312_v46 = vpop.f32.mrf.mxu3  ;;  %v4170_v7 = vand.u32 4294901760, %v4169_v41  ;;  %v8255_v43 = vand.u32 4294901760, %v4023_v49  ;;  %vm3645_vm3 = vweird.f32 %v5594_v9  ;;  %v2977_v47 = vadd.f32 %v8016_v55, %v2785_v10 }
 0x386   : > { %v3402_v15 = vsub.f32 0.0, %v3309_v57  ;;  %3228 = vmatmul.f32.gmra.mxu2 %v7878_v5  ;;  %v3642_v51 = vmul.f32 %v5594_v9, %v3641_v4  ;;  %vm3646_vm5 = vmor %vm3644_vm4, %vm3645_vm3  ;;  %vm3649_vm6 = vcmp.eq.f32.partialorder %v3648_v37, 8.507059e+37  ;;  %v3651_v57 = vor.u32 1.1754944e-38, %v3650_v1 }
 0x387   : > { %4171 = vmatmul.f32.gmra.mxu0 %v4170_v7  ;;  %4430 = vmatmul.f32.gmra.mxu1 %v8255_v43  ;;  %v8264_v16 = vsub.f32 %v4023_v49, %v8255_v43  ;;  %v2790_v37 = vadd.f32 %v8031_v61, %v7926_v48  ;;  %vm3659_vm8 = vweird.f32 %v8243_v33 }
 0x388   : > { %v5596_v22 = vpop.eup %5595  ;;  %v3445_v50 = vmul.f32 1.442695, %v3402_v15  ;;  %v3643_v0 = vadd.f32 %v5594_v9, %v3642_v51 }
 0x389   : > { %v5598_v41 = vpop.eup %5597  ;;  %v8270_v13 = vadd.f32 1.0, %v5596_v22  ;;  %v3165_v5 = vpop.f32.mrf.mxu2  ;;  %v9296_v4 = vand.u32 4294901760, %v8264_v16 }
 0x38a   : > { %v3655_v49 = vmul.f32 %v5598_v41, %v8243_v33  ;;  %5599 = vpow2.f32 %v3445_v50  ;;  %v3166_v7 = vadd.f32 %v3165_v5, %v2977_v47  ;;  %3379 = vmatmul.f32.gmra.mxu3 %v7899_v18  ;;  %v3647_v15 = vsel %vm3646_vm5, %v5594_v9, %v3643_v0  ;;  %v8291_v61 = vpop.f32.mrf.mxu0 }
 0x38b   : > { %5601 = vrcp.f32 %v8270_v13  ;;  %v4177_v55 = vsub.f32 %v8264_v16, %v9296_v4  ;;  %v3652_v20 = vsel %vm3649_vm6, %v3651_v57, %v3647_v15  ;;  %v3663_v9 = vand.u32 2147483647, %v8243_v33 }
 0x38c   : > { %v3656_v10 = vsub.f32 1.0, %v3655_v49  ;;  %v3313_v51 = vadd.f32 %v3312_v46, %v3166_v7  ;;  %v4026_v22 = vsel %vm337_vm1, %v3652_v20, 0  ;;  %v3665_v0 = vand.u32 2147483648, %v8243_v33 }
 0x38d   : > { %v3316_v1 = vpop.f32.mrf.mxu3  ;;  %v4178_v50 = vand.u32 4294901760, %v4177_v55  ;;  %v8282_v47 = vand.u32 4294901760, %v4026_v22  ;;  %vm3660_vm7 = vweird.f32 %v5598_v41  ;;  %v2983_v49 = vadd.f32 %v8025_v26, %v2790_v37 }
 0x38e   : > { %v3403_v5 = vsub.f32 0.0, %v3313_v51  ;;  %3232 = vmatmul.f32.gmra.mxu2 %v7899_v18  ;;  %v3657_v4 = vmul.f32 %v5598_v41, %v3656_v10  ;;  %vm3661_vm9 = vmor %vm3659_vm8, %vm3660_vm7  ;;  %vm3664_vm0 = vcmp.eq.f32.partialorder %v3663_v9, 8.507059e+37  ;;  %v3666_v10 = vor.u32 1.1754944e-38, %v3665_v0  ;;  %v8298_v51 = vpop.f32.mrf.mxu1 }
 0x38f   : > { %4179 = vmatmul.f32.gmra.mxu0 %v4178_v50  ;;  %4434 = vmatmul.f32.gmra.mxu1 %v8282_v47  ;;  %v8289_v46 = vsub.f32 %v4026_v22, %v8282_v47  ;;  %v2795_v0 = vadd.f32 %v8039_v45, %v7930_v2  ;;  %vm3674_vm11 = vweird.f32 %v8270_v13 }
 0x390   : > { %v5600_v48 = vpop.eup %5599  ;;  %v3447_v57 = vmul.f32 1.442695, %v3403_v5  ;;  %v3658_v7 = vadd.f32 %v5598_v41, %v3657_v4 }
 0x391   : > { %v5602_v15 = vpop.eup %5601  ;;  %v8295_v55 = vadd.f32 1.0, %v5600_v48  ;;  %v3169_v18 = vpop.f32.mrf.mxu2  ;;  %v9297_v20 = vand.u32 4294901760, %v8289_v46 }
 0x392   : > { %v3670_v22 = vmul.f32 %v5602_v15, %v8270_v13  ;;  %5603 = vpow2.f32 %v3447_v57  ;;  %v3170_v50 = vadd.f32 %v3169_v18, %v2983_v49  ;;  %3383 = vmatmul.f32.gmra.mxu3 %v7913_v14  ;;  %v3662_v26 = vsel %vm3661_vm9, %v5598_v41, %v3658_v7 }
 0x393   : > { %5605 = vrcp.f32 %v8295_v55  ;;  %v4185_v33 = vsub.f32 %v8289_v46, %v9297_v20  ;;  %v3667_v4 = vsel %vm3664_vm0, %v3666_v10, %v3662_v26  ;;  %v3678_v41 = vand.u32 2147483647, %v8270_v13 }
 0x394   : > { %v3671_v37 = vsub.f32 1.0, %v3670_v22  ;;  %v3317_v5 = vadd.f32 %v3316_v1, %v3170_v50  ;;  %v4029_v9 = vsel %vm337_vm1, %v3667_v4, 0  ;;  %v3680_v7 = vand.u32 2147483648, %v8270_v13 }
 0x395   : > { %v3320_v48 = vpop.f32.mrf.mxu3  ;;  %v4186_v57 = vand.u32 4294901760, %v4185_v33  ;;  %v8309_v49 = vand.u32 4294901760, %v4029_v9  ;;  %vm3675_vm10 = vweird.f32 %v5602_v15  ;;  %v2989_v10 = vadd.f32 %v8033_v32, %v2795_v0 }
 0x396   : > { %v3404_v18 = vsub.f32 0.0, %v3317_v5  ;;  %3236 = vmatmul.f32.gmra.mxu2 %v7913_v14  ;;  %v3672_v20 = vmul.f32 %v5602_v15, %v3671_v37  ;;  %vm3676_vm12 = vmor %vm3674_vm11, %vm3675_vm10  ;;  %vm3679_vm13 = vcmp.eq.f32.partialorder %v3678_v41, 8.507059e+37  ;;  %v3681_v4 = vor.u32 1.1754944e-38, %v3680_v7  ;;  %v8323_v37 = vpop.f32.mrf.mxu0  ;;  %v8331_v0 = vpop.f32.mrf.mxu1 }
 0x397   : > { %4187 = vmatmul.f32.gmra.mxu0 %v4186_v57  ;;  %4438 = vmatmul.f32.gmra.mxu1 %v8309_v49  ;;  %v8316_v1 = vsub.f32 %v4029_v9, %v8309_v49  ;;  %vm3689_vm15 = vweird.f32 %v8295_v55 }
 0x398   : > { %v5604_v2 = vpop.eup %5603  ;;  %v3449_v45 = vmul.f32 1.442695, %v3404_v18  ;;  %v3673_v22 = vadd.f32 %v5602_v15, %v3672_v20  ;;  %v2800_v18 = vadd.f32 %v8049_v39, %v7934_v56 }
 0x399   : > { %v5606_v50 = vpop.eup %5605  ;;  %v8320_v26 = vadd.f32 1.0, %v5604_v2  ;;  %v3173_v33 = vpop.f32.mrf.mxu2  ;;  %v9299_v14 = vand.u32 4294901760, %v8316_v1 }
 0x39a   : > { %v3685_v5 = vmul.f32 %v5606_v50, %v8295_v55  ;;  %5607 = vpow2.f32 %v3449_v45  ;;  %v3174_v9 = vadd.f32 %v3173_v33, %v2989_v10  ;;  %3387 = vmatmul.f32.gmra.mxu3 %v7921_v54  ;;  %v3677_v32 = vsel %vm3676_vm12, %v5602_v15, %v3673_v22 }
 0x39b   : > { %5609 = vrcp.f32 %v8320_v26  ;;  %v4193_v13 = vsub.f32 %v8316_v1, %v9299_v14  ;;  %v3682_v20 = vsel %vm3679_vm13, %v3681_v4, %v3677_v32  ;;  %v3693_v15 = vand.u32 2147483647, %v8295_v55 }
 0x39c   : > { %v3686_v57 = vsub.f32 1.0, %v3685_v5  ;;  %v3321_v41 = vadd.f32 %v3320_v48, %v3174_v9  ;;  %v4032_v7 = vsel %vm337_vm1, %v3682_v20, 0  ;;  %v3695_v22 = vand.u32 2147483648, %v8295_v55 }
 0x39d   : > { %v3324_v2 = vpop.f32.mrf.mxu3  ;;  %v4194_v45 = vand.u32 4294901760, %v4193_v13  ;;  %v8336_v10 = vand.u32 4294901760, %v4032_v7  ;;  %vm3690_vm14 = vweird.f32 %v5606_v50  ;;  %v2995_v5 = vadd.f32 %v8042_v36, %v2800_v18 }
 0x39e   : > { %v3405_v33 = vsub.f32 0.0, %v3321_v41  ;;  %3240 = vmatmul.f32.gmra.mxu2 %v7921_v54  ;;  %v3687_v4 = vmul.f32 %v5606_v50, %v3686_v57  ;;  %vm3691_vm2 = vmor %vm3689_vm15, %vm3690_vm14  ;;  %vm3694_vm3 = vcmp.eq.f32.partialorder %v3693_v15, 8.507059e+37  ;;  %v3696_v57 = vor.u32 1.1754944e-38, %v3695_v22 }
 0x39f   : > { %4195 = vmatmul.f32.gmra.mxu0 %v4194_v45  ;;  %4442 = vmatmul.f32.gmra.mxu1 %v8336_v10  ;;  %v8343_v48 = vsub.f32 %v4032_v7, %v8336_v10  ;;  %v9551_v45 = vand.u32 4294901760, %v8085_v59  ;;  %vm3704_vm5 = vweird.f32 %v8320_v26 }
 0x3a0   : > { %v5608_v56 = vpop.eup %5607  ;;  %v3451_v39 = vmul.f32 1.442695, %v3405_v33  ;;  %v3688_v9 = vadd.f32 %v5606_v50, %v3687_v4  ;;  %v8357_v33 = vpop.f32.mrf.mxu0 }
 0x3a1   : > { %v5610_v32 = vpop.eup %5609  ;;  %v8347_v13 = vadd.f32 1.0, %v5608_v56  ;;  %v3177_v20 = vpop.f32.mrf.mxu2  ;;  %v9298_v54 = vand.u32 4294901760, %v8343_v48  ;;  %v2805_v56 = vadd.f32 %v8056_v44, %v7939_v40 }
 0x3a2   : > { %v3700_v41 = vmul.f32 %v5610_v32, %v8320_v26  ;;  %5611 = vpow2.f32 %v3451_v39  ;;  %v3178_v7 = vadd.f32 %v3177_v20, %v2995_v5  ;;  %4732 = vmatmul.f32.vlgmr.msra.gmra.mxu3 %v9551_v45  ;;  %v3692_v36 = vsel %vm3691_vm2, %v5606_v50, %v3688_v9  ;;  %v8366_v45 = vpop.f32.mrf.mxu1 }
 0x3a3   : > { %5613 = vrcp.f32 %v8347_v13  ;;  %v4201_v55 = vsub.f32 %v8343_v48, %v9298_v54  ;;  %v3697_v18 = vsel %vm3694_vm3, %v3696_v57, %v3692_v36  ;;  %v3708_v50 = vand.u32 2147483647, %v8320_v26 }
 0x3a4   : > { %v3701_v4 = vsub.f32 1.0, %v3700_v41  ;;  %v3325_v15 = vadd.f32 %v3324_v2, %v3178_v7  ;;  %v4035_v22 = vsel %vm337_vm1, %v3697_v18, 0  ;;  %v3710_v9 = vand.u32 2147483648, %v8320_v26 }
 0x3a5   : > { %v3328_v39 = vpop.f32.mrf.mxu3  ;;  %v4202_v5 = vand.u32 4294901760, %v4201_v55  ;;  %v8362_v20 = vand.u32 4294901760, %v4035_v22  ;;  %vm3705_vm4 = vweird.f32 %v5610_v32  ;;  %v3001_v7 = vadd.f32 %v8051_v58, %v2805_v56 }
 0x3a6   : > { %v3406_v57 = vsub.f32 0.0, %v3325_v15  ;;  %4552 = vmatmul.f32.vlgmr.msra.gmra.mxu2 %v8085_v59  ;;  %v3702_v41 = vmul.f32 %v5610_v32, %v3701_v4  ;;  %vm3706_vm6 = vmor %vm3704_vm5, %vm3705_vm4  ;;  %vm3709_vm7 = vcmp.eq.f32.partialorder %v3708_v50, 8.507059e+37  ;;  %v3711_v4 = vor.u32 1.1754944e-38, %v3710_v9  ;;  %v9553_v9 = vld [vmem:[#allocation25_spill] sm:$0xff] }
 0x3a7   : > { %4203 = vmatmul.f32.gmra.mxu0 %v4202_v5  ;;  %4446 = vmatmul.f32.gmra.mxu1 %v8362_v20  ;;  %v8371_v40 = vsub.f32 %v4035_v22, %v8362_v20  ;;  %v2810_v54 = vadd.f32 %v9553_v9, %v7944_v30  ;;  %vm3719_vm9 = vweird.f32 %v8347_v13 }
 0x3a8   : > { %v5612_v44 = vpop.eup %5611  ;;  %v3453_v2 = vmul.f32 1.442695, %v3406_v57  ;;  %v3703_v36 = vadd.f32 %v5610_v32, %v3702_v41  ;;  %v9552_v57 = vand.u32 4294901760, %v8110_v53 }
 0x3a9   : > { %v5614_v55 = vpop.eup %5613  ;;  %v8375_v18 = vadd.f32 1.0, %v5612_v44  ;;  %v3181_v15 = vpop.f32.mrf.mxu2  ;;  %v9300_v59 = vand.u32 4294901760, %v8371_v40 }
 0x3aa   : > { %v3715_v5 = vmul.f32 %v5614_v55, %v8347_v13  ;;  %5615 = vpow2.f32 %v3453_v2  ;;  %v3182_v22 = vadd.f32 %v3181_v15, %v3001_v7  ;;  %4738 = vmatmul.f32.gmra.mxu3 %v9552_v57  ;;  %v3707_v58 = vsel %vm3706_vm6, %v5610_v32, %v3703_v36  ;;  %v8392_v57 = vpop.f32.mrf.mxu0 }
 0x3ab   : > { %5617 = vrcp.f32 %v8375_v18  ;;  %v4209_v26 = vsub.f32 %v8371_v40, %v9300_v59  ;;  %v3712_v56 = vsel %vm3709_vm7, %v3711_v4, %v3707_v58  ;;  %v3723_v32 = vand.u32 2147483647, %v8347_v13  ;;  %v9555_v58 = vld [vmem:[#allocation24_spill] sm:$0xff] }
 0x3ac   : > { %v3716_v41 = vsub.f32 1.0, %v3715_v5  ;;  %v3329_v44 = vadd.f32 %v3328_v39, %v3182_v22  ;;  %v4038_v50 = vsel %vm337_vm1, %v3712_v56, 0  ;;  %v3725_v36 = vand.u32 2147483648, %v8347_v13  ;;  %v8399_v5 = vpop.f32.mrf.mxu1 }
 0x3ad   : > { %v3332_v2 = vpop.f32.mrf.mxu3  ;;  %v4210_v7 = vand.u32 4294901760, %v4209_v26  ;;  %v8388_v15 = vand.u32 4294901760, %v4038_v50  ;;  %vm3720_vm8 = vweird.f32 %v5614_v55  ;;  %v3007_v26 = vadd.f32 %v9555_v58, %v2810_v54 }
 0x3ae   : > { %v3407_v14 = vsub.f32 0.0, %v3329_v44  ;;  %4557 = vmatmul.f32.gmra.mxu2 %v8110_v53  ;;  %v3717_v4 = vmul.f32 %v5614_v55, %v3716_v41  ;;  %vm3721_vm0 = vmor %vm3719_vm9, %vm3720_vm8  ;;  %vm3724_vm10 = vcmp.eq.f32.partialorder %v3723_v32, 8.507059e+37  ;;  %vm3734_vm12 = vweird.f32 %v8375_v18 }
 0x3af   : > { %9554 = vst [vmem:[#allocation32_spill] sm:$0xff] %v8388_v15  ;;  %4211 = vmatmul.f32.gmra.mxu0 %v4210_v7  ;;  %4450 = vmatmul.f32.gmra.mxu1 %v8388_v15  ;;  %v8397_v30 = vsub.f32 %v4038_v50, %v8388_v15  ;;  %v3726_v7 = vor.u32 1.1754944e-38, %v3725_v36  ;;  %v9557_v36 = vld [vmem:[#allocation12_spill] sm:$0xff] }
 0x3b0   : > { %v5616_v39 = vpop.eup %5615  ;;  %v3455_v22 = vmul.f32 1.442695, %v3407_v14  ;;  %v3718_v56 = vadd.f32 %v5614_v55, %v3717_v4  ;;  %v9556_v14 = vand.u32 4294901760, %v8133_v17  ;;  %v2815_v12 = vadd.f32 %v9558_v60, %v9557_v36 }
 0x3b1   : > { %v5618_v44 = vpop.eup %5617  ;;  %v8403_v9 = vadd.f32 1.0, %v5616_v39  ;;  %v3185_v53 = vpop.f32.mrf.mxu2  ;;  %v9303_v41 = vand.u32 4294901760, %v8397_v30 }
 0x3b2   : > { %v3730_v50 = vmul.f32 %v5618_v44, %v8375_v18  ;;  %5619 = vpow2.f32 %v3455_v22  ;;  %v3186_v59 = vadd.f32 %v3185_v53, %v3007_v26  ;;  %4744 = vmatmul.f32.gmra.mxu3 %v9556_v14  ;;  %v3722_v54 = vsel %vm3721_vm0, %v5614_v55, %v3718_v56 }
 0x3b3   : > { %5621 = vrcp.f32 %v8403_v9  ;;  %v4217_v13 = vsub.f32 %v8397_v30, %v9303_v41  ;;  %v3727_v4 = vsel %vm3724_vm10, %v3726_v7, %v3722_v54  ;;  %v3738_v55 = vand.u32 2147483647, %v8375_v18 }
 0x3b4   : > { %v3731_v39 = vsub.f32 1.0, %v3730_v50  ;;  %v3333_v58 = vadd.f32 %v3332_v2, %v3186_v59  ;;  %v4041_v32 = vsel %vm337_vm1, %v3727_v4, 0  ;;  %v3740_v56 = vand.u32 2147483648, %v8375_v18  ;;  %v8425_v2 = vpop.f32.mrf.mxu0  ;;  %v9560_v50 = vld [vmem:[#allocation26_spill] sm:$0xff] }
 0x3b5   : > { %v3336_v22 = vpop.f32.mrf.mxu3  ;;  %v4218_v26 = vand.u32 4294901760, %v4217_v13  ;;  %v8416_v53 = vand.u32 4294901760, %v4041_v32  ;;  %vm3735_vm11 = vweird.f32 %v5618_v44  ;;  %v3013_v54 = vadd.f32 %v9560_v50, %v2815_v12 }
 0x3b6   : > { %v3408_v14 = vsub.f32 0.0, %v3333_v58  ;;  %4562 = vmatmul.f32.gmra.mxu2 %v8133_v17  ;;  %v3732_v41 = vmul.f32 %v5618_v44, %v3731_v39  ;;  %vm3736_vm13 = vmor %vm3734_vm12, %vm3735_vm11  ;;  %vm3739_vm14 = vcmp.eq.f32.partialorder %v3738_v55, 8.507059e+37  ;;  %v3741_v36 = vor.u32 1.1754944e-38, %v3740_v56 }
 0x3b7   : > { %9559 = vst [vmem:[#allocation33_spill] sm:$0xff] %v8416_v53  ;;  %4219 = vmatmul.f32.gmra.mxu0 %v4218_v26  ;;  %4454 = vmatmul.f32.gmra.mxu1 %v8416_v53  ;;  %v8423_v59 = vsub.f32 %v4041_v32, %v8416_v53  ;;  %v8432_v32 = vpop.f32.mrf.mxu1  ;;  %v9561_v12 = vand.u32 4294901760, %v8158_v19  ;;  %v9562_v53 = vld [vmem:[#allocation11_spill] sm:$0xff]  ;;  %vm3749_vm2 = vweird.f32 %v8403_v9 }
 0x3b8   : > { %v5620_v60 = vpop.eup %5619  ;;  %v3457_v7 = vmul.f32 1.442695, %v3408_v14  ;;  %v3733_v13 = vadd.f32 %v5618_v44, %v3732_v41  ;;  %v2820_v15 = vadd.f32 %v8098_v28, %v9562_v53 }
 0x3b9   : > { %v5622_v4 = vpop.eup %5621  ;;  %v8429_v58 = vadd.f32 1.0, %v5620_v60  ;;  %v3189_v17 = vpop.f32.mrf.mxu2  ;;  %v9308_v39 = vand.u32 4294901760, %v8423_v59 }
 0x3ba   : > { %v3745_v26 = vmul.f32 %v5622_v4, %v8403_v9  ;;  %5623 = vpow2.f32 %v3457_v7  ;;  %v3190_v14 = vadd.f32 %v3189_v17, %v3013_v54  ;;  %4750 = vmatmul.f32.gmra.mxu3 %v9561_v12  ;;  %v3737_v41 = vsel %vm3736_vm13, %v5618_v44, %v3733_v13 }
 0x3bb   : > { %5625 = vrcp.f32 %v8429_v58  ;;  %v4225_v18 = vsub.f32 %v8423_v59, %v9308_v39  ;;  %v3742_v60 = vsel %vm3739_vm14, %v3741_v36, %v3737_v41  ;;  %v3753_v44 = vand.u32 2147483647, %v8403_v9 }
 0x3bc   : > { %v3746_v50 = vsub.f32 1.0, %v3745_v26  ;;  %v3337_v55 = vadd.f32 %v3336_v22, %v3190_v14  ;;  %v4044_v56 = vsel %vm337_vm1, %v3742_v60, 0  ;;  %v3755_v13 = vand.u32 2147483648, %v8403_v9 }
 0x3bd   : > { %v3340_v7 = vpop.f32.mrf.mxu3  ;;  %v4226_v54 = vand.u32 4294901760, %v4225_v18  ;;  %v8444_v17 = vand.u32 4294901760, %v4044_v56  ;;  %vm3750_vm15 = vweird.f32 %v5622_v4  ;;  %v3019_v36 = vadd.f32 %v8078_v24, %v2820_v15 }
 0x3be   : > { %v3409_v12 = vsub.f32 0.0, %v3337_v55  ;;  %4567 = vmatmul.f32.gmra.mxu2 %v8158_v19  ;;  %v3747_v39 = vmul.f32 %v5622_v4, %v3746_v50  ;;  %vm3751_vm3 = vmor %vm3749_vm2, %vm3750_vm15  ;;  %vm3754_vm4 = vcmp.eq.f32.partialorder %v3753_v44, 8.507059e+37  ;;  %v3756_v60 = vor.u32 1.1754944e-38, %v3755_v13  ;;  %v8458_v50 = vpop.f32.mrf.mxu0 }
 0x3bf   : > { %9563 = vst [vmem:[#allocation34_spill] sm:$0xff] %v8444_v17  ;;  %4227 = vmatmul.f32.gmra.mxu0 %v4226_v54  ;;  %4458 = vmatmul.f32.gmra.mxu1 %v8444_v17  ;;  %v8451_v22 = vsub.f32 %v4044_v56, %v8444_v17  ;;  %v9564_v24 = vand.u32 4294901760, %v8185_v21  ;;  %v8467_v54 = vpop.f32.mrf.mxu1  ;;  %vm3764_vm6 = vweird.f32 %v8429_v58 }
 0x3c0   : > { %v5624_v28 = vpop.eup %5623  ;;  %v3459_v53 = vmul.f32 1.442695, %v3409_v12  ;;  %v3748_v26 = vadd.f32 %v5622_v4, %v3747_v39 }
 0x3c1   : > { %v5626_v14 = vpop.eup %5625  ;;  %v8455_v41 = vadd.f32 1.0, %v5624_v28  ;;  %v3193_v18 = vpop.f32.mrf.mxu2  ;;  %v9311_v19 = vand.u32 4294901760, %v8451_v22  ;;  %v9565_v28 = vld [vmem:[#allocation14_spill] sm:$0xff] }
 0x3c2   : > { %v3760_v55 = vmul.f32 %v5626_v14, %v8429_v58  ;;  %5627 = vpow2.f32 %v3459_v53  ;;  %v3194_v56 = vadd.f32 %v3193_v18, %v3019_v36  ;;  %4756 = vmatmul.f32.gmra.mxu3 %v9564_v24  ;;  %v3752_v15 = vsel %vm3751_vm3, %v5622_v4, %v3748_v26 }
 0x3c3   : > { %5629 = vrcp.f32 %v8455_v41  ;;  %v4233_v9 = vsub.f32 %v8451_v22, %v9311_v19  ;;  %v3757_v39 = vsel %vm3754_vm4, %v3756_v60, %v3752_v15  ;;  %v2825_v53 = vadd.f32 %v8128_v23, %v9565_v28 }
 0x3c4   : > { %v3761_v44 = vsub.f32 1.0, %v3760_v55  ;;  %v3341_v13 = vadd.f32 %v3340_v7, %v3194_v56  ;;  %v4047_v12 = vsel %vm337_vm1, %v3757_v39, 0  ;;  %v3768_v4 = vand.u32 2147483647, %v8429_v58  ;;  %v9566_v56 = vld [vmem:[#allocation30_spill] sm:$0xff] }
 0x3c5   : > { %v3344_v36 = vpop.f32.mrf.mxu3  ;;  %v4234_v18 = vand.u32 4294901760, %v4233_v9  ;;  %v8472_v24 = vand.u32 4294901760, %v4047_v12  ;;  %v3770_v26 = vand.u32 2147483648, %v8429_v58  ;;  %vm3765_vm5 = vweird.f32 %v5626_v14 }
 0x3c6   : > { %v3410_v17 = vsub.f32 0.0, %v3341_v13  ;;  %4572 = vmatmul.f32.gmra.mxu2 %v8185_v21  ;;  %v3762_v60 = vmul.f32 %v5626_v14, %v3761_v44  ;;  %v3025_v15 = vadd.f32 %v9566_v56, %v2825_v53  ;;  %vm3766_vm7 = vmor %vm3764_vm6, %vm3765_vm5  ;;  %vm3769_vm8 = vcmp.eq.f32.partialorder %v3768_v4, 8.507059e+37 }
 0x3c7   : > { %4235 = vmatmul.f32.gmra.mxu0 %v4234_v18  ;;  %4462 = vmatmul.f32.gmra.mxu1 %v8472_v24  ;;  %v8479_v7 = vsub.f32 %v4047_v12, %v8472_v24  ;;  %v3771_v44 = vor.u32 1.1754944e-38, %v3770_v26  ;;  %v3783_v19 = vand.u32 2147483647, %v8455_v41  ;;  %vm3779_vm0 = vweird.f32 %v8455_v41 }
 0x3c8   : > { %v5628_v23 = vpop.eup %5627  ;;  %v3461_v55 = vmul.f32 1.442695, %v3410_v17  ;;  %v3763_v9 = vadd.f32 %v5626_v14, %v3762_v60  ;;  %v9567_v17 = vand.u32 4294901760, %v8212_v38 }
 0x3c9   : > { %v5630_v39 = vpop.eup %5629  ;;  %v8483_v28 = vadd.f32 1.0, %v5628_v23  ;;  %v3197_v13 = vpop.f32.mrf.mxu2  ;;  %v9312_v21 = vand.u32 4294901760, %v8479_v7  ;;  %vm3784_vm11 = vcmp.eq.f32.partialorder %v3783_v19, 8.507059e+37 }
 0x3ca   : > { %v3775_v18 = vmul.f32 %v5630_v39, %v8455_v41  ;;  %5631 = vpow2.f32 %v3461_v55  ;;  %v3198_v12 = vadd.f32 %v3197_v13, %v3025_v15  ;;  %4762 = vmatmul.f32.gmra.mxu3 %v9567_v17  ;;  %v3767_v53 = vsel %vm3766_vm7, %v5626_v14, %v3763_v9  ;;  %v8493_v23 = vpop.f32.mrf.mxu0  ;;  %v9568_v15 = vld [vmem:[#allocation13_spill] sm:$0xff] }
 0x3cb   : > { %5633 = vrcp.f32 %v8483_v28  ;;  %v4241_v58 = vsub.f32 %v8479_v7, %v9312_v21  ;;  %v3772_v60 = vsel %vm3769_vm8, %v3771_v44, %v3767_v53  ;;  %v2830_v13 = vadd.f32 %v8160_v25, %v9568_v15 }
 0x3cc   : > { %v3776_v56 = vsub.f32 1.0, %v3775_v18  ;;  %v3345_v4 = vadd.f32 %v3344_v36, %v3198_v12  ;;  %v8495_v26 = vpop.f32.mrf.mxu1  ;;  %v4050_v55 = vsel %vm337_vm1, %v3772_v60, 0  ;;  %v3785_v21 = vand.u32 2147483648, %v8455_v41 }
 0x3cd   : > { %v3348_v17 = vpop.f32.mrf.mxu3  ;;  %v4242_v14 = vand.u32 4294901760, %v4241_v58  ;;  %v8500_v9 = vand.u32 4294901760, %v4050_v55  ;;  %vm3780_vm9 = vweird.f32 %v5630_v39  ;;  %v3031_v53 = vadd.f32 %v8135_v3, %v2830_v13 }
 0x3ce   : > { %v3411_v44 = vsub.f32 0.0, %v3345_v4  ;;  %4577 = vmatmul.f32.gmra.mxu2 %v8212_v38  ;;  %v3777_v18 = vmul.f32 %v5630_v39, %v3776_v56  ;;  %vm3781_vm10 = vmor %vm3779_vm0, %vm3780_vm9  ;;  %v3786_v56 = vor.u32 1.1754944e-38, %v3785_v21  ;;  %vm3794_vm13 = vweird.f32 %v8483_v28 }
 0x3cf   : > { %9569 = vst [vmem:[#allocation6_spill] sm:$0xff] %v8500_v9  ;;  %4243 = vmatmul.f32.gmra.mxu0 %v4242_v14  ;;  %4466 = vmatmul.f32.gmra.mxu1 %v8500_v9  ;;  %v8507_v36 = vsub.f32 %v4050_v55, %v8500_v9 }
 0x3d0   : > { %v5632_v25 = vpop.eup %5631  ;;  %v3463_v12 = vmul.f32 1.442695, %v3411_v44  ;;  %v3778_v58 = vadd.f32 %v5630_v39, %v3777_v18  ;;  %v9570_v44 = vand.u32 4294901760, %v8239_v35 }
 0x3d1   : > { %v5634_v60 = vpop.eup %5633  ;;  %v8511_v15 = vadd.f32 1.0, %v5632_v25  ;;  %v3201_v4 = vpop.f32.mrf.mxu2  ;;  %v9315_v38 = vand.u32 4294901760, %v8507_v36 }
 0x3d2   : > { %v3790_v14 = vmul.f32 %v5634_v60, %v8483_v28  ;;  %5635 = vpow2.f32 %v3463_v12  ;;  %v3202_v55 = vadd.f32 %v3201_v4, %v3031_v53  ;;  %4768 = vmatmul.f32.gmra.mxu3 %v9570_v44  ;;  %v3782_v3 = vsel %vm3781_vm10, %v5630_v39, %v3778_v58  ;;  %v9571_v12 = vld [vmem:[#allocation16_spill] sm:$0xff] }
 0x3d3   : > { %5637 = vrcp.f32 %v8511_v15  ;;  %v4249_v41 = vsub.f32 %v8507_v36, %v9315_v38  ;;  %v3787_v13 = vsel %vm3784_vm11, %v3786_v56, %v3782_v3  ;;  %v2835_v53 = vadd.f32 %v8192_v42, %v9571_v12 }
 0x3d4   : > { %v3791_v18 = vsub.f32 1.0, %v3790_v14  ;;  %v3349_v25 = vadd.f32 %v3348_v17, %v3202_v55  ;;  %v8521_v9 = vpop.f32.mrf.mxu0  ;;  %v8523_v19 = vpop.f32.mrf.mxu1  ;;  %v4053_v21 = vsel %vm337_vm1, %v3787_v13, 0  ;;  %v3798_v44 = vand.u32 2147483647, %v8483_v28 }
 0x3d5   : > { %v3352_v4 = vpop.f32.mrf.mxu3  ;;  %v4250_v39 = vand.u32 4294901760, %v4249_v41  ;;  %v8528_v58 = vand.u32 4294901760, %v4053_v21  ;;  %v3800_v38 = vand.u32 2147483648, %v8483_v28  ;;  %vm3795_vm12 = vweird.f32 %v5634_v60 }
 0x3d6   : > { %v3412_v56 = vsub.f32 0.0, %v3349_v25  ;;  %4582 = vmatmul.f32.gmra.mxu2 %v8239_v35  ;;  %v3792_v17 = vmul.f32 %v5634_v60, %v3791_v18  ;;  %v3037_v3 = vadd.f32 %v8167_v31, %v2835_v53  ;;  %vm3796_vm14 = vmor %vm3794_vm13, %vm3795_vm12  ;;  %vm3799_vm15 = vcmp.eq.f32.partialorder %v3798_v44, 8.507059e+37 }
 0x3d7   : > { %9572 = vst [vmem:[#allocation5_spill] sm:$0xff] %v8528_v58  ;;  %4251 = vmatmul.f32.gmra.mxu0 %v4250_v39  ;;  %4470 = vmatmul.f32.gmra.mxu1 %v8528_v58  ;;  %v8535_v14 = vsub.f32 %v4053_v21, %v8528_v58  ;;  %v3801_v18 = vor.u32 1.1754944e-38, %v3800_v38  ;;  %vm3809_vm3 = vweird.f32 %v8511_v15 }
 0x3d8   : > { %v5636_v42 = vpop.eup %5635  ;;  %v3465_v55 = vmul.f32 1.442695, %v3412_v56  ;;  %v3793_v41 = vadd.f32 %v5634_v60, %v3792_v17  ;;  %v9573_v56 = vand.u32 4294901760, %v8264_v16 }
 0x3d9   : > { %v5638_v13 = vpop.eup %5637  ;;  %v8539_v12 = vadd.f32 1.0, %v5636_v42  ;;  %v3205_v25 = vpop.f32.mrf.mxu2  ;;  %v9318_v35 = vand.u32 4294901760, %v8535_v14 }
 0x3da   : > { %v3805_v39 = vmul.f32 %v5638_v13, %v8511_v15  ;;  %5639 = vpow2.f32 %v3465_v55  ;;  %v3206_v21 = vadd.f32 %v3205_v25, %v3037_v3  ;;  %4774 = vmatmul.f32.gmra.mxu3 %v9573_v56  ;;  %v3797_v31 = vsel %vm3796_vm14, %v5634_v60, %v3793_v41  ;;  %v9574_v55 = vld [vmem:[#allocation15_spill] sm:$0xff] }
 0x3db   : > { %5641 = vrcp.f32 %v8539_v12  ;;  %v4257_v28 = vsub.f32 %v8535_v14, %v9318_v35  ;;  %v3802_v53 = vsel %vm3799_vm15, %v3801_v18, %v3797_v31  ;;  %v2840_v3 = vadd.f32 %v8225_v6, %v9574_v55 }
 0x3dc   : > { %v3806_v17 = vsub.f32 1.0, %v3805_v39  ;;  %v3353_v42 = vadd.f32 %v3352_v4, %v3206_v21  ;;  %v8549_v58 = vpop.f32.mrf.mxu0  ;;  %v8551_v38 = vpop.f32.mrf.mxu1  ;;  %v4056_v44 = vsel %vm337_vm1, %v3802_v53, 0  ;;  %v3813_v56 = vand.u32 2147483647, %v8511_v15 }
 0x3dd   : > { %v3356_v25 = vpop.f32.mrf.mxu3  ;;  %v4258_v60 = vand.u32 4294901760, %v4257_v28  ;;  %v8556_v41 = vand.u32 4294901760, %v4056_v44  ;;  %v3815_v35 = vand.u32 2147483648, %v8511_v15  ;;  %vm3810_vm2 = vweird.f32 %v5638_v13 }
 0x3de   : > { %v3413_v18 = vsub.f32 0.0, %v3353_v42  ;;  %4587 = vmatmul.f32.gmra.mxu2 %v8264_v16  ;;  %v3807_v4 = vmul.f32 %v5638_v13, %v3806_v17  ;;  %v3043_v31 = vadd.f32 %v8200_v63, %v2840_v3  ;;  %vm3811_vm4 = vmor %vm3809_vm3, %vm3810_vm2  ;;  %vm3814_vm5 = vcmp.eq.f32.partialorder %v3813_v56, 8.507059e+37 }
 0x3df   : > { %9575 = vst [vmem:[#allocation8_spill] sm:$0xff] %v8556_v41  ;;  %4259 = vmatmul.f32.gmra.mxu0 %v4258_v60  ;;  %4474 = vmatmul.f32.gmra.mxu1 %v8556_v41  ;;  %v8563_v39 = vsub.f32 %v4056_v44, %v8556_v41  ;;  %v3816_v17 = vor.u32 1.1754944e-38, %v3815_v35  ;;  %vm3824_vm7 = vweird.f32 %v8539_v12 }
 0x3e0   : > { %v5640_v6 = vpop.eup %5639  ;;  %v3467_v21 = vmul.f32 1.442695, %v3413_v18  ;;  %v3808_v28 = vadd.f32 %v5638_v13, %v3807_v4  ;;  %v9576_v18 = vand.u32 4294901760, %v8289_v46 }
 0x3e1   : > { %v5642_v53 = vpop.eup %5641  ;;  %v8567_v55 = vadd.f32 1.0, %v5640_v6  ;;  %v3209_v42 = vpop.f32.mrf.mxu2  ;;  %v9321_v16 = vand.u32 4294901760, %v8563_v39 }
 0x3e2   : > { %v3820_v60 = vmul.f32 %v5642_v53, %v8539_v12  ;;  %5643 = vpow2.f32 %v3467_v21  ;;  %v3210_v44 = vadd.f32 %v3209_v42, %v3043_v31  ;;  %4780 = vmatmul.f32.gmra.mxu3 %v9576_v18  ;;  %v3812_v63 = vsel %vm3811_vm4, %v5638_v13, %v3808_v28  ;;  %v9577_v21 = vld [vmem:[#allocation18_spill] sm:$0xff] }
 0x3e3   : > { %5645 = vrcp.f32 %v8567_v55  ;;  %v4265_v15 = vsub.f32 %v8563_v39, %v9321_v16  ;;  %v3817_v3 = vsel %vm3814_vm5, %v3816_v17, %v3812_v63  ;;  %v2845_v31 = vadd.f32 %v8259_v62, %v9577_v21 }
 0x3e4   : > { %v3821_v4 = vsub.f32 1.0, %v3820_v60  ;;  %v3357_v6 = vadd.f32 %v3356_v25, %v3210_v44  ;;  %v8577_v41 = vpop.f32.mrf.mxu0  ;;  %v8579_v35 = vpop.f32.mrf.mxu1  ;;  %v4059_v56 = vsel %vm337_vm1, %v3817_v3, 0  ;;  %v3828_v18 = vand.u32 2147483647, %v8539_v12 }
 0x3e5   : > { %v3360_v42 = vpop.f32.mrf.mxu3  ;;  %v4266_v13 = vand.u32 4294901760, %v4265_v15  ;;  %v8584_v28 = vand.u32 4294901760, %v4059_v56  ;;  %v3830_v16 = vand.u32 2147483648, %v8539_v12  ;;  %vm3825_vm6 = vweird.f32 %v5642_v53 }
 0x3e6   : > { %v3414_v17 = vsub.f32 0.0, %v3357_v6  ;;  %4592 = vmatmul.f32.gmra.mxu2 %v8289_v46  ;;  %v3822_v25 = vmul.f32 %v5642_v53, %v3821_v4  ;;  %v3049_v63 = vadd.f32 %v8234_v52, %v2845_v31  ;;  %vm3826_vm8 = vmor %vm3824_vm7, %vm3825_vm6  ;;  %vm3829_vm9 = vcmp.eq.f32.partialorder %v3828_v18, 8.507059e+37 }
 0x3e7   : > { %9578 = vst [vmem:[#allocation7_spill] sm:$0xff] %v8584_v28  ;;  %4267 = vmatmul.f32.gmra.mxu0 %v4266_v13  ;;  %4478 = vmatmul.f32.gmra.mxu1 %v8584_v28  ;;  %v8591_v60 = vsub.f32 %v4059_v56, %v8584_v28  ;;  %v3831_v4 = vor.u32 1.1754944e-38, %v3830_v16  ;;  %vm3839_vm10 = vweird.f32 %v8567_v55 }
 0x3e8   : > { %v5644_v62 = vpop.eup %5643  ;;  %v3469_v44 = vmul.f32 1.442695, %v3414_v17  ;;  %v3823_v15 = vadd.f32 %v5642_v53, %v3822_v25  ;;  %v9579_v17 = vand.u32 4294901760, %v8316_v1 }
 0x3e9   : > { %v5646_v3 = vpop.eup %5645  ;;  %v8595_v21 = vadd.f32 1.0, %v5644_v62  ;;  %v3213_v6 = vpop.f32.mrf.mxu2  ;;  %v9324_v46 = vand.u32 4294901760, %v8591_v60 }
 0x3ea   : > { %v3835_v13 = vmul.f32 %v5646_v3, %v8567_v55  ;;  %5647 = vpow2.f32 %v3469_v44  ;;  %v3214_v56 = vadd.f32 %v3213_v6, %v3049_v63  ;;  %4786 = vmatmul.f32.gmra.mxu3 %v9579_v17  ;;  %v3827_v52 = vsel %vm3826_vm8, %v5642_v53, %v3823_v15  ;;  %v9580_v44 = vld [vmem:[#allocation17_spill] sm:$0xff] }
 0x3eb   : > { %5649 = vrcp.f32 %v8595_v21  ;;  %v4273_v12 = vsub.f32 %v8591_v60, %v9324_v46  ;;  %v3832_v31 = vsel %vm3829_vm9, %v3831_v4, %v3827_v52  ;;  %v2850_v63 = vadd.f32 %v8291_v61, %v9580_v44 }
 0x3ec   : > { %v3836_v25 = vsub.f32 1.0, %v3835_v13  ;;  %v3361_v62 = vadd.f32 %v3360_v42, %v3214_v56  ;;  %v8605_v28 = vpop.f32.mrf.mxu0  ;;  %v8607_v16 = vpop.f32.mrf.mxu1  ;;  %v4062_v18 = vsel %vm337_vm1, %v3832_v31, 0  ;;  %v3843_v17 = vand.u32 2147483647, %v8567_v55 }
 0x3ed   : > { %v3364_v6 = vpop.f32.mrf.mxu3  ;;  %v4274_v53 = vand.u32 4294901760, %v4273_v12  ;;  %v8612_v15 = vand.u32 4294901760, %v4062_v18  ;;  %v3845_v46 = vand.u32 2147483648, %v8567_v55  ;;  %vm3840_vm0 = vweird.f32 %v5646_v3 }
 0x3ee   : > { %v3415_v4 = vsub.f32 0.0, %v3361_v62  ;;  %4597 = vmatmul.f32.gmra.mxu2 %v8316_v1  ;;  %v3837_v42 = vmul.f32 %v5646_v3, %v3836_v25  ;;  %v3055_v52 = vadd.f32 %v8266_v11, %v2850_v63  ;;  %vm3841_vm11 = vmor %vm3839_vm10, %vm3840_vm0  ;;  %vm3844_vm12 = vcmp.eq.f32.partialorder %v3843_v17, 8.507059e+37 }
 0x3ef   : > { %9581 = vst [vmem:[#allocation10_spill] sm:$0xff] %v8612_v15  ;;  %4275 = vmatmul.f32.gmra.mxu0 %v4274_v53  ;;  %4482 = vmatmul.f32.gmra.mxu1 %v8612_v15  ;;  %v8619_v13 = vsub.f32 %v4062_v18, %v8612_v15  ;;  %v3846_v25 = vor.u32 1.1754944e-38, %v3845_v46  ;;  %vm3854_vm14 = vweird.f32 %v8595_v21 }
 0x3f0   : > { %v5648_v61 = vpop.eup %5647  ;;  %v3471_v56 = vmul.f32 1.442695, %v3415_v4  ;;  %v3838_v12 = vadd.f32 %v5646_v3, %v3837_v42  ;;  %v9582_v4 = vand.u32 4294901760, %v8343_v48 }
 0x3f1   : > { %v5650_v31 = vpop.eup %5649  ;;  %v8623_v44 = vadd.f32 1.0, %v5648_v61  ;;  %v3217_v62 = vpop.f32.mrf.mxu2  ;;  %v9327_v1 = vand.u32 4294901760, %v8619_v13 }
 0x3f2   : > { %v3850_v53 = vmul.f32 %v5650_v31, %v8595_v21  ;;  %5651 = vpow2.f32 %v3471_v56  ;;  %v3218_v18 = vadd.f32 %v3217_v62, %v3055_v52  ;;  %4792 = vmatmul.f32.gmra.mxu3 %v9582_v4  ;;  %v3842_v11 = vsel %vm3841_vm11, %v5646_v3, %v3838_v12  ;;  %v9583_v56 = vld [vmem:[#allocation35_spill] sm:$0xff] }
 0x3f3   : > { %5653 = vrcp.f32 %v8623_v44  ;;  %v4281_v55 = vsub.f32 %v8619_v13, %v9327_v1  ;;  %v3847_v63 = vsel %vm3844_vm12, %v3846_v25, %v3842_v11  ;;  %v2855_v52 = vadd.f32 %v8323_v37, %v9583_v56 }
 0x3f4   : > { %v3851_v42 = vsub.f32 1.0, %v3850_v53  ;;  %v3365_v61 = vadd.f32 %v3364_v6, %v3218_v18  ;;  %v8633_v15 = vpop.f32.mrf.mxu0  ;;  %v8635_v46 = vpop.f32.mrf.mxu1  ;;  %v4065_v17 = vsel %vm337_vm1, %v3847_v63, 0  ;;  %v3858_v4 = vand.u32 2147483647, %v8595_v21 }
 0x3f5   : > { %v3368_v62 = vpop.f32.mrf.mxu3  ;;  %v4282_v3 = vand.u32 4294901760, %v4281_v55  ;;  %v8640_v12 = vand.u32 4294901760, %v4065_v17  ;;  %v3860_v1 = vand.u32 2147483648, %v8595_v21  ;;  %vm3855_vm13 = vweird.f32 %v5650_v31 }
 0x3f6   : > { %v3416_v25 = vsub.f32 0.0, %v3365_v61  ;;  %4602 = vmatmul.f32.gmra.mxu2 %v8343_v48  ;;  %v3852_v6 = vmul.f32 %v5650_v31, %v3851_v42  ;;  %v3061_v11 = vadd.f32 %v8298_v51, %v2855_v52  ;;  %vm3856_vm15 = vmor %vm3854_vm14, %vm3855_vm13  ;;  %vm3859_vm2 = vcmp.eq.f32.partialorder %v3858_v4, 8.507059e+37 }
 0x3f7   : > { %9584 = vst [vmem:[#allocation9_spill] sm:$0xff] %v8640_v12  ;;  %4283 = vmatmul.f32.gmra.mxu0 %v4282_v3  ;;  %4486 = vmatmul.f32.gmra.mxu1 %v8640_v12  ;;  %v8647_v53 = vsub.f32 %v4065_v17, %v8640_v12  ;;  %v3861_v42 = vor.u32 1.1754944e-38, %v3860_v1  ;;  %vm3869_vm4 = vweird.f32 %v8623_v44 }
 0x3f8   : > { %v5652_v37 = vpop.eup %5651  ;;  %v3473_v18 = vmul.f32 1.442695, %v3416_v25  ;;  %v3853_v55 = vadd.f32 %v5650_v31, %v3852_v6  ;;  %v9585_v25 = vand.u32 4294901760, %v8371_v40 }
 0x3f9   : > { %v5654_v63 = vpop.eup %5653  ;;  %v8651_v56 = vadd.f32 1.0, %v5652_v37  ;;  %v3221_v61 = vpop.f32.mrf.mxu2  ;;  %v9330_v48 = vand.u32 4294901760, %v8647_v53 }
 0x3fa   : > { %v3865_v3 = vmul.f32 %v5654_v63, %v8623_v44  ;;  %5655 = vpow2.f32 %v3473_v18  ;;  %v3222_v17 = vadd.f32 %v3221_v61, %v3061_v11  ;;  %4798 = vmatmul.f32.gmra.mxu3 %v9585_v25  ;;  %v3857_v51 = vsel %vm3856_vm15, %v5650_v31, %v3853_v55  ;;  %v9586_v18 = vld [vmem:[#allocation20_spill] sm:$0xff] }
 0x3fb   : > { %5657 = vrcp.f32 %v8651_v56  ;;  %v4289_v21 = vsub.f32 %v8647_v53, %v9330_v48  ;;  %v3862_v52 = vsel %vm3859_vm2, %v3861_v42, %v3857_v51  ;;  %v2860_v11 = vadd.f32 %v8357_v33, %v9586_v18 }
 0x3fc   : > { %v3866_v6 = vsub.f32 1.0, %v3865_v3  ;;  %v3369_v37 = vadd.f32 %v3368_v62, %v3222_v17  ;;  %v8661_v12 = vpop.f32.mrf.mxu0  ;;  %v8663_v1 = vpop.f32.mrf.mxu1  ;;  %v4068_v4 = vsel %vm337_vm1, %v3862_v52, 0  ;;  %v3873_v25 = vand.u32 2147483647, %v8623_v44 }
 0x3fd   : > { %v3372_v61 = vpop.f32.mrf.mxu3  ;;  %v4290_v31 = vand.u32 4294901760, %v4289_v21  ;;  %v8668_v55 = vand.u32 4294901760, %v4068_v4  ;;  %v3875_v48 = vand.u32 2147483648, %v8623_v44  ;;  %vm3870_vm3 = vweird.f32 %v5654_v63 }
 0x3fe   : > { %v3417_v42 = vsub.f32 0.0, %v3369_v37  ;;  %4607 = vmatmul.f32.gmra.mxu2 %v8371_v40  ;;  %v3867_v62 = vmul.f32 %v5654_v63, %v3866_v6  ;;  %v3067_v51 = vadd.f32 %v8331_v0, %v2860_v11  ;;  %vm3871_vm5 = vmor %vm3869_vm4, %vm3870_vm3  ;;  %vm3874_vm6 = vcmp.eq.f32.partialorder %v3873_v25, 8.507059e+37 }
 0x3ff   : > { %9587 = vst [vmem:[#allocation25_spill] sm:$0xff] %v8668_v55  ;;  %4291 = vmatmul.f32.gmra.mxu0 %v4290_v31  ;;  %4490 = vmatmul.f32.gmra.mxu1 %v8668_v55  ;;  %v8675_v3 = vsub.f32 %v4068_v4, %v8668_v55  ;;  %v3876_v6 = vor.u32 1.1754944e-38, %v3875_v48  ;;  %vm3884_vm8 = vweird.f32 %v8651_v56 }
 0x400   : > { %v5656_v33 = vpop.eup %5655  ;;  %v3475_v17 = vmul.f32 1.442695, %v3417_v42  ;;  %v3868_v21 = vadd.f32 %v5654_v63, %v3867_v62  ;;  %v9588_v42 = vand.u32 4294901760, %v8397_v30 }
 0x401   : > { %v5658_v52 = vpop.eup %5657  ;;  %v8679_v18 = vadd.f32 1.0, %v5656_v33  ;;  %v3225_v37 = vpop.f32.mrf.mxu2  ;;  %v9333_v40 = vand.u32 4294901760, %v8675_v3 }
 0x402   : > { %v3880_v31 = vmul.f32 %v5658_v52, %v8651_v56  ;;  %5659 = vpow2.f32 %v3475_v17  ;;  %v3226_v4 = vadd.f32 %v3225_v37, %v3067_v51  ;;  %4804 = vmatmul.f32.gmra.mxu3 %v9588_v42  ;;  %v3872_v0 = vsel %vm3871_vm5, %v5654_v63, %v3868_v21  ;;  %v9589_v17 = vld [vmem:[#allocation19_spill] sm:$0xff] }
 0x403   : > { %5661 = vrcp.f32 %v8679_v18  ;;  %v4297_v44 = vsub.f32 %v8675_v3, %v9333_v40  ;;  %v3877_v11 = vsel %vm3874_vm6, %v3876_v6, %v3872_v0  ;;  %v2865_v51 = vadd.f32 %v8392_v57, %v9589_v17 }
 0x404   : > { %v3881_v62 = vsub.f32 1.0, %v3880_v31  ;;  %v3373_v33 = vadd.f32 %v3372_v61, %v3226_v4  ;;  %v8689_v55 = vpop.f32.mrf.mxu0  ;;  %v8691_v48 = vpop.f32.mrf.mxu1  ;;  %v4071_v25 = vsel %vm337_vm1, %v3877_v11, 0  ;;  %v3888_v42 = vand.u32 2147483647, %v8651_v56 }
 0x405   : > { %v3376_v37 = vpop.f32.mrf.mxu3  ;;  %v4298_v63 = vand.u32 4294901760, %v4297_v44  ;;  %v8696_v21 = vand.u32 4294901760, %v4071_v25  ;;  %v3890_v40 = vand.u32 2147483648, %v8651_v56  ;;  %vm3885_vm7 = vweird.f32 %v5658_v52 }
 0x406   : > { %v3418_v6 = vsub.f32 0.0, %v3373_v33  ;;  %4612 = vmatmul.f32.gmra.mxu2 %v8397_v30  ;;  %v3882_v61 = vmul.f32 %v5658_v52, %v3881_v62  ;;  %v3073_v0 = vadd.f32 %v8366_v45, %v2865_v51  ;;  %vm3886_vm9 = vmor %vm3884_vm8, %vm3885_vm7  ;;  %vm3889_vm0 = vcmp.eq.f32.partialorder %v3888_v42, 8.507059e+37 }
 0x407   : > { %9590 = vst [vmem:[#allocation24_spill] sm:$0xff] %v8696_v21  ;;  %4299 = vmatmul.f32.gmra.mxu0 %v4298_v63  ;;  %4494 = vmatmul.f32.gmra.mxu1 %v8696_v21  ;;  %v8703_v31 = vsub.f32 %v4071_v25, %v8696_v21  ;;  %v3891_v62 = vor.u32 1.1754944e-38, %v3890_v40  ;;  %vm3899_vm11 = vweird.f32 %v8679_v18 }
 0x408   : > { %v5660_v57 = vpop.eup %5659  ;;  %v3477_v4 = vmul.f32 1.442695, %v3418_v6  ;;  %v3883_v44 = vadd.f32 %v5658_v52, %v3882_v61  ;;  %v9591_v6 = vand.u32 4294901760, %v8423_v59 }
 0x409   : > { %v5662_v11 = vpop.eup %5661  ;;  %v8707_v17 = vadd.f32 1.0, %v5660_v57  ;;  %v3229_v33 = vpop.f32.mrf.mxu2  ;;  %v9336_v30 = vand.u32 4294901760, %v8703_v31 }
 0x40a   : > { %v3895_v63 = vmul.f32 %v5662_v11, %v8679_v18  ;;  %5663 = vpow2.f32 %v3477_v4  ;;  %v3230_v25 = vadd.f32 %v3229_v33, %v3073_v0  ;;  %4810 = vmatmul.f32.gmra.mxu3 %v9591_v6  ;;  %v3887_v45 = vsel %vm3886_vm9, %v5658_v52, %v3883_v44  ;;  %v9592_v4 = vld [vmem:[#allocation22_spill] sm:$0xff] }
 0x40b   : > { %5665 = vrcp.f32 %v8707_v17  ;;  %v4305_v56 = vsub.f32 %v8703_v31, %v9336_v30  ;;  %v3892_v51 = vsel %vm3889_vm0, %v3891_v62, %v3887_v45  ;;  %v2870_v0 = vadd.f32 %v8425_v2, %v9592_v4 }
 0x40c   : > { %v3896_v61 = vsub.f32 1.0, %v3895_v63  ;;  %v3377_v57 = vadd.f32 %v3376_v37, %v3230_v25  ;;  %v8717_v21 = vpop.f32.mrf.mxu0  ;;  %v8719_v40 = vpop.f32.mrf.mxu1  ;;  %v4074_v42 = vsel %vm337_vm1, %v3892_v51, 0  ;;  %v3903_v6 = vand.u32 2147483647, %v8679_v18 }
 0x40d   : > { %v3380_v33 = vpop.f32.mrf.mxu3  ;;  %v4306_v52 = vand.u32 4294901760, %v4305_v56  ;;  %v8724_v44 = vand.u32 4294901760, %v4074_v42  ;;  %v3905_v30 = vand.u32 2147483648, %v8679_v18  ;;  %vm3900_vm10 = vweird.f32 %v5662_v11 }
 0x40e   : > { %v3419_v62 = vsub.f32 0.0, %v3377_v57  ;;  %4617 = vmatmul.f32.gmra.mxu2 %v8423_v59  ;;  %v3897_v37 = vmul.f32 %v5662_v11, %v3896_v61  ;;  %v3079_v45 = vadd.f32 %v8399_v5, %v2870_v0  ;;  %vm3901_vm12 = vmor %vm3899_vm11, %vm3900_vm10  ;;  %vm3904_vm13 = vcmp.eq.f32.partialorder %v3903_v6, 8.507059e+37 }
 0x40f   : > { %9593 = vst [vmem:[#allocation12_spill] sm:$0xff] %v8724_v44  ;;  %4307 = vmatmul.f32.gmra.mxu0 %v4306_v52  ;;  %4498 = vmatmul.f32.gmra.mxu1 %v8724_v44  ;;  %v8731_v63 = vsub.f32 %v4074_v42, %v8724_v44  ;;  %v3906_v61 = vor.u32 1.1754944e-38, %v3905_v30  ;;  %vm3914_vm15 = vweird.f32 %v8707_v17 }
 0x410   : > { %v5664_v2 = vpop.eup %5663  ;;  %v3479_v25 = vmul.f32 1.442695, %v3419_v62  ;;  %v3898_v56 = vadd.f32 %v5662_v11, %v3897_v37  ;;  %v9594_v62 = vand.u32 4294901760, %v8451_v22 }
 0x411   : > { %v5666_v51 = vpop.eup %5665  ;;  %v8735_v4 = vadd.f32 1.0, %v5664_v2  ;;  %v3233_v57 = vpop.f32.mrf.mxu2  ;;  %v9339_v59 = vand.u32 4294901760, %v8731_v63 }
 0x412   : > { %v3910_v52 = vmul.f32 %v5666_v51, %v8707_v17  ;;  %5667 = vpow2.f32 %v3479_v25  ;;  %v3234_v42 = vadd.f32 %v3233_v57, %v3079_v45  ;;  %4816 = vmatmul.f32.gmra.mxu3 %v9594_v62  ;;  %v3902_v5 = vsel %vm3901_vm12, %v5662_v11, %v3898_v56  ;;  %v9595_v25 = vld [vmem:[#allocation21_spill] sm:$0xff] }
 0x413   : > { %5669 = vrcp.f32 %v8735_v4  ;;  %v4313_v18 = vsub.f32 %v8731_v63, %v9339_v59  ;;  %v3907_v0 = vsel %vm3904_vm13, %v3906_v61, %v3902_v5  ;;  %v2875_v45 = vadd.f32 %v8458_v50, %v9595_v25 }
 0x414   : > { %v3911_v37 = vsub.f32 1.0, %v3910_v52  ;;  %v3381_v2 = vadd.f32 %v3380_v33, %v3234_v42  ;;  %v8745_v44 = vpop.f32.mrf.mxu0  ;;  %v8747_v30 = vpop.f32.mrf.mxu1  ;;  %v4077_v6 = vsel %vm337_vm1, %v3907_v0, 0  ;;  %v3918_v62 = vand.u32 2147483647, %v8707_v17 }
 0x415   : > { %v3384_v57 = vpop.f32.mrf.mxu3  ;;  %v4314_v11 = vand.u32 4294901760, %v4313_v18  ;;  %v8752_v56 = vand.u32 4294901760, %v4077_v6  ;;  %v3920_v59 = vand.u32 2147483648, %v8707_v17  ;;  %vm3915_vm14 = vweird.f32 %v5666_v51 }
 0x416   : > { %v3420_v61 = vsub.f32 0.0, %v3381_v2  ;;  %4622 = vmatmul.f32.gmra.mxu2 %v8451_v22  ;;  %v3912_v33 = vmul.f32 %v5666_v51, %v3911_v37  ;;  %v3085_v5 = vadd.f32 %v8432_v32, %v2875_v45  ;;  %vm3916_vm2 = vmor %vm3914_vm15, %vm3915_vm14  ;;  %vm3919_vm3 = vcmp.eq.f32.partialorder %v3918_v62, 8.507059e+37 }
 0x417   : > { %9596 = vst [vmem:[#allocation27_spill] sm:$0xff] %v8752_v56  ;;  %4315 = vmatmul.f32.gmra.mxu0 %v4314_v11  ;;  %4502 = vmatmul.f32.gmra.mxu1 %v8752_v56  ;;  %v8759_v52 = vsub.f32 %v4077_v6, %v8752_v56  ;;  %v3921_v37 = vor.u32 1.1754944e-38, %v3920_v59  ;;  %vm3929_vm5 = vweird.f32 %v8735_v4 }
 0x418   : > { %v5668_v50 = vpop.eup %5667  ;;  %v3481_v42 = vmul.f32 1.442695, %v3420_v61  ;;  %v3913_v18 = vadd.f32 %v5666_v51, %v3912_v33  ;;  %v9597_v61 = vand.u32 4294901760, %v8479_v7 }
 0x419   : > { %v5670_v0 = vpop.eup %5669  ;;  %v8763_v25 = vadd.f32 1.0, %v5668_v50  ;;  %v3237_v2 = vpop.f32.mrf.mxu2  ;;  %v9342_v22 = vand.u32 4294901760, %v8759_v52 }
 0x41a   : > { %v3925_v11 = vmul.f32 %v5670_v0, %v8735_v4  ;;  %5671 = vpow2.f32 %v3481_v42  ;;  %v3238_v6 = vadd.f32 %v3237_v2, %v3085_v5  ;;  %4822 = vmatmul.f32.gmra.mxu3 %v9597_v61  ;;  %v3917_v32 = vsel %vm3916_vm2, %v5666_v51, %v3913_v18  ;;  %v9598_v42 = vld [vmem:[#allocation23_spill] sm:$0xff] }
 0x41b   : > { %5673 = vrcp.f32 %v8763_v25  ;;  %v4321_v17 = vsub.f32 %v8759_v52, %v9342_v22  ;;  %v3922_v45 = vsel %vm3919_vm3, %v3921_v37, %v3917_v32  ;;  %v2880_v5 = vadd.f32 %v8493_v23, %v9598_v42 }
 0x41c   : > { %v3926_v33 = vsub.f32 1.0, %v3925_v11  ;;  %v3385_v50 = vadd.f32 %v3384_v57, %v3238_v6  ;;  %v8773_v56 = vpop.f32.mrf.mxu0  ;;  %v8775_v59 = vpop.f32.mrf.mxu1  ;;  %v4080_v62 = vsel %vm337_vm1, %v3922_v45, 0  ;;  %v3933_v61 = vand.u32 2147483647, %v8735_v4 }
 0x41d   : > { %v3388_v2 = vpop.f32.mrf.mxu3  ;;  %v4322_v51 = vand.u32 4294901760, %v4321_v17  ;;  %v8780_v18 = vand.u32 4294901760, %v4080_v62  ;;  %v3935_v22 = vand.u32 2147483648, %v8735_v4  ;;  %vm3930_vm4 = vweird.f32 %v5670_v0 }
 0x41e   : > { %v3421_v37 = vsub.f32 0.0, %v3385_v50  ;;  %4627 = vmatmul.f32.gmra.mxu2 %v8479_v7  ;;  %v3927_v57 = vmul.f32 %v5670_v0, %v3926_v33  ;;  %v3091_v32 = vadd.f32 %v8467_v54, %v2880_v5  ;;  %vm3931_vm6 = vmor %vm3929_vm5, %vm3930_vm4  ;;  %vm3934_vm7 = vcmp.eq.f32.partialorder %v3933_v61, 8.507059e+37 }
 0x41f   : > { %9599 = vst [vmem:[#allocation26_spill] sm:$0xff] %v8780_v18  ;;  %4323 = vmatmul.f32.gmra.mxu0 %v4322_v51  ;;  %4506 = vmatmul.f32.gmra.mxu1 %v8780_v18  ;;  %v8787_v11 = vsub.f32 %v4080_v62, %v8780_v18  ;;  %v3936_v33 = vor.u32 1.1754944e-38, %v3935_v22  ;;  %vm3944_vm9 = vweird.f32 %v8763_v25 }
 0x420   : > { %v5672_v23 = vpop.eup %5671  ;;  %v3483_v6 = vmul.f32 1.442695, %v3421_v37  ;;  %v3928_v17 = vadd.f32 %v5670_v0, %v3927_v57  ;;  %v9600_v37 = vand.u32 4294901760, %v8507_v36 }
 0x421   : > { %v5674_v45 = vpop.eup %5673  ;;  %v8791_v42 = vadd.f32 1.0, %v5672_v23  ;;  %v3241_v50 = vpop.f32.mrf.mxu2  ;;  %v9345_v7 = vand.u32 4294901760, %v8787_v11 }
 0x422   : > { %v3940_v51 = vmul.f32 %v5674_v45, %v8763_v25  ;;  %5675 = vpow2.f32 %v3483_v6  ;;  %v3242_v62 = vadd.f32 %v3241_v50, %v3091_v32  ;;  %4828 = vmatmul.f32.gmra.mxu3 %v9600_v37  ;;  %v3932_v54 = vsel %vm3931_vm6, %v5670_v0, %v3928_v17 }
 0x423   : > { %5677 = vrcp.f32 %v8791_v42  ;;  %v4329_v4 = vsub.f32 %v8787_v11, %v9345_v7  ;;  %v3937_v5 = vsel %vm3934_vm7, %v3936_v33, %v3932_v54  ;;  %v3948_v0 = vand.u32 2147483647, %v8763_v25 }
 0x424   : > { %v3941_v57 = vsub.f32 1.0, %v3940_v51  ;;  %v3389_v23 = vadd.f32 %v3388_v2, %v3242_v62  ;;  %v8801_v18 = vpop.f32.mrf.mxu0  ;;  %v8803_v22 = vpop.f32.mrf.mxu1  ;;  %v4083_v61 = vsel %vm337_vm1, %v3937_v5, 0  ;;  %v3950_v17 = vand.u32 2147483648, %v8763_v25 }
 0x425   : > { %v4733_v6 = vpop.f32.mrf.mxu3  ;;  %v4330_v32 = vand.u32 4294901760, %v4329_v4  ;;  %v8806_v50 = vand.u32 4294901760, %v4083_v61  ;;  %vm3945_vm8 = vweird.f32 %v5674_v45  ;;  %v4404_v62 = vadd.f32 %v8495_v26, %v8521_v9 }
 0x426   : > { %v3422_v37 = vsub.f32 0.0, %v3389_v23  ;;  %4632 = vmatmul.f32.gmra.mxu2 %v8507_v36  ;;  %v3942_v33 = vmul.f32 %v5674_v45, %v3941_v57  ;;  %vm3946_vm0 = vmor %vm3944_vm9, %vm3945_vm8  ;;  %vm3949_vm10 = vcmp.eq.f32.partialorder %v3948_v0, 8.507059e+37  ;;  %vm3959_vm12 = vweird.f32 %v8791_v42 }
 0x427   : > { %9601 = vst [vmem:[#allocation11_spill] sm:$0xff] %v8806_v50  ;;  %4331 = vmatmul.f32.gmra.mxu0 %v4330_v32  ;;  %4510 = vmatmul.f32.gmra.mxu1 %v8806_v50  ;;  %v8813_v2 = vsub.f32 %v4083_v61, %v8806_v50  ;;  %v3951_v32 = vor.u32 1.1754944e-38, %v3950_v17  ;;  %v9602_v50 = vand.u32 4294901760, %v8535_v14 }
 0x428   : > { %v5676_v51 = vpop.eup %5675  ;;  %v3485_v54 = vmul.f32 1.442695, %v3422_v37  ;;  %v3943_v4 = vadd.f32 %v5674_v45, %v3942_v33 }
 0x429   : > { %v5678_v5 = vpop.eup %5677  ;;  %v8818_v23 = vadd.f32 1.0, %v5676_v51  ;;  %v4553_v36 = vpop.f32.mrf.mxu2  ;;  %v9348_v57 = vand.u32 4294901760, %v8813_v2 }
 0x42a   : > { %v3955_v61 = vmul.f32 %v5678_v5, %v8791_v42  ;;  %5679 = vpow2.f32 %v3485_v54  ;;  %v4554_v7 = vadd.f32 %v4553_v36, %v4404_v62  ;;  %4834 = vmatmul.f32.gmra.mxu3 %v9602_v50  ;;  %v3947_v26 = vsel %vm3946_vm0, %v5674_v45, %v3943_v4 }
 0x42b   : > { %5681 = vrcp.f32 %v8818_v23  ;;  %v4337_v9 = vsub.f32 %v8813_v2, %v9348_v57  ;;  %v3952_v25 = vsel %vm3949_vm10, %v3951_v32, %v3947_v26  ;;  %v3965_v45 = vand.u32 2147483648, %v8791_v42 }
 0x42c   : > { %v3956_v37 = vsub.f32 1.0, %v3955_v61  ;;  %v8828_v33 = vpop.f32.mrf.mxu0  ;;  %v8830_v0 = vpop.f32.mrf.mxu1  ;;  %v4086_v17 = vsel %vm337_vm1, %v3952_v25, 0  ;;  %vm3960_vm11 = vweird.f32 %v5678_v5  ;;  %v3963_v4 = vand.u32 2147483647, %v8791_v42 }
 0x42d   : > { %9603 = vst [vmem:[#allocation14_spill] sm:$0xff] %v8830_v0  ;;  %v4739_v51 = vpop.f32.mrf.mxu3  ;;  %v4338_v62 = vand.u32 4294901760, %v4337_v9  ;;  %v8833_v54 = vand.u32 4294901760, %v4086_v17  ;;  %v8838_v36 = vadd.f32 %v4733_v6, %v4554_v7  ;;  %v4408_v26 = vadd.f32 %v8523_v19, %v8549_v58  ;;  %vm3961_vm13 = vmor %vm3959_vm12, %vm3960_vm11 }
 0x42e   : > { %4637 = vmatmul.f32.gmra.mxu2 %v8535_v14  ;;  %v3957_v50 = vmul.f32 %v5678_v5, %v3956_v37  ;;  %v3966_v6 = vor.u32 1.1754944e-38, %v3965_v45  ;;  %vm3964_vm14 = vcmp.eq.f32.partialorder %v3963_v4, 8.507059e+37  ;;  %vm3974_vm2 = vweird.f32 %v8818_v23 }
 0x42f   : > { %9604 = vst [vmem:[#allocation30_spill] sm:$0xff] %v8833_v54  ;;  %4339 = vmatmul.f32.gmra.mxu0 %v4338_v62  ;;  %4514 = vmatmul.f32.gmra.mxu1 %v8833_v54  ;;  %v8842_v32 = vsub.f32 %v4086_v17, %v8833_v54  ;;  %v9605_v17 = vand.u32 4294901760, %v8563_v39 }
 0x430   : > { %v5680_v61 = vpop.eup %5679  ;;  %v3958_v9 = vadd.f32 %v5678_v5, %v3957_v50 }
 0x431   : > { %v5682_v14 = vpop.eup %5681  ;;  %v8847_v25 = vadd.f32 1.0, %v5680_v61  ;;  %v4558_v37 = vpop.f32.mrf.mxu2  ;;  %v9351_v7 = vand.u32 4294901760, %v8842_v32 }
 0x432   : > { %v3970_v62 = vmul.f32 %v5682_v14, %v8818_v23  ;;  %v4559_v57 = vadd.f32 %v4558_v37, %v4408_v26  ;;  %4840 = vmatmul.f32.gmra.mxu3 %v9605_v17  ;;  %v3962_v54 = vsel %vm3961_vm13, %v5678_v5, %v3958_v9  ;;  %v3980_v5 = vand.u32 2147483648, %v8818_v23 }
 0x433   : > { %5683 = vrcp.f32 %v8847_v25  ;;  %v4345_v19 = vsub.f32 %v8842_v32, %v9351_v7  ;;  %v3967_v58 = vsel %vm3964_vm14, %v3966_v6, %v3962_v54  ;;  %vm3975_vm15 = vweird.f32 %v5682_v14 }
 0x434   : > { %v3971_v42 = vsub.f32 1.0, %v3970_v62  ;;  %v8857_v50 = vpop.f32.mrf.mxu0  ;;  %v8859_v61 = vpop.f32.mrf.mxu1  ;;  %v4089_v45 = vsel %vm337_vm1, %v3967_v58, 0  ;;  %v8865_v4 = vadd.f32 %v4739_v51, %v4559_v57  ;;  %v3978_v54 = vand.u32 2147483647, %v8818_v23  ;;  %vm3976_vm3 = vmor %vm3974_vm2, %vm3975_vm15 }
 0x435   : > { %9606 = vst [vmem:[#allocation13_spill] sm:$0xff] %v8859_v61  ;;  %v4745_v26 = vpop.f32.mrf.mxu3  ;;  %v4346_v37 = vand.u32 4294901760, %v4345_v19  ;;  %v8862_v0 = vand.u32 4294901760, %v4089_v45  ;;  %v4412_v62 = vadd.f32 %v8551_v38, %v8577_v41  ;;  %v3981_v19 = vor.u32 1.1754944e-38, %v3980_v5 }
 0x436   : > { %4642 = vmatmul.f32.gmra.mxu2 %v8563_v39  ;;  %v3972_v9 = vmul.f32 %v5682_v14, %v3971_v42  ;;  %vm3979_vm4 = vcmp.eq.f32.partialorder %v3978_v54, 8.507059e+37  ;;  %vm3989_vm6 = vweird.f32 %v8847_v25 }
 0x437   : > { %9607 = vst [vmem:[#allocation16_spill] sm:$0xff] %v8862_v0  ;;  %4347 = vmatmul.f32.gmra.mxu0 %v4346_v37  ;;  %4518 = vmatmul.f32.gmra.mxu1 %v8862_v0  ;;  %v8871_v6 = vsub.f32 %v4089_v45, %v8862_v0  ;;  %v9608_v37 = vand.u32 4294901760, %v8591_v60 }
 0x438   : > { %v3973_v17 = vadd.f32 %v5682_v14, %v3972_v9 }
 0x439   : > { %v5684_v57 = vpop.eup %5683  ;;  %v4563_v51 = vpop.f32.mrf.mxu2  ;;  %v4352_v39 = vand.u32 4294901760, %v8871_v6 }
 0x43a   : > { %v3985_v58 = vmul.f32 %v5684_v57, %v8847_v25  ;;  %v4564_v42 = vadd.f32 %v4563_v51, %v4412_v62  ;;  %4846 = vmatmul.f32.gmra.mxu3 %v9608_v37  ;;  %v3977_v45 = vsel %vm3976_vm3, %v5682_v14, %v3973_v17  ;;  %v3995_v14 = vand.u32 2147483648, %v8847_v25 }
 0x43b   : > { %v4353_v38 = vsub.f32 %v8871_v6, %v4352_v39  ;;  %v3982_v41 = vsel %vm3979_vm4, %v3981_v19, %v3977_v45  ;;  %vm3990_vm5 = vweird.f32 %v5684_v57  ;;  %v3993_v17 = vand.u32 2147483647, %v8847_v25 }
 0x43c   : > { %v3986_v23 = vsub.f32 1.0, %v3985_v58  ;;  %v8883_v9 = vpop.f32.mrf.mxu0  ;;  %v8885_v7 = vpop.f32.mrf.mxu1  ;;  %v4092_v5 = vsel %vm337_vm1, %v3982_v41, 0  ;;  %v8888_v0 = vadd.f32 %v4745_v26, %v4564_v42  ;;  %v4416_v26 = vadd.f32 %v8579_v35, %v8605_v28  ;;  %vm3991_vm7 = vmor %vm3989_vm6, %vm3990_vm5 }
 0x43d   : > { %v4751_v62 = vpop.f32.mrf.mxu3  ;;  %v4354_v51 = vand.u32 4294901760, %v4353_v38  ;;  %v8890_v61 = vand.u32 4294901760, %v4092_v5  ;;  %v9609_v38 = vand.u32 4294901760, %v8619_v13  ;;  %vm3994_vm8 = vcmp.eq.f32.partialorder %v3993_v17, 8.507059e+37 }
 0x43e   : > { %4647 = vmatmul.f32.gmra.mxu2 %v8591_v60  ;;  %v3987_v54 = vmul.f32 %v5684_v57, %v3986_v23  ;;  %v3996_v60 = vor.u32 1.1754944e-38, %v3995_v14  ;;  %v4420_v17 = vadd.f32 %v8607_v16, %v8633_v15  ;;  %v9611_v15 = vld [vmem:[#allocation28_spill] sm:$0xff] }
 0x43f   : > { %4355 = vmatmul.f32.gmra.mxu0 %v4354_v51  ;;  %4522 = vmatmul.f32.gmra.mxu1 %v8890_v61  ;;  %v8897_v19 = vsub.f32 %v4092_v5, %v8890_v61 }
 0x440   : > { %v3988_v58 = vadd.f32 %v5684_v57, %v3987_v54 }
 0x441   : > { %v4568_v42 = vpop.f32.mrf.mxu2  ;;  %v4360_v37 = vand.u32 4294901760, %v8897_v19 }
 0x442   : > { %v4569_v45 = vadd.f32 %v4568_v42, %v4416_v26  ;;  %4852 = vmatmul.f32.gmra.mxu3 %v9609_v38  ;;  %v3992_v41 = vsel %vm3991_vm7, %v5684_v57, %v3988_v58 }
 0x443   : > { %v4361_v23 = vsub.f32 %v8897_v19, %v4360_v37  ;;  %v3997_v5 = vsel %vm3994_vm8, %v3996_v60, %v3992_v41  ;;  %v9610_v60 = vand.u32 4294901760, %v8647_v53 }
 0x444   : > { %v8908_v35 = vpop.f32.mrf.mxu0  ;;  %v8910_v28 = vpop.f32.mrf.mxu1  ;;  %v4095_v25 = vsel %vm337_vm1, %v3997_v5, 0  ;;  %v8913_v51 = vadd.f32 %v4751_v62, %v4569_v45  ;;  %v4424_v5 = vadd.f32 %v8635_v46, %v8661_v12  ;;  %v4428_v46 = vadd.f32 %v8663_v1, %v8689_v55 }
 0x445   : > { %v4757_v14 = vpop.f32.mrf.mxu3  ;;  %v4362_v54 = vand.u32 4294901760, %v4361_v23  ;;  %v8915_v26 = vand.u32 4294901760, %v4095_v25  ;;  %v4432_v1 = vadd.f32 %v8691_v48, %v8717_v21  ;;  %v9617_v48 = vand.u32 4294901760, %v8759_v52 }
 0x446   : > { %4652 = vmatmul.f32.gmra.mxu2 %v8619_v13  ;;  %vm5293_vm1 = vcmask 1041409  }
 0x447   : > { %4363 = vmatmul.f32.gmra.mxu0 %v4362_v54  ;;  %4526 = vmatmul.f32.gmra.mxu1 %v8915_v26  ;;  %v8920_v57 = vsub.f32 %v4095_v25, %v8915_v26 }
 0x449   : > { %v4573_v58 = vpop.f32.mrf.mxu2  ;;  %v4368_v42 = vand.u32 4294901760, %v8920_v57 }
 0x44a   : > { %v4574_v62 = vadd.f32 %v4573_v58, %v4420_v17  ;;  %4858 = vmatmul.f32.gmra.mxu3 %v9610_v60  ;;  %v9612_v17 = vand.u32 4294901760, %v8675_v3 }
 0x44b   : > { %v4369_v13 = vsub.f32 %v8920_v57, %v4368_v42 }
 0x44c   : > { %v8930_v45 = vpop.f32.mrf.mxu0  ;;  %v8932_v38 = vpop.f32.mrf.mxu1  ;;  %v8934_v41 = vadd.f32 %v4757_v14, %v4574_v62 }
 0x44d   : > { %v4370_v23 = vand.u32 4294901760, %v4369_v13  ;;  %v4763_v16 = vpop.f32.mrf.mxu3 }
 0x44e   : > { %4657 = vmatmul.f32.gmra.mxu2 %v8647_v53  ;;  %v9613_v53 = vld [vmem:[#allocation29_spill] sm:$0xff] }
 0x44f   : > { %4371 = vmatmul.f32.gmra.mxu0 %v4370_v23  ;;  %5092 = vmatmul.f32.vlgmr.msra.gmra.mxu1 %v9611_v15  ;;  %v9614_v23 = vand.u32 4294901760, %v8703_v31 }
 0x451   : > { %v4578_v25 = vpop.f32.mrf.mxu2 }
 0x452   : > { %v4579_v54 = vadd.f32 %v4578_v25, %v4424_v5  ;;  %4864 = vmatmul.f32.gmra.mxu3 %v9612_v17 }
 0x454   : > { %v8942_v58 = vpop.f32.mrf.mxu0  ;;  %v8944_v60 = vpop.f32.mrf.mxu1  ;;  %v8946_v14 = vadd.f32 %v4763_v16, %v4579_v54  ;;  %v9616_v54 = vand.u32 4294901760, %v8731_v63 }
 0x455   : > { %v4769_v12 = vpop.f32.mrf.mxu3 }
 0x456   : > { %4662 = vmatmul.f32.gmra.mxu2 %v8675_v3  ;;  %v9615_v3 = vld [vmem:[#allocation31_spill] sm:$0xff] }
 0x457   : > { %4945 = vmatmul.f32.vlgmr.msra.gmra.mxu0 %v9611_v15  ;;  %5096 = vmatmul.f32.gmra.mxu1 %v9613_v53 }
 0x459   : > { %v4583_v62 = vpop.f32.mrf.mxu2 }
 0x45a   : > { %v4584_v13 = vadd.f32 %v4583_v62, %v4428_v46  ;;  %4870 = vmatmul.f32.gmra.mxu3 %v9614_v23  ;;  %v9619_v23 = vand.u32 4294901760, %v8813_v2 }
 0x45c   : > { %v8955_v5 = vpop.f32.mrf.mxu0  ;;  %v8957_v25 = vpop.f32.mrf.mxu1  ;;  %v8959_v16 = vadd.f32 %v4769_v12, %v4584_v13 }
 0x45d   : > { %v4775_v17 = vpop.f32.mrf.mxu3 }
 0x45e   : > { %4667 = vmatmul.f32.gmra.mxu2 %v8703_v31 }
 0x45f   : > { %4949 = vmatmul.f32.gmra.mxu0 %v9613_v53  ;;  %5100 = vmatmul.f32.gmra.mxu1 %v9615_v3  ;;  %v9618_v53 = vand.u32 4294901760, %v8787_v11 }
 0x461   : > { %v4588_v55 = vpop.f32.mrf.mxu2 }
 0x462   : > { %v4589_v15 = vadd.f32 %v4588_v55, %v4432_v1  ;;  %4876 = vmatmul.f32.gmra.mxu3 %v9616_v54  ;;  %v9629_v1 = vld [vmem:[#allocation33_spill] sm:$0xff] }
 0x464   : > { %v8968_v46 = vpop.f32.mrf.mxu0  ;;  %v8970_v62 = vpop.f32.mrf.mxu1  ;;  %v8972_v12 = vadd.f32 %v4775_v17, %v4589_v15  ;;  %v9632_v15 = vld [vmem:[#allocation34_spill] sm:$0xff] }
 0x466   : > { %4672 = vmatmul.f32.gmra.mxu2 %v8731_v63 }
 0x467   : > { %4953 = vmatmul.f32.gmra.mxu0 %v9615_v3  ;;  %5104 = vmatmul.f32.gmra.mxu1 %v8151_v8  ;;  %v9620_v3 = vand.u32 4294901760, %v8842_v32 }
 0x46a   : > { %4882 = vmatmul.f32.gmra.mxu3 %v9617_v48 }
 0x46c   : > { %v8979_v21 = vpop.f32.mrf.mxu0  ;;  %v8981_v31 = vpop.f32.mrf.mxu1 }
 0x46e   : > { %4677 = vmatmul.f32.gmra.mxu2 %v8759_v52 }
 0x46f   : > { %4957 = vmatmul.f32.gmra.mxu0 %v8151_v8  ;;  %5108 = vmatmul.f32.gmra.mxu1 %v8178_v29 }
 0x472   : > { %4888 = vmatmul.f32.gmra.mxu3 %v9618_v53  ;;  %v9636_v53 = vld [vmem:[#allocation6_spill] sm:$0xff] }
 0x474   : > { %v8988_v63 = vpop.f32.mrf.mxu0  ;;  %v8990_v13 = vpop.f32.mrf.mxu1 }
 0x476   : > { %4682 = vmatmul.f32.gmra.mxu2 %v8787_v11 }
 0x477   : > { %4961 = vmatmul.f32.gmra.mxu0 %v8178_v29  ;;  %5112 = vmatmul.f32.gmra.mxu1 %v8205_v34 }
 0x47a   : > { %4894 = vmatmul.f32.gmra.mxu3 %v9619_v23 }
 0x47c   : > { %v8997_v52 = vpop.f32.mrf.mxu0  ;;  %v8999_v8 = vpop.f32.mrf.mxu1 }
 0x47e   : > { %4687 = vmatmul.f32.gmra.mxu2 %v8813_v2 }
 0x47f   : > { %4965 = vmatmul.f32.gmra.mxu0 %v8205_v34  ;;  %5116 = vmatmul.f32.gmra.mxu1 %v8230_v27 }
 0x482   : > { %4900 = vmatmul.f32.gmra.mxu3 %v9620_v3 }
 0x484   : > { %v9006_v11 = vpop.f32.mrf.mxu0  ;;  %v9008_v29 = vpop.f32.mrf.mxu1 }
 0x486   : > { %4692 = vmatmul.f32.gmra.mxu2 %v8842_v32 }
 0x487   : > { %4969 = vmatmul.f32.gmra.mxu0 %v8230_v27  ;;  %5120 = vmatmul.f32.gmra.mxu1 %v8255_v43 }
 0x48a   : > { %4906 = vmatmul.f32.gmra.mxu3 %v4352_v39 }
 0x48c   : > { %v9015_v2 = vpop.f32.mrf.mxu0  ;;  %v9017_v34 = vpop.f32.mrf.mxu1 }
 0x48e   : > { %4697 = vmatmul.f32.gmra.mxu2 %v8871_v6 }
 0x48f   : > { %4973 = vmatmul.f32.gmra.mxu0 %v8255_v43  ;;  %5124 = vmatmul.f32.gmra.mxu1 %v8282_v47 }
 0x492   : > { %4912 = vmatmul.f32.gmra.mxu3 %v4360_v37 }
 0x494   : > { %v9024_v32 = vpop.f32.mrf.mxu0  ;;  %v9026_v27 = vpop.f32.mrf.mxu1 }
 0x496   : > { %4702 = vmatmul.f32.gmra.mxu2 %v8897_v19 }
 0x497   : > { %4977 = vmatmul.f32.gmra.mxu0 %v8282_v47  ;;  %5128 = vmatmul.f32.gmra.mxu1 %v8309_v49 }
 0x49a   : > { %4918 = vmatmul.f32.gmra.mxu3 %v4368_v42  ;;  %v9626_v42 = vld [vmem:[#allocation32_spill] sm:$0xff] }
 0x49c   : > { %v9033_v6 = vpop.f32.mrf.mxu0  ;;  %v9035_v43 = vpop.f32.mrf.mxu1 }
 0x49d   : > { %9621 = vst [vmem:[#allocation15_spill] sm:$0xff] %v9035_v43 }
 0x49e   : > { %4707 = vmatmul.f32.gmra.mxu2 %v8920_v57 }
 0x49f   : > { %4981 = vmatmul.f32.gmra.mxu0 %v8309_v49  ;;  %5132 = vmatmul.f32.gmra.mxu1 %v8336_v10 }
 0x4a4   : > { %v9040_v39 = vpop.f32.mrf.mxu0  ;;  %v9042_v19 = vpop.f32.mrf.mxu1 }
 0x4a5   : > { %9622 = vst [vmem:[#allocation18_spill] sm:$0xff] %v9040_v39 }
 0x4a6   : > { %9623 = vst [vmem:[#allocation17_spill] sm:$0xff] %v9042_v19 }
 0x4a7   : > { %4985 = vmatmul.f32.gmra.mxu0 %v8336_v10  ;;  %5136 = vmatmul.f32.gmra.mxu1 %v8362_v20 }
 0x4ac   : > { %v9046_v47 = vpop.f32.mrf.mxu0  ;;  %v9048_v37 = vpop.f32.mrf.mxu1 }
 0x4ad   : > { %9624 = vst [vmem:[#allocation35_spill] sm:$0xff] %v9046_v47  ;;  %v9644_v47 = vld [vmem:[#allocation12_spill] sm:$0xff] }
 0x4ae   : > { %9625 = vst [vmem:[#allocation20_spill] sm:$0xff] %v9048_v37 }
 0x4af   : > { %4989 = vmatmul.f32.gmra.mxu0 %v8362_v20  ;;  %5140 = vmatmul.f32.gmra.mxu1 %v9626_v42 }
 0x4b4   : > { %v9052_v57 = vpop.f32.mrf.mxu0  ;;  %v9054_v49 = vpop.f32.mrf.mxu1 }
 0x4b5   : > { %9627 = vst [vmem:[#allocation19_spill] sm:$0xff] %v9052_v57 }
 0x4b6   : > { %9628 = vst [vmem:[#allocation22_spill] sm:$0xff] %v9054_v49 }
 0x4b7   : > { %4993 = vmatmul.f32.gmra.mxu0 %v9626_v42  ;;  %5144 = vmatmul.f32.gmra.mxu1 %v9629_v1 }
 0x4bc   : > { %v9058_v55 = vpop.f32.mrf.mxu0  ;;  %v9060_v10 = vpop.f32.mrf.mxu1 }
 0x4bd   : > { %9630 = vst [vmem:[#allocation21_spill] sm:$0xff] %v9058_v55  ;;  %v4781_v55 = vpop.f32.mrf.mxu3 }
 0x4be   : > { %9631 = vst [vmem:[#allocation23_spill] sm:$0xff] %v9060_v10 }
 0x4bf   : > { %4997 = vmatmul.f32.gmra.mxu0 %v9629_v1  ;;  %5148 = vmatmul.f32.gmra.mxu1 %v9632_v15  ;;  %v9637_v1 = vld [vmem:[#allocation5_spill] sm:$0xff] }
 0x4c4   : > { %v9064_v54 = vpop.f32.mrf.mxu0  ;;  %v9066_v20 = vpop.f32.mrf.mxu1 }
 0x4c5   : > { %9633 = vst [vmem:[#allocation28_spill] sm:$0xff] %v9064_v54  ;;  %v4593_v54 = vpop.f32.mrf.mxu2 }
 0x4c6   : > { %9634 = vst [vmem:[#allocation29_spill] sm:$0xff] %v9066_v20 }
 0x4c7   : > { %5001 = vmatmul.f32.gmra.mxu0 %v9632_v15  ;;  %5152 = vmatmul.f32.gmra.mxu1 %v8472_v24 }
 0x4cc   : > { %v9070_v17 = vpop.f32.mrf.mxu0  ;;  %v5093_v48 = vpop.f32.mrf.mxu1 }
 0x4cd   : > { %9635 = vst [vmem:[#allocation31_spill] sm:$0xff] %v9070_v17 }
 0x4cf   : > { %5005 = vmatmul.f32.gmra.mxu0 %v8472_v24  ;;  %5156 = vmatmul.f32.gmra.mxu1 %v9636_v53  ;;  %v9638_v24 = vld [vmem:[#allocation8_spill] sm:$0xff] }
 0x4d4   : > { %v4946_v23 = vpop.f32.mrf.mxu0  ;;  %v5097_v3 = vpop.f32.mrf.mxu1 }
 0x4d5   : > { %v4947_v42 = vadd.f32 %v4946_v23, %v8838_v36  ;;  %v4598_v23 = vpop.f32.mrf.mxu2 }
 0x4d7   : > { %5009 = vmatmul.f32.gmra.mxu0 %v9636_v53  ;;  %5160 = vmatmul.f32.gmra.mxu1 %v9637_v1  ;;  %v5094_v20 = vadd.f32 %v5093_v48, %v4947_v42 }
 0x4d9   : > { %5220 = vxpose.xlu0.b32.start [1/16] (narrow) %v5094_v20, 8  ;;  %v9639_v20 = vld [vmem:[#allocation7_spill] sm:$0xff] }
 0x4dc   : > { %v4950_v15 = vpop.f32.mrf.mxu0  ;;  %v5101_v10 = vpop.f32.mrf.mxu1 }
 0x4dd   : > { %v4951_v17 = vadd.f32 %v4950_v15, %v8865_v4  ;;  %v4787_v15 = vpop.f32.mrf.mxu3 }
 0x4df   : > { %5013 = vmatmul.f32.gmra.mxu0 %v9637_v1  ;;  %5164 = vmatmul.f32.gmra.mxu1 %v9638_v24  ;;  %v5098_v49 = vadd.f32 %v5097_v3, %v4951_v17  ;;  %v4603_v3 = vpop.f32.mrf.mxu2 }
 0x4e1   : > { %5221 = vxpose.xlu0.b32.cont [2/16] (narrow) %v5098_v49, 8  ;;  %v9640_v49 = vld [vmem:[#allocation10_spill] sm:$0xff] }
 0x4e4   : > { %v4954_v37 = vpop.f32.mrf.mxu0  ;;  %v5105_v36 = vpop.f32.mrf.mxu1 }
 0x4e5   : > { %v4955_v53 = vadd.f32 %v4954_v37, %v8888_v0  ;;  %v4793_v57 = vpop.f32.mrf.mxu3 }
 0x4e7   : > { %5017 = vmatmul.f32.gmra.mxu0 %v9638_v24  ;;  %5168 = vmatmul.f32.gmra.mxu1 %v9639_v20  ;;  %v5102_v48 = vadd.f32 %v5101_v10, %v4955_v53  ;;  %v9641_v10 = vld [vmem:[#allocation9_spill] sm:$0xff] }
 0x4e9   : > { %5222 = vxpose.xlu0.b32.cont [3/16] (narrow) %v5102_v48, 8  ;;  %v4608_v48 = vpop.f32.mrf.mxu2 }
 0x4ec   : > { %v4958_v42 = vpop.f32.mrf.mxu0  ;;  %v5109_v4 = vpop.f32.mrf.mxu1 }
 0x4ed   : > { %v4959_v1 = vadd.f32 %v4958_v42, %v8913_v51 }
 0x4ef   : > { %5021 = vmatmul.f32.gmra.mxu0 %v9639_v20  ;;  %5172 = vmatmul.f32.gmra.mxu1 %v9640_v49  ;;  %v5106_v17 = vadd.f32 %v5105_v36, %v4959_v1  ;;  %v9642_v36 = vld [vmem:[#allocation25_spill] sm:$0xff] }
 0x4f1   : > { %5223 = vxpose.xlu0.b32.cont [4/16] (narrow) %v5106_v17, 8  ;;  %v4799_v17 = vpop.f32.mrf.mxu3  ;;  %v4613_v19 = vpop.f32.mrf.mxu2 }
 0x4f4   : > { %v4962_v0 = vpop.f32.mrf.mxu0  ;;  %v5113_v37 = vpop.f32.mrf.mxu1 }
 0x4f5   : > { %v4963_v24 = vadd.f32 %v4962_v0, %v8934_v41 }
 0x4f7   : > { %5025 = vmatmul.f32.gmra.mxu0 %v9640_v49  ;;  %5176 = vmatmul.f32.gmra.mxu1 %v9641_v10  ;;  %v5110_v53 = vadd.f32 %v5109_v4, %v4963_v24  ;;  %v9643_v4 = vld [vmem:[#allocation24_spill] sm:$0xff] }
 0x4f9   : > { %5224 = vxpose.xlu0.b32.cont [5/16] (narrow) %v5110_v53, 8  ;;  %v4805_v53 = vpop.f32.mrf.mxu3 }
 0x4fc   : > { %v4966_v51 = vpop.f32.mrf.mxu0  ;;  %v5117_v42 = vpop.f32.mrf.mxu1 }
 0x4fd   : > { %v4967_v20 = vadd.f32 %v4966_v51, %v8946_v14 }
 0x4ff   : > { %5029 = vmatmul.f32.gmra.mxu0 %v9641_v10  ;;  %5180 = vmatmul.f32.gmra.mxu1 %v9642_v36  ;;  %v5114_v1 = vadd.f32 %v5113_v37, %v4967_v20  ;;  %v4436_v10 = vadd.f32 %v8719_v40, %v8745_v44  ;;  %v9645_v40 = vld [vmem:[#allocation27_spill] sm:$0xff] }
 0x501   : > { %5225 = vxpose.xlu0.b32.cont [6/16] (narrow) %v5114_v1, 8  ;;  %v4594_v20 = vadd.f32 %v4593_v54, %v4436_v10  ;;  %v4618_v1 = vpop.f32.mrf.mxu2 }
 0x504   : > { %v4970_v41 = vpop.f32.mrf.mxu0  ;;  %v5121_v0 = vpop.f32.mrf.mxu1 }
 0x505   : > { %v4971_v49 = vadd.f32 %v4970_v41, %v8959_v16 }
 0x507   : > { %5033 = vmatmul.f32.gmra.mxu0 %v9642_v36  ;;  %5184 = vmatmul.f32.gmra.mxu1 %v9643_v4  ;;  %v5118_v24 = vadd.f32 %v5117_v42, %v4971_v49  ;;  %v4782_v36 = vadd.f32 %v4781_v55, %v4594_v20  ;;  %v4440_v49 = vadd.f32 %v8747_v30, %v8773_v56  ;;  %v9646_v30 = vld [vmem:[#allocation26_spill] sm:$0xff] }
 0x508   : > { %v4444_v55 = vadd.f32 %v8775_v59, %v8801_v18  ;;  %v9647_v59 = vld [vmem:[#allocation11_spill] sm:$0xff] }
 0x509   : > { %5226 = vxpose.xlu0.b32.cont [7/16] (narrow) %v5118_v24, 8  ;;  %v4811_v24 = vpop.f32.mrf.mxu3  ;;  %v4599_v39 = vadd.f32 %v4598_v23, %v4440_v49 }
 0x50a   : > { %v4604_v10 = vadd.f32 %v4603_v3, %v4444_v55 }
 0x50b   : > { %v4788_v54 = vadd.f32 %v4787_v15, %v4599_v39  ;;  %v4448_v39 = vadd.f32 %v8803_v22, %v8828_v33  ;;  %v9649_v22 = vld [vmem:[#allocation30_spill] sm:$0xff] }
 0x50c   : > { %v4974_v14 = vpop.f32.mrf.mxu0  ;;  %v5125_v51 = vpop.f32.mrf.mxu1  ;;  %v4794_v23 = vadd.f32 %v4793_v57, %v4604_v10 }
 0x50d   : > { %v4975_v37 = vadd.f32 %v4974_v14, %v8972_v12  ;;  %v4623_v12 = vpop.f32.mrf.mxu2  ;;  %v4609_v20 = vadd.f32 %v4608_v48, %v4448_v39 }
 0x50f   : > { %5037 = vmatmul.f32.gmra.mxu0 %v9643_v4  ;;  %5188 = vmatmul.f32.gmra.mxu1 %v9644_v47  ;;  %v5122_v16 = vadd.f32 %v5121_v0, %v4975_v37 }
 0x511   : > { %5227 = vxpose.xlu0.b32.cont [8/16] (narrow) %v5122_v16, 8  ;;  %v4817_v37 = vpop.f32.mrf.mxu3  ;;  %v4800_v16 = vadd.f32 %v4799_v17, %v4609_v20  ;;  %v9650_v17 = vld [vmem:[#allocation13_spill] sm:$0xff] }
 0x512   : > { %v4456_v55 = vadd.f32 %v9650_v17, %v8883_v9 }
 0x514   : > { %v4978_v41 = vpop.f32.mrf.mxu0  ;;  %v5129_v42 = vpop.f32.mrf.mxu1  ;;  %v4619_v10 = vadd.f32 %v4618_v1, %v4456_v55 }
 0x515   : > { %v4979_v43 = vadd.f32 %v4978_v41, %v4782_v36 }
 0x517   : > { %5041 = vmatmul.f32.gmra.mxu0 %v9644_v47  ;;  %5192 = vmatmul.f32.gmra.mxu1 %v9645_v40  ;;  %v5126_v44 = vadd.f32 %v5125_v51, %v4979_v43  ;;  %v4628_v47 = vpop.f32.mrf.mxu2 }
 0x519   : > { %5228 = vxpose.xlu0.b32.cont [9/16] (narrow) %v5126_v44, 8  ;;  %v4823_v3 = vpop.f32.mrf.mxu3 }
 0x51c   : > { %v4982_v4 = vpop.f32.mrf.mxu0  ;;  %v5133_v0 = vpop.f32.mrf.mxu1 }
 0x51d   : > { %v4983_v14 = vadd.f32 %v4982_v4, %v4788_v54 }
 0x51f   : > { %5045 = vmatmul.f32.gmra.mxu0 %v9645_v40  ;;  %5196 = vmatmul.f32.gmra.mxu1 %v9646_v30  ;;  %v5130_v56 = vadd.f32 %v5129_v42, %v4983_v14  ;;  %v9648_v42 = vld [vmem:[#allocation14_spill] sm:$0xff]  ;;  %v4633_v49 = vpop.f32.mrf.mxu2 }
 0x520   : > { %v4452_v57 = vadd.f32 %v9648_v42, %v8857_v50  ;;  %v9651_v50 = vld [vmem:[#allocation16_spill] sm:$0xff] }
 0x521   : > { %5229 = vxpose.xlu0.b32.cont [10/16] (narrow) %v5130_v56, 8  ;;  %v4829_v48 = vpop.f32.mrf.mxu3  ;;  %v4812_v56 = vadd.f32 %v4811_v24, %v4619_v10  ;;  %v4464_v24 = vadd.f32 %v8910_v28, %v8930_v45 }
 0x522   : > { %v4614_v44 = vadd.f32 %v4613_v19, %v4452_v57 }
 0x524   : > { %v4986_v43 = vpop.f32.mrf.mxu0  ;;  %v5137_v51 = vpop.f32.mrf.mxu1  ;;  %v4806_v54 = vadd.f32 %v4805_v53, %v4614_v44  ;;  %v4460_v53 = vadd.f32 %v8885_v7, %v8908_v35 }
 0x525   : > { %v4987_v15 = vadd.f32 %v4986_v43, %v4794_v23 }
 0x527   : > { %5049 = vmatmul.f32.gmra.mxu0 %v9646_v30  ;;  %5200 = vmatmul.f32.gmra.mxu1 %v9647_v59  ;;  %v5134_v18 = vadd.f32 %v5133_v0, %v4987_v15  ;;  %v4638_v30 = vpop.f32.mrf.mxu2  ;;  %v4624_v15 = vadd.f32 %v4623_v12, %v4460_v53 }
 0x529   : > { %5230 = vxpose.xlu0.b32.cont [11/16] (narrow) %v5134_v18, 8  ;;  %v4818_v20 = vadd.f32 %v4817_v37, %v4624_v15  ;;  %v4468_v37 = vadd.f32 %v8932_v38, %v8942_v58 }
 0x52b   : > { %v4634_v44 = vadd.f32 %v4633_v49, %v4468_v37 }
 0x52c   : > { %v4990_v36 = vpop.f32.mrf.mxu0  ;;  %v5141_v41 = vpop.f32.mrf.mxu1 }
 0x52d   : > { %v4991_v40 = vadd.f32 %v4990_v36, %v4800_v16  ;;  %v4629_v36 = vadd.f32 %v4628_v47, %v4464_v24  ;;  %v4830_v47 = vadd.f32 %v4829_v48, %v4634_v44  ;;  %v4488_v24 = vadd.f32 %v8990_v13, %v8997_v52 }
 0x52e   : > { %v4496_v52 = vadd.f32 %v9008_v29, %v9015_v2  ;;  %v4504_v2 = vadd.f32 %v9026_v27, %v9033_v6  ;;  %v9654_v27 = vld [vmem:[#allocation35_spill] sm:$0xff]  ;;  %v9655_v6 = vld [vmem:[#allocation17_spill] sm:$0xff] }
 0x52f   : > { %5053 = vmatmul.f32.gmra.mxu0 %v9647_v59  ;;  %5204 = vmatmul.f32.gmra.mxu1 %v9649_v22  ;;  %v5138_v33 = vadd.f32 %v5137_v51, %v4991_v40  ;;  %v4835_v51 = vpop.f32.mrf.mxu3  ;;  %v4643_v1 = vpop.f32.mrf.mxu2  ;;  %v4824_v12 = vadd.f32 %v4823_v3, %v4629_v36 }
 0x531   : > { %5231 = vxpose.xlu0.b32.cont [12/16] (narrow) %v5138_v33, 8  ;;  %v4472_v33 = vadd.f32 %v8944_v60, %v8955_v5  ;;  %v4480_v5 = vadd.f32 %v8970_v62, %v8979_v21 }
 0x534   : > { %v4994_v4 = vpop.f32.mrf.mxu0  ;;  %v5145_v0 = vpop.f32.mrf.mxu1 }
 0x535   : > { %v4995_v14 = vadd.f32 %v4994_v4, %v4806_v54  ;;  %v4639_v4 = vadd.f32 %v4638_v30, %v4472_v33 }
 0x537   : > { %5057 = vmatmul.f32.gmra.mxu0 %v9649_v22  ;;  %5208 = vmatmul.f32.gmra.mxu1 %v9651_v50  ;;  %v5142_v19 = vadd.f32 %v5141_v41, %v4995_v14  ;;  %v4841_v41 = vpop.f32.mrf.mxu3  ;;  %v4648_v35 = vpop.f32.mrf.mxu2  ;;  %v4836_v38 = vadd.f32 %v4835_v51, %v4639_v4 }
 0x539   : > { %5232 = vxpose.xlu0.b32.cont [13/16] (narrow) %v5142_v19, 8 }
 0x53c   : > { %v4998_v23 = vpop.f32.mrf.mxu0  ;;  %v5149_v43 = vpop.f32.mrf.mxu1 }
 0x53d   : > { %v4999_v39 = vadd.f32 %v4998_v23, %v4812_v56  ;;  %v4649_v23 = vadd.f32 %v4648_v35, %v4480_v5  ;;  %v9653_v5 = vld [vmem:[#allocation15_spill] sm:$0xff] }
 0x53f   : > { %5061 = vmatmul.f32.gmra.mxu0 %v9651_v50  ;;  %5212 = vmatmul.f32.gmra.mxu1 %v8890_v61  ;;  %v5146_v9 = vadd.f32 %v5145_v0, %v4999_v39  ;;  %v4847_v45 = vpop.f32.mrf.mxu3  ;;  %v4653_v54 = vpop.f32.mrf.mxu2 }
 0x540   : > { %v4848_v51 = vadd.f32 %v4847_v45, %v4649_v23 }
 0x541   : > { %5233 = vxpose.xlu0.b32.cont [14/16] (narrow) %v5146_v9, 8 }
 0x544   : > { %v5002_v59 = vpop.f32.mrf.mxu0  ;;  %v5153_v18 = vpop.f32.mrf.mxu1 }
 0x545   : > { %v5003_v16 = vadd.f32 %v5002_v59, %v4818_v20 }
 0x547   : > { %5065 = vmatmul.f32.gmra.mxu0 %v8890_v61  ;;  %5216 = vmatmul.f32.gmra.mxu1 %v8915_v26  ;;  %v5150_v7 = vadd.f32 %v5149_v43, %v5003_v16  ;;  %v4853_v17 = vpop.f32.mrf.mxu3  ;;  %v4658_v48 = vpop.f32.mrf.mxu2 }
 0x548   : > { %v4659_v36 = vadd.f32 %v4658_v48, %v4488_v24  ;;  %v9657_v24 = vld [vmem:[#allocation20_spill] sm:$0xff] }
 0x549   : > { %5234 = vxpose.xlu0.b32.cont [15/16] (narrow) %v5150_v7, 8 }
 0x54c   : > { %v5006_v42 = vpop.f32.mrf.mxu0  ;;  %v5157_v57 = vpop.f32.mrf.mxu1 }
 0x54d   : > { %v5007_v40 = vadd.f32 %v5006_v42, %v4824_v12 }
 0x54f   : > { %5069 = vmatmul.f32.gmra.mxu0 %v8915_v26  ;;  %v5154_v28 = vadd.f32 %v5153_v18, %v5007_v40  ;;  %v4476_v26 = vadd.f32 %v8957_v25, %v8968_v46  ;;  %v4859_v30 = vpop.f32.mrf.mxu3  ;;  %v4663_v53 = vpop.f32.mrf.mxu2  ;;  %v4484_v46 = vadd.f32 %v8981_v31, %v8988_v63  ;;  %v4492_v63 = vadd.f32 %v8999_v8, %v9006_v11 }
 0x550   : > { %v4860_v35 = vadd.f32 %v4859_v30, %v4659_v36  ;;  %v4500_v11 = vadd.f32 %v9017_v34, %v9024_v32 }
 0x551   : > { %5235 = vxpose.xlu0.b32.end [16/16] (narrow) %v5154_v28, 8  ;;  %v4644_v14 = vadd.f32 %v4643_v1, %v4476_v26  ;;  %v4654_v9 = vadd.f32 %v4653_v54, %v4484_v46  ;;  %v4664_v37 = vadd.f32 %v4663_v53, %v4492_v63 }
 0x553   : > { %v4842_v50 = vadd.f32 %v4841_v41, %v4644_v14  ;;  %v4854_v18 = vadd.f32 %v4853_v17, %v4654_v9 }
 0x554   : > { %v5010_v61 = vpop.f32.mrf.mxu0  ;;  %v5161_v22 = vpop.f32.mrf.mxu1 }
 0x555   : > { %v5011_v3 = vadd.f32 %v5010_v61, %v4830_v47 }
 0x557   : > { %v5158_v0 = vadd.f32 %v5157_v57, %v5011_v3  ;;  %v4865_v1 = vpop.f32.mrf.mxu3  ;;  %v4668_v59 = vpop.f32.mrf.mxu2 }
 0x558   : > { %v4866_v28 = vadd.f32 %v4865_v1, %v4664_v37  ;;  %v4669_v61 = vadd.f32 %v4668_v59, %v4496_v52 }
 0x559   : > { %5252 = vxpose.xlu1.b32.start [1/16] (narrow) %v5158_v0, 8 }
 0x55c   : > { %v5014_v58 = vpop.f32.mrf.mxu0  ;;  %v5165_v49 = vpop.f32.mrf.mxu1 }
 0x55d   : > { %v5015_v55 = vadd.f32 %v5014_v58, %v4836_v38 }
 0x55f   : > { %v5162_v10 = vadd.f32 %v5161_v22, %v5015_v55  ;;  %v4871_v7 = vpop.f32.mrf.mxu3  ;;  %v4673_v42 = vpop.f32.mrf.mxu2 }
 0x560   : > { %v4872_v54 = vadd.f32 %v4871_v7, %v4669_v61  ;;  %v4674_v17 = vadd.f32 %v4673_v42, %v4500_v11  ;;  %v9658_v42 = vld [vmem:[#allocation21_spill] sm:$0xff] }
 0x561   : > { %5253 = vxpose.xlu1.b32.cont [2/16] (narrow) %v5162_v10, 8 }
 0x564   : > { %v5018_v19 = vpop.f32.mrf.mxu0  ;;  %v5169_v60 = vpop.f32.mrf.mxu1 }
 0x565   : > { %v5019_v56 = vadd.f32 %v5018_v19, %v4842_v50 }
 0x567   : > { %v5166_v43 = vadd.f32 %v5165_v49, %v5019_v56  ;;  %v4877_v44 = vpop.f32.mrf.mxu3  ;;  %v4678_v22 = vpop.f32.mrf.mxu2 }
 0x568   : > { %v4878_v49 = vadd.f32 %v4877_v44, %v4674_v17  ;;  %v4679_v14 = vadd.f32 %v4678_v22, %v4504_v2  ;;  %v9660_v22 = vld [vmem:[#allocation28_spill] sm:$0xff] }
 0x569   : > { %5254 = vxpose.xlu1.b32.cont [3/16] (narrow) %v5166_v43, 8 }
 0x56c   : > { %v5022_v39 = vpop.f32.mrf.mxu0  ;;  %v5173_v25 = vpop.f32.mrf.mxu1 }
 0x56d   : > { %v5023_v15 = vadd.f32 %v5022_v39, %v4848_v51 }
 0x56f   : > { %v5170_v20 = vadd.f32 %v5169_v60, %v5023_v15  ;;  %v4883_v0 = vpop.f32.mrf.mxu3  ;;  %v4683_v58 = vpop.f32.mrf.mxu2  ;;  %v9652_v60 = vld [vmem:[#allocation18_spill] sm:$0xff] }
 0x570   : > { %v4884_v19 = vadd.f32 %v4883_v0, %v4679_v14  ;;  %v4508_v30 = vadd.f32 %v9653_v5, %v9652_v60  ;;  %v5428_v60 = vld [vmem:[%s9202_s6] ss:$0 sm:$0xff] }
 0x571   : > { %5255 = vxpose.xlu1.b32.cont [4/16] (narrow) %v5170_v20, 8 }
 0x572   : > { %v4684_v23 = vadd.f32 %v4683_v58, %v4508_v30 }
 0x574   : > { %v5026_v62 = vpop.f32.mrf.mxu0  ;;  %v5177_v21 = vpop.f32.mrf.mxu1 }
 0x575   : > { %v5027_v16 = vadd.f32 %v5026_v62, %v4854_v18 }
 0x577   : > { %v5174_v41 = vadd.f32 %v5173_v25, %v5027_v16  ;;  %v4889_v10 = vpop.f32.mrf.mxu3  ;;  %v4688_v50 = vpop.f32.mrf.mxu2  ;;  %v4512_v25 = vadd.f32 %v9655_v6, %v9654_v27 }
 0x578   : > { %v4890_v51 = vadd.f32 %v4889_v10, %v4684_v23 }
 0x579   : > { %5256 = vxpose.xlu1.b32.cont [5/16] (narrow) %v5174_v41, 8  ;;  %v4689_v1 = vadd.f32 %v4688_v50, %v4512_v25 }
 0x57c   : > { %v5030_v12 = vpop.f32.mrf.mxu0  ;;  %v5181_v31 = vpop.f32.mrf.mxu1 }
 0x57d   : > { %v5031_v57 = vadd.f32 %v5030_v12, %v4860_v35  ;;  %v5236_v5 = vpop.trf.xlu0 }
 0x57e   : > { %v5288_v23 = vadd.f32 %v5428_v60, %v5236_v5 }
 0x57f   : > { %v5178_v40 = vadd.f32 %v5177_v21, %v5031_v57  ;;  %v4895_v53 = vpop.f32.mrf.mxu3  ;;  %v4693_v46 = vpop.f32.mrf.mxu2  ;;  %v9656_v21 = vld [vmem:[#allocation19_spill] sm:$0xff]  ;;  %v9659_v57 = vld [vmem:[#allocation22_spill] sm:$0xff] }
 0x580   : > { %v4896_v59 = vadd.f32 %v4895_v53, %v4689_v1  ;;  %v4516_v16 = vadd.f32 %v9657_v24, %v9656_v21  ;;  %v4520_v37 = vadd.f32 %v9659_v57, %v9658_v42 }
 0x581   : > { %5257 = vxpose.xlu1.b32.cont [6/16] (narrow) %v5178_v40, 8 }
 0x582   : > { %v4694_v41 = vadd.f32 %v4693_v46, %v4516_v16 }
 0x584   : > { %v5034_v45 = vpop.f32.mrf.mxu0  ;;  %v5185_v13 = vpop.f32.mrf.mxu1 }
 0x585   : > { %v5035_v47 = vadd.f32 %v5034_v45, %v4866_v28 }
 0x587   : > { %v5182_v33 = vadd.f32 %v5181_v31, %v5035_v47  ;;  %v4901_v18 = vpop.f32.mrf.mxu3  ;;  %v4698_v7 = vpop.f32.mrf.mxu2 }
 0x588   : > { %v4902_v31 = vadd.f32 %v4901_v18, %v4694_v41  ;;  %v4699_v28 = vadd.f32 %v4698_v7, %v4520_v37 }
 0x589   : > { %5258 = vxpose.xlu1.b32.cont [7/16] (narrow) %v5182_v33, 8  ;;  %v9661_v33 = vld [vmem:[#allocation23_spill] sm:$0xff] }
 0x58c   : > { %v5038_v3 = vpop.f32.mrf.mxu0  ;;  %v5189_v8 = vpop.f32.mrf.mxu1 }
 0x58d   : > { %v5039_v4 = vadd.f32 %v5038_v3, %v4872_v54  ;;  %v4524_v54 = vadd.f32 %v9661_v33, %v9660_v22 }
 0x58f   : > { %v5186_v38 = vadd.f32 %v5185_v13, %v5039_v4  ;;  %v4907_v44 = vpop.f32.mrf.mxu3  ;;  %v4703_v13 = vpop.f32.mrf.mxu2 }
 0x590   : > { %v4908_v47 = vadd.f32 %v4907_v44, %v4699_v28 }
 0x591   : > { %5259 = vxpose.xlu1.b32.cont [8/16] (narrow) %v5186_v38, 8 }
 0x594   : > { %v5042_v26 = vpop.f32.mrf.mxu0  ;;  %v5193_v29 = vpop.f32.mrf.mxu1 }
 0x595   : > { %v5043_v55 = vadd.f32 %v5042_v26, %v4878_v49  ;;  %v9662_v49 = vld [vmem:[#allocation31_spill] sm:$0xff]  ;;  %v9663_v26 = vld [vmem:[#allocation29_spill] sm:$0xff] }
 0x597   : > { %v5190_v48 = vadd.f32 %v5189_v8, %v5043_v55  ;;  %v4704_v8 = vadd.f32 %v4703_v13, %v4524_v54  ;;  %v4913_v4 = vpop.f32.mrf.mxu3  ;;  %v4708_v0 = vpop.f32.mrf.mxu2 }
 0x599   : > { %5260 = vxpose.xlu1.b32.cont [9/16] (narrow) %v5190_v48, 8  ;;  %v4914_v17 = vadd.f32 %v4913_v4, %v4704_v8 }
 0x59c   : > { %v5046_v34 = vpop.f32.mrf.mxu0  ;;  %v5197_v32 = vpop.f32.mrf.mxu1 }
 0x59d   : > { %v5047_v56 = vadd.f32 %v5046_v34, %v4884_v19 }
 0x59f   : > { %v5194_v43 = vadd.f32 %v5193_v29, %v5047_v56  ;;  %v4528_v29 = vadd.f32 %v9663_v26, %v9662_v49  ;;  %v4919_v48 = vpop.f32.mrf.mxu3 }
 0x5a1   : > { %5261 = vxpose.xlu1.b32.cont [10/16] (narrow) %v5194_v43, 8  ;;  %v4709_v55 = vadd.f32 %v4708_v0, %v4528_v29 }
 0x5a3   : > { %v4920_v10 = vadd.f32 %v4919_v48, %v4709_v55 }
 0x5a4   : > { %v5050_v39 = vpop.f32.mrf.mxu0  ;;  %v5201_v9 = vpop.f32.mrf.mxu1 }
 0x5a5   : > { %v5051_v15 = vadd.f32 %v5050_v39, %v4890_v51 }
 0x5a7   : > { %v5198_v20 = vadd.f32 %v5197_v32, %v5051_v15 }
 0x5a9   : > { %5262 = vxpose.xlu1.b32.cont [11/16] (narrow) %v5198_v20, 8 }
 0x5ac   : > { %v5054_v62 = vpop.f32.mrf.mxu0  ;;  %v5205_v12 = vpop.f32.mrf.mxu1 }
 0x5ad   : > { %v5055_v36 = vadd.f32 %v5054_v62, %v4896_v59 }
 0x5af   : > { %v5202_v35 = vadd.f32 %v5201_v9, %v5055_v36 }
 0x5b1   : > { %5263 = vxpose.xlu1.b32.cont [12/16] (narrow) %v5202_v35, 8 }
 0x5b4   : > { %v5058_v63 = vpop.f32.mrf.mxu0  ;;  %v5209_v52 = vpop.f32.mrf.mxu1 }
 0x5b5   : > { %v5059_v40 = vadd.f32 %v5058_v63, %v4902_v31 }
 0x5b7   : > { %v5206_v45 = vadd.f32 %v5205_v12, %v5059_v40 }
 0x5b9   : > { %5264 = vxpose.xlu1.b32.cont [13/16] (narrow) %v5206_v45, 8 }
 0x5bc   : > { %v5062_v61 = vpop.f32.mrf.mxu0  ;;  %v5213_v38 = vpop.f32.mrf.mxu1 }
 0x5bd   : > { %v5063_v3 = vadd.f32 %v5062_v61, %v4908_v47 }
 0x5bf   : > { %v5210_v11 = vadd.f32 %v5209_v52, %v5063_v3 }
 0x5c1   : > { %5265 = vxpose.xlu1.b32.cont [14/16] (narrow) %v5210_v11, 8 }
 0x5c4   : > { %v5066_v58 = vpop.f32.mrf.mxu0  ;;  %v5217_v34 = vpop.f32.mrf.mxu1 }
 0x5c5   : > { %v5067_v2 = vadd.f32 %v5066_v58, %v4914_v17 }
 0x5c7   : > { %v5214_v14 = vadd.f32 %v5213_v38, %v5067_v2 }
 0x5c9   : > { %5266 = vxpose.xlu1.b32.cont [15/16] (narrow) %v5214_v14, 8 }
 0x5cc   : > { %v5070_v50 = vpop.f32.mrf.mxu0 }
 0x5cd   : > { %v5071_v19 = vadd.f32 %v5070_v50, %v4920_v10 }
 0x5cf   : > { %v5218_v32 = vadd.f32 %v5217_v34, %v5071_v19 }
 0x5d1   : > { %5267 = vxpose.xlu1.b32.end [16/16] (narrow) %v5218_v32, 8 }
 0x5fd   : > { %v5268_v30 = vpop.trf.xlu1 }
 0x5fe   : > { %v5289_v56 = vadd.f32 %v5428_v60, %v5268_v30 }
 0x600   : > { %v5292_v43 = vrot.slane %v5289_v56, 7 }
 0x602   : > { %v5294_v53 = vsel %vm5293_vm1, %v5292_v43, %v5288_v23 }
 0x603   : > { %5296 = vst [vmem:[%s284_s16] sm:$0x3] %v5294_v53 }
 0x604   : > { %5713 = shalt.err (!%p5710_p3)
}
 0x605   : > { %5387 = dma.vmem_to_hbm [thread:$0]  (%p5828_p5), %s5311_s17, 32, %s5313_s18, %s5298_s28  }
 0x606 PF: > { %p5393_p4 = scmp.ge.s32.totalorder %s5748_s27, 2  ;;  %s5324_s22 = sand.u32 1, %s5736_s24  }
 0x607   : > { %s5325_s13 = scalar_lea.sflag [#allocation3], %s5324_s22 }
 0x608   : > { %p5390_p7 = pnand %p5393_p4, %p5832_p6 }
 0x60a   : > { %p5391_p8 = pneg %p5390_p7 }
 0x60c   : > { %5731 = dma.done.wait (%p5391_p8), %s5325_s13, 32  }
 0x60d   : > { %5733 = vsyncadd (%p5391_p8), %s5325_s13, 4294967264  ;;  %p17_p9 = scmp.ge.s32.totalorder %s5815_s30, 10   ;;  %s9664_s24 = smov %s5740_s25 }
 0x60e   : > { %s9665_s25 = smov %s5744_s26  ;;  %s9666_s26 = smov %s5826_s10 }
 0x60f   : > { %s9667_s27 = smov %s5815_s30  ;;  %19 = sbr.rel (!%p17_p9) target bundleno = 3 (0x3), region = 83 }
 0x614   :  { %5331 = vsyncpa [#allocation3], 1 }
 0x615   :  { %5333 = vsyncpa [#allocation3 + $0x1], 1 }

</bundles_post_ra>
